<compile_context>
chip_gen: v6e
topology: v6e:2x2x1
jax: 0.10.0
libtpu: 0.0.40
codegen_flags: <defaults>
</compile_context>

<pallas_src>
import math

import jax
import jax.numpy as jnp
from jax.experimental import pallas as pl
from jax.experimental.pallas import tpu as pltpu


# ----------------------- generation-aware VMEM budget -----------------------

_VMEM_LIMIT_CACHE = []


def _vmem_limit():
    """vmem_limit_bytes derived from the chip (v5e/v6e: 128 MiB physical VMEM,
    v7x: 64 MiB).  Blocks here are tiny, so this is just headroom policy."""
    if not _VMEM_LIMIT_CACHE:
        try:
            cap = int(pltpu.get_tpu_info().vmem_capacity_bytes)
        except Exception:  # pragma: no cover - conservative fallback
            cap = 128 << 20
        _VMEM_LIMIT_CACHE.append(max(16 << 20, min(cap // 2, 64 << 20)))
    return _VMEM_LIMIT_CACHE[0]


# ----------------------------- Pallas kernels -----------------------------

def _conv_rows_kernel(x_ref, t_ref, b_ref, o_ref):
    """Per-image conv as kh row-shifted GEMMs against block-Toeplitz weights.

    x_ref: [1, Hp, W*Cin]        bf16 activation (H zero-padded; W pad/stride
                                 are folded into t_ref)
    t_ref: [kh, W*Cin, Wo*Cout]  bf16 BN-folded block-Toeplitz weights
    b_ref: [1, Wo*Cout]          f32 bias, pre-tiled over Wo
    o_ref: [1, Hout, Wo*Cout]    bf16, Hout = Hp - kh + 1 (stride-1 rows;
                                 H-stride>1 is a wrapper-side row subsample)
    """
    hout = o_ref.shape[1]
    kh = t_ref.shape[0]
    x = x_ref[0]                                           # [Hp, W*Cin] bf16
    acc = None
    for ki in range(kh):
        # Full-height dot, then shift the f32 result rows by ki: avoids any
        # sub-tile slicing of the packed bf16 input.
        p = jnp.dot(x, t_ref[ki], preferred_element_type=jnp.float32)
        contrib = p[ki:ki + hout]                          # [Hout, Wo*Cout] f32
        acc = contrib if acc is None else acc + contrib
    o_ref[0] = jnp.maximum(acc + b_ref[...], 0.0).astype(o_ref.dtype)


def _make_pool_kernel(kh, kw, mode):
    """max/avg pool over kh*kw in-VMEM shifted slices of one padded image."""

    def kernel(x_ref, o_ref):
        # x_ref: [1, Hp, Wp, C] bf16 ; o_ref: [1, Ho1, Wo1, C] bf16 (stride 1)
        ho, wo = o_ref.shape[1], o_ref.shape[2]
        x = x_ref[0].astype(jnp.float32)       # f32 VPU math (v5e-safe)
        acc = x[0:ho, 0:wo, :]
        for t in range(1, kh * kw):
            ki, kj = divmod(t, kw)
            s = x[ki:ki + ho, kj:kj + wo, :]
            acc = jnp.maximum(acc, s) if mode == "max" else acc + s
        if mode == "avg":
            # divides by kh*kw including zero pad (count_include_pad=True,
            # the torch default; the fused branch_pool GEMM relies on this).
            acc = acc * (1.0 / (kh * kw))
        o_ref[0] = acc.astype(o_ref.dtype)

    return kernel


def _mixed_1x1_kernel(x_ref, p_ref, wx_ref, wp_ref, b_ref, o_ref):
    """Fused InceptionA 1x1 block: out = relu(x @ Wx + avgpool(x) @ Wp + b)."""
    acc = jnp.dot(x_ref[...], wx_ref[...], preferred_element_type=jnp.float32)
    acc = acc + jnp.dot(p_ref[...], wp_ref[...],
                        preferred_element_type=jnp.float32)
    o_ref[...] = jnp.maximum(acc + b_ref[...], 0.0).astype(o_ref.dtype)


# ------------------------------ op wrappers -------------------------------

def conv_bn_relu(x, layer):
    """BasicConv2d: Conv2d(bias=False) + BatchNorm2d(eps=1e-3, folded) + ReLU.

    x: [B, H, W, Cin] bf16 NHWC.  Returns [B, Ho, Wo, Cout] bf16.
    """
    B, H, W, Cin = x.shape
    kh, stride, ph = layer["kh"], layer["stride"], layer["pad"]
    Wo, cout = layer["Wo"], layer["cout"]
    assert layer["T"].shape[1] == W * Cin, (layer["T"].shape, (W, Cin))
    if ph:
        x = jnp.pad(x, ((0, 0), (ph, ph), (0, 0), (0, 0)))  # H pad only
    Hp = H + 2 * ph
    hout = Hp - kh + 1                                       # stride-1 rows
    xf = x.reshape(B, Hp, W * Cin)                           # lane-dense W*Cin

    y = pl.pallas_call(
        _conv_rows_kernel,
        out_shape=jax.ShapeDtypeStruct((B, hout, Wo * cout), jnp.bfloat16),
        grid=(B,),
        in_specs=[
            pl.BlockSpec((1, Hp, W * Cin), lambda b: (b, 0, 0)),
            pl.BlockSpec(layer["T"].shape, lambda b: (0, 0, 0)),
            pl.BlockSpec((1, Wo * cout), lambda b: (0, 0)),
        ],
        out_specs=pl.BlockSpec((1, hout, Wo * cout), lambda b: (b, 0, 0)),
        compiler_params=pltpu.CompilerParams(
            dimension_semantics=("parallel",),
            vmem_limit_bytes=_vmem_limit()),
    )(xf, layer["T"], layer["b"])

    y = y.reshape(B, hout, Wo, cout)
    if stride > 1:
        y = y[:, ::stride]          # tiny wrapper-side H subsample (stem only)
    return y


def pool2d(x, kh, kw, stride, pad, mode):
    """max_pool2d / avg_pool2d with in-kernel window extraction.

    Stride > 1 is handled by subsampling the (small, stride-1) output.
    """
    assert mode in ("max", "avg")
    # max pool would need -inf padding; all max call sites here use pad=0.
    assert not (mode == "max" and pad > 0)
    if pad:
        x = jnp.pad(x, ((0, 0), (pad, pad), (pad, pad), (0, 0)))
    B, Hp, Wp, C = x.shape
    ho1, wo1 = Hp - kh + 1, Wp - kw + 1

    y = pl.pallas_call(
        _make_pool_kernel(kh, kw, mode),
        out_shape=jax.ShapeDtypeStruct((B, ho1, wo1, C), jnp.bfloat16),
        grid=(B,),
        in_specs=[pl.BlockSpec((1, Hp, Wp, C), lambda b: (b, 0, 0, 0))],
        out_specs=pl.BlockSpec((1, ho1, wo1, C), lambda b: (b, 0, 0, 0)),
        compiler_params=pltpu.CompilerParams(
            dimension_semantics=("parallel",),
            vmem_limit_bytes=_vmem_limit()),
    )(x)

    if stride > 1:
        y = y[:, ::stride, ::stride, :]
    return y


def mixed_1x1(x, px, layer):
    """All four InceptionA 1x1 convs as one two-operand GEMM."""
    B, H, W, C = x.shape
    M = B * H * W
    nout = layer["b"].shape[1]
    xr = x.reshape(M, C)
    pr = px.reshape(M, C)

    y = pl.pallas_call(
        _mixed_1x1_kernel,
        out_shape=jax.ShapeDtypeStruct((M, nout), jnp.bfloat16),
        grid=(1,),
        in_specs=[
            pl.BlockSpec((M, C), lambda i: (0, 0)),
            pl.BlockSpec((M, C), lambda i: (0, 0)),
            pl.BlockSpec((C, nout), lambda i: (0, 0)),
            pl.BlockSpec((C, nout), lambda i: (0, 0)),
            pl.BlockSpec((1, nout), lambda i: (0, 0)),
        ],
        out_specs=pl.BlockSpec((M, nout), lambda i: (0, 0)),
        compiler_params=pltpu.CompilerParams(
            dimension_semantics=("arbitrary",),
            vmem_limit_bytes=_vmem_limit()),
    )(xr, pr, layer["wx"], layer["wp"], layer["b"])
    return y.reshape(B, H, W, nout)


# ---------------------------- params & packing ----------------------------

_SHAPES = {
    "conv1":   (3, 3, 3, 8),     # stem Conv2d_1a_3x3 (stride 2)
    "conv2":   (3, 3, 8, 16),    # stem Conv2d_2b_3x3
    "a_1x1":   (1, 1, 16, 8),    # InceptionA branch1x1
    "a_5x5_1": (1, 1, 16, 6),    # InceptionA branch5x5_1
    "a_5x5_2": (5, 5, 6, 8),     # InceptionA branch5x5_2
    "a_3x3_1": (1, 1, 16, 8),    # InceptionA branch3x3dbl_1
    "a_3x3_2": (3, 3, 8, 12),    # InceptionA branch3x3dbl_2
    "a_3x3_3": (3, 3, 12, 12),   # InceptionA branch3x3dbl_3
    "a_pool":  (1, 1, 16, 4),    # InceptionA branch_pool
}

N_FEATURES = 8 + 8 + 12 + 4      # = 32 (scaled-down stand-in for 2048)


def _make_conv_params(key, kh, kw, cin, cout):
    ks = jax.random.split(key, 5)
    fan_in = kh * kw * cin
    w = jax.random.normal(ks[0], (kh, kw, cin, cout), jnp.float32) / math.sqrt(fan_in)
    gamma = 1.0 + 0.1 * jax.random.normal(ks[1], (cout,), jnp.float32)
    beta = 0.1 * jax.random.normal(ks[2], (cout,), jnp.float32)
    mean = 0.1 * jax.random.normal(ks[3], (cout,), jnp.float32)
    var = 0.5 + jnp.abs(jax.random.normal(ks[4], (cout,), jnp.float32))
    eps = 1e-3                    # BatchNorm2d eps in torchvision's BasicConv2d
    scale = gamma / jnp.sqrt(var + eps)
    bias = beta - mean * scale
    return {"w": w, "scale": scale, "bias": bias}


def init_params(key):
    keys = jax.random.split(key, len(_SHAPES))
    return {n: _make_conv_params(k, *s) for k, (n, s) in zip(keys, _SHAPES.items())}


def _pack_toeplitz(w_folded, bias, w_in, stride, pad):
    """(kh,kw,cin,cout) BN-folded weights -> kh block-Toeplitz matrices
    T[ki] of shape [w_in*cin, Wo*cout] with W-padding and W-stride folded in,
    plus the bias tiled to the lane-dense [1, Wo*cout] layout."""
    kh, kw, cin, cout = w_folded.shape
    wo = (w_in + 2 * pad - kw) // stride + 1
    t = jnp.zeros((kh, w_in * cin, wo * cout), jnp.float32)
    for o in range(wo):
        for kj in range(kw):
            wi = stride * o + kj - pad
            if 0 <= wi < w_in:
                t = t.at[:, wi * cin:(wi + 1) * cin,
                         o * cout:(o + 1) * cout].set(w_folded[:, kj])
    b_row = jnp.tile(bias, wo)[None, :].astype(jnp.float32)
    return {"T": t.astype(jnp.bfloat16), "b": b_row,
            "kh": kh, "stride": stride, "pad": pad, "Wo": wo, "cout": cout}


def prepare_params(raw, image_hw=(32, 32)):
    """One-time packing: fold BN scale into conv weights, build the per-layer
    block-Toeplitz GEMM operands (bf16), and fuse the four InceptionA 1x1
    convs into one two-operand GEMM."""

    def folded(name):
        p = raw[name]
        return p["w"] * p["scale"][None, None, None, :]

    def out_sz(s, k, st, p):
        return (s + 2 * p - k) // st + 1

    _, W0 = image_hw
    w1 = out_sz(W0, 3, 2, 0)           # width after conv1
    w2 = out_sz(w1, 3, 1, 1)           # width after conv2
    w3 = out_sz(w2, 3, 2, 0)           # width after stem maxpool

    prep = {
        "conv1":   _pack_toeplitz(folded("conv1"),   raw["conv1"]["bias"],   W0, 2, 0),
        "conv2":   _pack_toeplitz(folded("conv2"),   raw["conv2"]["bias"],   w1, 1, 1),
        "a_5x5_2": _pack_toeplitz(folded("a_5x5_2"), raw["a_5x5_2"]["bias"], w3, 1, 2),
        "a_3x3_2": _pack_toeplitz(folded("a_3x3_2"), raw["a_3x3_2"]["bias"], w3, 1, 1),
        "a_3x3_3": _pack_toeplitz(folded("a_3x3_3"), raw["a_3x3_3"]["bias"], w3, 1, 1),
    }

    # Fused 1x1 GEMM: out = x @ wx + avg_pool3x3(x) @ wp  (+bias, ReLU)
    #   columns 0..21  -> branch1x1 | branch5x5_1 | branch3x3dbl_1  (from x)
    #   columns 22..25 -> branch_pool                               (from pool)
    cin = _SHAPES["a_1x1"][2]
    top = jnp.concatenate([folded(n).reshape(cin, -1)
                           for n in ("a_1x1", "a_5x5_1", "a_3x3_1")], axis=-1)
    wpool = folded("a_pool").reshape(cin, -1)
    c_top, c_pool = top.shape[1], wpool.shape[1]
    wx = jnp.concatenate([top, jnp.zeros((cin, c_pool), jnp.float32)], axis=-1)
    wp = jnp.concatenate([jnp.zeros((cin, c_top), jnp.float32), wpool], axis=-1)
    bias = jnp.concatenate([raw[n]["bias"] for n in
                            ("a_1x1", "a_5x5_1", "a_3x3_1", "a_pool")])
    prep["mixed_1x1"] = {
        "wx": wx.astype(jnp.bfloat16),
        "wp": wp.astype(jnp.bfloat16),
        "b": bias[None, :].astype(jnp.float32),
        "splits": (_SHAPES["a_1x1"][3], _SHAPES["a_5x5_1"][3],
                   _SHAPES["a_3x3_1"][3], _SHAPES["a_pool"][3]),
    }
    return prep


# --------------------------------- forward --------------------------------

def inception_forward(images_nchw, prep):
    """Mirrors Inception.forward: [B,3,H,W] -> backbone features [B,C,1,1]."""
    # NCHW -> NHWC, bf16 activations end-to-end (f32 accumulate in-kernel).
    x = jnp.transpose(images_nchw, (0, 2, 3, 1)).astype(jnp.bfloat16)

    # stem (BasicConv2d blocks + maxpool)
    x = conv_bn_relu(x, prep["conv1"])
    x = conv_bn_relu(x, prep["conv2"])
    x = pool2d(x, 3, 3, 2, 0, "max")

    # InceptionA-style mixed block: all four 1x1 convs in ONE fused GEMM.
    px = pool2d(x, 3, 3, 1, 1, "avg")
    y = mixed_1x1(x, px, prep["mixed_1x1"])
    c1, c5, c3, _ = prep["mixed_1x1"]["splits"]
    b1 = y[..., :c1]
    b5 = y[..., c1:c1 + c5]
    b3 = y[..., c1 + c5:c1 + c5 + c3]
    bp = y[..., c1 + c5 + c3:]

    b5 = conv_bn_relu(b5, prep["a_5x5_2"])
    b3 = conv_bn_relu(b3, prep["a_3x3_2"])
    b3 = conv_bn_relu(b3, prep["a_3x3_3"])
    x = jnp.concatenate([b1, b5, b3, bp], axis=-1)

    # AdaptiveAvgPool2d((1,1)) + Dropout (identity in eval).  Per perf review,
    # at [B, 7*7, 32] (~12 KB) a pallas_call is pure launch overhead, so the
    # global mean stays an XLA fusion.
    feat = jnp.mean(x.astype(jnp.float32), axis=(1, 2))
    return feat[:, :, None, None]          # Sequential keeps NCHW [B, C, 1, 1]


# ------------------------- pure-JAX reference path -------------------------

def _im2col_ref(x, kh, kw, stride, pad):
    if pad:
        x = jnp.pad(x, ((0, 0), (pad, pad), (pad, pad), (0, 0)))
    B, H, W, C = x.shape
    Ho = (H - kh) // stride + 1
    Wo = (W - kw) // stride + 1
    if kh == 1 and kw == 1 and stride == 1:
        return x.reshape(B * Ho * Wo, C), (B, Ho, Wo)
    cols = [x[:, i:i + stride * Ho:stride, j:j + stride * Wo:stride, :]
            for i in range(kh) for j in range(kw)]
    patches = jnp.concatenate(cols, axis=-1)
    return patches.reshape(B * Ho * Wo, kh * kw * C), (B, Ho, Wo)


def _conv_ref(x, w, scale, bias, stride=1, pad=0):
    kh, kw, cin, cout = w.shape
    patches, (B, Ho, Wo) = _im2col_ref(x, kh, kw, stride, pad)
    y = jnp.dot(patches, w.reshape(kh * kw * cin, cout))
    y = y * scale[None, :] + bias[None, :]
    return jnp.maximum(y, 0.0).reshape(B, Ho, Wo, cout)


def _pool_ref(x, kh, kw, stride, pad, mode):
    if pad:
        x = jnp.pad(x, ((0, 0), (pad, pad), (pad, pad), (0, 0)))
    B, H, W, C = x.shape
    Ho = (H - kh) // stride + 1
    Wo = (W - kw) // stride + 1
    wins = jnp.stack([x[:, i:i + stride * Ho:stride, j:j + stride * Wo:stride, :]
                      for i in range(kh) for j in range(kw)], axis=0)
    return jnp.max(wins, 0) if mode == "max" else jnp.mean(wins, 0)


def inception_reference(images_nchw, raw):
    """Pure-JAX f32 reference with the original (unfused, unfolded) structure."""
    x = jnp.transpose(images_nchw, (0, 2, 3, 1)).astype(jnp.float32)
    x = _conv_ref(x, **raw["conv1"], stride=2, pad=0)
    x = _conv_ref(x, **raw["conv2"], stride=1, pad=1)
    x = _pool_ref(x, 3, 3, 2, 0, "max")
    b1 = _conv_ref(x, **raw["a_1x1"])
    b5 = _conv_ref(x, **raw["a_5x5_1"])
    b5 = _conv_ref(b5, **raw["a_5x5_2"], pad=2)
    b3 = _conv_ref(x, **raw["a_3x3_1"])
    b3 = _conv_ref(b3, **raw["a_3x3_2"], pad=1)
    b3 = _conv_ref(b3, **raw["a_3x3_3"], pad=1)
    bp = _pool_ref(x, 3, 3, 1, 1, "avg")
    bp = _conv_ref(bp, **raw["a_pool"])
    x = jnp.concatenate([b1, b5, b3, bp], axis=-1)
    return jnp.mean(x, axis=(1, 2))[:, :, None, None]


if __name__ == "__main__":
    key = jax.random.PRNGKey(0)
    pkey, xkey = jax.random.split(key)
    raw = init_params(pkey)
    prep = prepare_params(raw, image_hw=(32, 32))            # one-time packing
    images = jax.random.normal(xkey, (2, 3, 32, 32), jnp.float32)   # NCHW

    fwd = jax.jit(lambda a: inception_forward(a, prep))
    out = jax.block_until_ready(fwd(images))
    ref = inception_reference(images, raw)

    assert out.shape == (2, N_FEATURES, 1, 1), out.shape
    assert bool(jnp.all(jnp.isfinite(out)))
    # bf16 activations / weights (f32 accumulate) vs. the pure-f32 reference
    max_err = float(jnp.max(jnp.abs(out - ref)))
    assert bool(jnp.allclose(out, ref, rtol=6e-2, atol=6e-2)), max_err
    print("KERNEL_OK")
</pallas_src>

<mosaic_0001>
module attributes {stable_mosaic.version = 11 : i64} {
  func.func @_conv_rows_kernel(%arg0: i32, %arg1: memref<1x32x96xbf16, #tpu.memory_space<vmem>>, %arg2: memref<3x96x120xbf16, #tpu.memory_space<vmem>>, %arg3: memref<1x120xf32, #tpu.memory_space<vmem>>, %arg4: memref<1x30x120xbf16, #tpu.memory_space<vmem>>) attributes {dimension_semantics = [#tpu.dimension_semantics<parallel>], iteration_bounds = array<i64: 2>, scalar_prefetch = 0 : i64, scratch_operands = 0 : i64, tpu.core_type = #tpu.core_type<tc>, window_params = [{transform_indices = @transform_0, window_bounds = array<i64: 1, 32, 96>}, {pipeline_mode = #tpu.pipeline_mode<synchronous>, transform_indices = @transform_1, window_bounds = array<i64: 3, 96, 120>}, {pipeline_mode = #tpu.pipeline_mode<synchronous>, transform_indices = @transform_2, window_bounds = array<i64: 1, 120>}, {transform_indices = @transform_3, window_bounds = array<i64: 1, 30, 120>}]} {
    %c0 = arith.constant 0 : index
    %c0_0 = arith.constant 0 : index
    %c0_1 = arith.constant 0 : index
    %0 = vector.load %arg1[%c0, %c0_0, %c0_1] : memref<1x32x96xbf16, #tpu.memory_space<vmem>>, vector<1x32x96xbf16>
    %1 = vector.shape_cast %0 : vector<1x32x96xbf16> to vector<32x96xbf16>
    %c0_2 = arith.constant 0 : index
    %c0_3 = arith.constant 0 : index
    %c0_4 = arith.constant 0 : index
    %2 = vector.load %arg2[%c0_2, %c0_3, %c0_4] : memref<3x96x120xbf16, #tpu.memory_space<vmem>>, vector<1x96x120xbf16>
    %3 = vector.shape_cast %2 : vector<1x96x120xbf16> to vector<96x120xbf16>
    %cst = arith.constant dense<0.000000e+00> : vector<32x120xf32>
    %4 = tpu.matmul %1, %3, %cst {dimension_numbers = #tpu.dot_dimension_numbers<[1], [0], [0], [1], [0, 0, 1, 1], [], []>} : vector<32x96xbf16>, vector<96x120xbf16>, vector<32x120xf32> -> vector<32x120xf32>
    %5 = vector.extract_strided_slice %4 {offsets = [0, 0], sizes = [30, 120], strides = [1, 1]} : vector<32x120xf32> to vector<30x120xf32>
    %c1 = arith.constant 1 : index
    %c0_5 = arith.constant 0 : index
    %c0_6 = arith.constant 0 : index
    %6 = vector.load %arg2[%c1, %c0_5, %c0_6] : memref<3x96x120xbf16, #tpu.memory_space<vmem>>, vector<1x96x120xbf16>
    %7 = vector.shape_cast %6 : vector<1x96x120xbf16> to vector<96x120xbf16>
    %cst_7 = arith.constant dense<0.000000e+00> : vector<32x120xf32>
    %8 = tpu.matmul %1, %7, %cst_7 {dimension_numbers = #tpu.dot_dimension_numbers<[1], [0], [0], [1], [0, 0, 1, 1], [], []>} : vector<32x96xbf16>, vector<96x120xbf16>, vector<32x120xf32> -> vector<32x120xf32>
    %9 = vector.extract_strided_slice %8 {offsets = [1, 0], sizes = [30, 120], strides = [1, 1]} : vector<32x120xf32> to vector<30x120xf32>
    %10 = arith.addf %5, %9 : vector<30x120xf32>
    %c2 = arith.constant 2 : index
    %c0_8 = arith.constant 0 : index
    %c0_9 = arith.constant 0 : index
    %11 = vector.load %arg2[%c2, %c0_8, %c0_9] : memref<3x96x120xbf16, #tpu.memory_space<vmem>>, vector<1x96x120xbf16>
    %12 = vector.shape_cast %11 : vector<1x96x120xbf16> to vector<96x120xbf16>
    %cst_10 = arith.constant dense<0.000000e+00> : vector<32x120xf32>
    %13 = tpu.matmul %1, %12, %cst_10 {dimension_numbers = #tpu.dot_dimension_numbers<[1], [0], [0], [1], [0, 0, 1, 1], [], []>} : vector<32x96xbf16>, vector<96x120xbf16>, vector<32x120xf32> -> vector<32x120xf32>
    %14 = vector.extract_strided_slice %13 {offsets = [2, 0], sizes = [30, 120], strides = [1, 1]} : vector<32x120xf32> to vector<30x120xf32>
    %15 = arith.addf %10, %14 : vector<30x120xf32>
    %c0_11 = arith.constant 0 : index
    %c0_12 = arith.constant 0 : index
    %16 = vector.load %arg3[%c0_11, %c0_12] : memref<1x120xf32, #tpu.memory_space<vmem>>, vector<1x120xf32>
    %17 = vector.broadcast %16 : vector<1x120xf32> to vector<30x120xf32>
    %18 = arith.addf %15, %17 : vector<30x120xf32>
    %cst_13 = arith.constant 0.000000e+00 : f32
    %19 = vector.broadcast %cst_13 : f32 to vector<30x120xf32>
    %20 = arith.maximumf %18, %19 : vector<30x120xf32>
    %21 = arith.truncf %20 : vector<30x120xf32> to vector<30x120xbf16>
    %c0_14 = arith.constant 0 : index
    %c0_15 = arith.constant 0 : index
    %c0_16 = arith.constant 0 : index
    %22 = vector.load %arg4[%c0_14, %c0_15, %c0_16] : memref<1x30x120xbf16, #tpu.memory_space<vmem>>, vector<1x30x120xbf16>
    %23 = vector.shape_cast %22 : vector<1x30x120xbf16> to vector<30x120xbf16>
    %24 = vector.shape_cast %21 : vector<30x120xbf16> to vector<1x30x120xbf16>
    tpu.vector_store %arg4[%c0_14, %c0_15, %c0_16], %24 {strides = array<i32>} : memref<1x30x120xbf16, #tpu.memory_space<vmem>>, vector<1x30x120xbf16>,
    return
  }
  func.func @transform_0(%arg0: i32) -> (i32, i32, i32) {
    %c0_i32 = arith.constant 0 : i32
    %c0_i32_0 = arith.constant 0 : i32
    %c0_i32_1 = arith.constant 0 : i32
    return %arg0, %c0_i32, %c0_i32_0 : i32, i32, i32
  }
  func.func @transform_1(%arg0: i32) -> (i32, i32, i32) {
    %c0_i32 = arith.constant 0 : i32
    %c0_i32_0 = arith.constant 0 : i32
    %c0_i32_1 = arith.constant 0 : i32
    %c0_i32_2 = arith.constant 0 : i32
    return %c0_i32, %c0_i32_0, %c0_i32_1 : i32, i32, i32
  }
  func.func @transform_2(%arg0: i32) -> (i32, i32) {
    %c0_i32 = arith.constant 0 : i32
    %c0_i32_0 = arith.constant 0 : i32
    %c0_i32_1 = arith.constant 0 : i32
    return %c0_i32, %c0_i32_0 : i32, i32
  }
  func.func @transform_3(%arg0: i32) -> (i32, i32, i32) {
    %c0_i32 = arith.constant 0 : i32
    %c0_i32_0 = arith.constant 0 : i32
    %c0_i32_1 = arith.constant 0 : i32
    return %arg0, %c0_i32, %c0_i32_0 : i32, i32, i32
  }
}

module attributes {stable_mosaic.version = 11 : i64} {
  func.func @_conv_rows_kernel(%arg0: i32, %arg1: memref<1x17x120xbf16, #tpu.memory_space<vmem>>, %arg2: memref<3x120x240xbf16, #tpu.memory_space<vmem>>, %arg3: memref<1x240xf32, #tpu.memory_space<vmem>>, %arg4: memref<1x15x240xbf16, #tpu.memory_space<vmem>>) attributes {dimension_semantics = [#tpu.dimension_semantics<parallel>], iteration_bounds = array<i64: 2>, scalar_prefetch = 0 : i64, scratch_operands = 0 : i64, tpu.core_type = #tpu.core_type<tc>, window_params = [{transform_indices = @transform_0, window_bounds = array<i64: 1, 17, 120>}, {pipeline_mode = #tpu.pipeline_mode<synchronous>, transform_indices = @transform_1, window_bounds = array<i64: 3, 120, 240>}, {pipeline_mode = #tpu.pipeline_mode<synchronous>, transform_indices = @transform_2, window_bounds = array<i64: 1, 240>}, {transform_indices = @transform_3, window_bounds = array<i64: 1, 15, 240>}]} {
    %c0 = arith.constant 0 : index
    %c0_0 = arith.constant 0 : index
    %c0_1 = arith.constant 0 : index
    %0 = vector.load %arg1[%c0, %c0_0, %c0_1] : memref<1x17x120xbf16, #tpu.memory_space<vmem>>, vector<1x17x120xbf16>
    %1 = vector.shape_cast %0 : vector<1x17x120xbf16> to vector<17x120xbf16>
    %c0_2 = arith.constant 0 : index
    %c0_3 = arith.constant 0 : index
    %c0_4 = arith.constant 0 : index
    %2 = vector.load %arg2[%c0_2, %c0_3, %c0_4] : memref<3x120x240xbf16, #tpu.memory_space<vmem>>, vector<1x120x240xbf16>
    %3 = vector.shape_cast %2 : vector<1x120x240xbf16> to vector<120x240xbf16>
    %cst = arith.constant dense<0.000000e+00> : vector<17x240xf32>
    %4 = tpu.matmul %1, %3, %cst {dimension_numbers = #tpu.dot_dimension_numbers<[1], [0], [0], [1], [0, 0, 1, 1], [], []>} : vector<17x120xbf16>, vector<120x240xbf16>, vector<17x240xf32> -> vector<17x240xf32>
    %5 = vector.extract_strided_slice %4 {offsets = [0, 0], sizes = [15, 240], strides = [1, 1]} : vector<17x240xf32> to vector<15x240xf32>
    %c1 = arith.constant 1 : index
    %c0_5 = arith.constant 0 : index
    %c0_6 = arith.constant 0 : index
    %6 = vector.load %arg2[%c1, %c0_5, %c0_6] : memref<3x120x240xbf16, #tpu.memory_space<vmem>>, vector<1x120x240xbf16>
    %7 = vector.shape_cast %6 : vector<1x120x240xbf16> to vector<120x240xbf16>
    %cst_7 = arith.constant dense<0.000000e+00> : vector<17x240xf32>
    %8 = tpu.matmul %1, %7, %cst_7 {dimension_numbers = #tpu.dot_dimension_numbers<[1], [0], [0], [1], [0, 0, 1, 1], [], []>} : vector<17x120xbf16>, vector<120x240xbf16>, vector<17x240xf32> -> vector<17x240xf32>
    %9 = vector.extract_strided_slice %8 {offsets = [1, 0], sizes = [15, 240], strides = [1, 1]} : vector<17x240xf32> to vector<15x240xf32>
    %10 = arith.addf %5, %9 : vector<15x240xf32>
    %c2 = arith.constant 2 : index
    %c0_8 = arith.constant 0 : index
    %c0_9 = arith.constant 0 : index
    %11 = vector.load %arg2[%c2, %c0_8, %c0_9] : memref<3x120x240xbf16, #tpu.memory_space<vmem>>, vector<1x120x240xbf16>
    %12 = vector.shape_cast %11 : vector<1x120x240xbf16> to vector<120x240xbf16>
    %cst_10 = arith.constant dense<0.000000e+00> : vector<17x240xf32>
    %13 = tpu.matmul %1, %12, %cst_10 {dimension_numbers = #tpu.dot_dimension_numbers<[1], [0], [0], [1], [0, 0, 1, 1], [], []>} : vector<17x120xbf16>, vector<120x240xbf16>, vector<17x240xf32> -> vector<17x240xf32>
    %14 = vector.extract_strided_slice %13 {offsets = [2, 0], sizes = [15, 240], strides = [1, 1]} : vector<17x240xf32> to vector<15x240xf32>
    %15 = arith.addf %10, %14 : vector<15x240xf32>
    %c0_11 = arith.constant 0 : index
    %c0_12 = arith.constant 0 : index
    %16 = vector.load %arg3[%c0_11, %c0_12] : memref<1x240xf32, #tpu.memory_space<vmem>>, vector<1x240xf32>
    %17 = vector.broadcast %16 : vector<1x240xf32> to vector<15x240xf32>
    %18 = arith.addf %15, %17 : vector<15x240xf32>
    %cst_13 = arith.constant 0.000000e+00 : f32
    %19 = vector.broadcast %cst_13 : f32 to vector<15x240xf32>
    %20 = arith.maximumf %18, %19 : vector<15x240xf32>
    %21 = arith.truncf %20 : vector<15x240xf32> to vector<15x240xbf16>
    %c0_14 = arith.constant 0 : index
    %c0_15 = arith.constant 0 : index
    %c0_16 = arith.constant 0 : index
    %22 = vector.load %arg4[%c0_14, %c0_15, %c0_16] : memref<1x15x240xbf16, #tpu.memory_space<vmem>>, vector<1x15x240xbf16>
    %23 = vector.shape_cast %22 : vector<1x15x240xbf16> to vector<15x240xbf16>
    %24 = vector.shape_cast %21 : vector<15x240xbf16> to vector<1x15x240xbf16>
    tpu.vector_store %arg4[%c0_14, %c0_15, %c0_16], %24 {strides = array<i32>} : memref<1x15x240xbf16, #tpu.memory_space<vmem>>, vector<1x15x240xbf16>,
    return
  }
  func.func @transform_0(%arg0: i32) -> (i32, i32, i32) {
    %c0_i32 = arith.constant 0 : i32
    %c0_i32_0 = arith.constant 0 : i32
    %c0_i32_1 = arith.constant 0 : i32
    return %arg0, %c0_i32, %c0_i32_0 : i32, i32, i32
  }
  func.func @transform_1(%arg0: i32) -> (i32, i32, i32) {
    %c0_i32 = arith.constant 0 : i32
    %c0_i32_0 = arith.constant 0 : i32
    %c0_i32_1 = arith.constant 0 : i32
    %c0_i32_2 = arith.constant 0 : i32
    return %c0_i32, %c0_i32_0, %c0_i32_1 : i32, i32, i32
  }
  func.func @transform_2(%arg0: i32) -> (i32, i32) {
    %c0_i32 = arith.constant 0 : i32
    %c0_i32_0 = arith.constant 0 : i32
    %c0_i32_1 = arith.constant 0 : i32
    return %c0_i32, %c0_i32_0 : i32, i32
  }
  func.func @transform_3(%arg0: i32) -> (i32, i32, i32) {
    %c0_i32 = arith.constant 0 : i32
    %c0_i32_0 = arith.constant 0 : i32
    %c0_i32_1 = arith.constant 0 : i32
    return %arg0, %c0_i32, %c0_i32_0 : i32, i32, i32
  }
}

module attributes {stable_mosaic.version = 11 : i64} {
  func.func @kernel(%arg0: i32, %arg1: memref<1x15x15x16xbf16, #tpu.memory_space<vmem>>, %arg2: memref<1x13x13x16xbf16, #tpu.memory_space<vmem>>) attributes {dimension_semantics = [#tpu.dimension_semantics<parallel>], iteration_bounds = array<i64: 2>, scalar_prefetch = 0 : i64, scratch_operands = 0 : i64, tpu.core_type = #tpu.core_type<tc>, window_params = [{transform_indices = @transform_0, window_bounds = array<i64: 1, 15, 15, 16>}, {transform_indices = @transform_1, window_bounds = array<i64: 1, 13, 13, 16>}]} {
    %c0 = arith.constant 0 : index
    %c0_0 = arith.constant 0 : index
    %c0_1 = arith.constant 0 : index
    %c0_2 = arith.constant 0 : index
    %0 = vector.load %arg1[%c0, %c0_0, %c0_1, %c0_2] : memref<1x15x15x16xbf16, #tpu.memory_space<vmem>>, vector<1x15x15x16xbf16>
    %1 = vector.shape_cast %0 : vector<1x15x15x16xbf16> to vector<15x15x16xbf16>
    %2 = arith.extf %1 : vector<15x15x16xbf16> to vector<15x15x16xf32>
    %3 = vector.extract_strided_slice %2 {offsets = [0, 0, 0], sizes = [13, 13, 16], strides = [1, 1, 1]} : vector<15x15x16xf32> to vector<13x13x16xf32>
    %4 = vector.extract_strided_slice %2 {offsets = [0, 1, 0], sizes = [13, 13, 16], strides = [1, 1, 1]} : vector<15x15x16xf32> to vector<13x13x16xf32>
    %5 = arith.maximumf %3, %4 : vector<13x13x16xf32>
    %6 = vector.extract_strided_slice %2 {offsets = [0, 2, 0], sizes = [13, 13, 16], strides = [1, 1, 1]} : vector<15x15x16xf32> to vector<13x13x16xf32>
    %7 = arith.maximumf %5, %6 : vector<13x13x16xf32>
    %8 = vector.extract_strided_slice %2 {offsets = [1, 0, 0], sizes = [13, 13, 16], strides = [1, 1, 1]} : vector<15x15x16xf32> to vector<13x13x16xf32>
    %9 = arith.maximumf %7, %8 : vector<13x13x16xf32>
    %10 = vector.extract_strided_slice %2 {offsets = [1, 1, 0], sizes = [13, 13, 16], strides = [1, 1, 1]} : vector<15x15x16xf32> to vector<13x13x16xf32>
    %11 = arith.maximumf %9, %10 : vector<13x13x16xf32>
    %12 = vector.extract_strided_slice %2 {offsets = [1, 2, 0], sizes = [13, 13, 16], strides = [1, 1, 1]} : vector<15x15x16xf32> to vector<13x13x16xf32>
    %13 = arith.maximumf %11, %12 : vector<13x13x16xf32>
    %14 = vector.extract_strided_slice %2 {offsets = [2, 0, 0], sizes = [13, 13, 16], strides = [1, 1, 1]} : vector<15x15x16xf32> to vector<13x13x16xf32>
    %15 = arith.maximumf %13, %14 : vector<13x13x16xf32>
    %16 = vector.extract_strided_slice %2 {offsets = [2, 1, 0], sizes = [13, 13, 16], strides = [1, 1, 1]} : vector<15x15x16xf32> to vector<13x13x16xf32>
    %17 = arith.maximumf %15, %16 : vector<13x13x16xf32>
    %18 = vector.extract_strided_slice %2 {offsets = [2, 2, 0], sizes = [13, 13, 16], strides = [1, 1, 1]} : vector<15x15x16xf32> to vector<13x13x16xf32>
    %19 = arith.maximumf %17, %18 : vector<13x13x16xf32>
    %20 = arith.truncf %19 : vector<13x13x16xf32> to vector<13x13x16xbf16>
    %c0_3 = arith.constant 0 : index
    %c0_4 = arith.constant 0 : index
    %c0_5 = arith.constant 0 : index
    %c0_6 = arith.constant 0 : index
    %21 = vector.load %arg2[%c0_3, %c0_4, %c0_5, %c0_6] : memref<1x13x13x16xbf16, #tpu.memory_space<vmem>>, vector<1x13x13x16xbf16>
    %22 = vector.shape_cast %21 : vector<1x13x13x16xbf16> to vector<13x13x16xbf16>
    %23 = vector.shape_cast %20 : vector<13x13x16xbf16> to vector<1x13x13x16xbf16>
    tpu.vector_store %arg2[%c0_3, %c0_4, %c0_5, %c0_6], %23 {strides = array<i32>} : memref<1x13x13x16xbf16, #tpu.memory_space<vmem>>, vector<1x13x13x16xbf16>,
    return
  }
  func.func @transform_0(%arg0: i32) -> (i32, i32, i32, i32) {
    %c0_i32 = arith.constant 0 : i32
    %c0_i32_0 = arith.constant 0 : i32
    %c0_i32_1 = arith.constant 0 : i32
    %c0_i32_2 = arith.constant 0 : i32
    return %arg0, %c0_i32, %c0_i32_0, %c0_i32_1 : i32, i32, i32, i32
  }
  func.func @transform_1(%arg0: i32) -> (i32, i32, i32, i32) {
    %c0_i32 = arith.constant 0 : i32
    %c0_i32_0 = arith.constant 0 : i32
    %c0_i32_1 = arith.constant 0 : i32
    %c0_i32_2 = arith.constant 0 : i32
    return %arg0, %c0_i32, %c0_i32_0, %c0_i32_1 : i32, i32, i32, i32
  }
}

module attributes {stable_mosaic.version = 11 : i64} {
  func.func @kernel(%arg0: i32, %arg1: memref<1x9x9x16xbf16, #tpu.memory_space<vmem>>, %arg2: memref<1x7x7x16xbf16, #tpu.memory_space<vmem>>) attributes {dimension_semantics = [#tpu.dimension_semantics<parallel>], iteration_bounds = array<i64: 2>, scalar_prefetch = 0 : i64, scratch_operands = 0 : i64, tpu.core_type = #tpu.core_type<tc>, window_params = [{transform_indices = @transform_0, window_bounds = array<i64: 1, 9, 9, 16>}, {transform_indices = @transform_1, window_bounds = array<i64: 1, 7, 7, 16>}]} {
    %c0 = arith.constant 0 : index
    %c0_0 = arith.constant 0 : index
    %c0_1 = arith.constant 0 : index
    %c0_2 = arith.constant 0 : index
    %0 = vector.load %arg1[%c0, %c0_0, %c0_1, %c0_2] : memref<1x9x9x16xbf16, #tpu.memory_space<vmem>>, vector<1x9x9x16xbf16>
    %1 = vector.shape_cast %0 : vector<1x9x9x16xbf16> to vector<9x9x16xbf16>
    %2 = arith.extf %1 : vector<9x9x16xbf16> to vector<9x9x16xf32>
    %3 = vector.extract_strided_slice %2 {offsets = [0, 0, 0], sizes = [7, 7, 16], strides = [1, 1, 1]} : vector<9x9x16xf32> to vector<7x7x16xf32>
    %4 = vector.extract_strided_slice %2 {offsets = [0, 1, 0], sizes = [7, 7, 16], strides = [1, 1, 1]} : vector<9x9x16xf32> to vector<7x7x16xf32>
    %5 = arith.addf %3, %4 : vector<7x7x16xf32>
    %6 = vector.extract_strided_slice %2 {offsets = [0, 2, 0], sizes = [7, 7, 16], strides = [1, 1, 1]} : vector<9x9x16xf32> to vector<7x7x16xf32>
    %7 = arith.addf %5, %6 : vector<7x7x16xf32>
    %8 = vector.extract_strided_slice %2 {offsets = [1, 0, 0], sizes = [7, 7, 16], strides = [1, 1, 1]} : vector<9x9x16xf32> to vector<7x7x16xf32>
    %9 = arith.addf %7, %8 : vector<7x7x16xf32>
    %10 = vector.extract_strided_slice %2 {offsets = [1, 1, 0], sizes = [7, 7, 16], strides = [1, 1, 1]} : vector<9x9x16xf32> to vector<7x7x16xf32>
    %11 = arith.addf %9, %10 : vector<7x7x16xf32>
    %12 = vector.extract_strided_slice %2 {offsets = [1, 2, 0], sizes = [7, 7, 16], strides = [1, 1, 1]} : vector<9x9x16xf32> to vector<7x7x16xf32>
    %13 = arith.addf %11, %12 : vector<7x7x16xf32>
    %14 = vector.extract_strided_slice %2 {offsets = [2, 0, 0], sizes = [7, 7, 16], strides = [1, 1, 1]} : vector<9x9x16xf32> to vector<7x7x16xf32>
    %15 = arith.addf %13, %14 : vector<7x7x16xf32>
    %16 = vector.extract_strided_slice %2 {offsets = [2, 1, 0], sizes = [7, 7, 16], strides = [1, 1, 1]} : vector<9x9x16xf32> to vector<7x7x16xf32>
    %17 = arith.addf %15, %16 : vector<7x7x16xf32>
    %18 = vector.extract_strided_slice %2 {offsets = [2, 2, 0], sizes = [7, 7, 16], strides = [1, 1, 1]} : vector<9x9x16xf32> to vector<7x7x16xf32>
    %19 = arith.addf %17, %18 : vector<7x7x16xf32>
    %cst = arith.constant 0.111111112 : f32
    %20 = vector.broadcast %cst : f32 to vector<7x7x16xf32>
    %21 = arith.mulf %19, %20 : vector<7x7x16xf32>
    %22 = arith.truncf %21 : vector<7x7x16xf32> to vector<7x7x16xbf16>
    %c0_3 = arith.constant 0 : index
    %c0_4 = arith.constant 0 : index
    %c0_5 = arith.constant 0 : index
    %c0_6 = arith.constant 0 : index
    %23 = vector.load %arg2[%c0_3, %c0_4, %c0_5, %c0_6] : memref<1x7x7x16xbf16, #tpu.memory_space<vmem>>, vector<1x7x7x16xbf16>
    %24 = vector.shape_cast %23 : vector<1x7x7x16xbf16> to vector<7x7x16xbf16>
    %25 = vector.shape_cast %22 : vector<7x7x16xbf16> to vector<1x7x7x16xbf16>
    tpu.vector_store %arg2[%c0_3, %c0_4, %c0_5, %c0_6], %25 {strides = array<i32>} : memref<1x7x7x16xbf16, #tpu.memory_space<vmem>>, vector<1x7x7x16xbf16>,
    return
  }
  func.func @transform_0(%arg0: i32) -> (i32, i32, i32, i32) {
    %c0_i32 = arith.constant 0 : i32
    %c0_i32_0 = arith.constant 0 : i32
    %c0_i32_1 = arith.constant 0 : i32
    %c0_i32_2 = arith.constant 0 : i32
    return %arg0, %c0_i32, %c0_i32_0, %c0_i32_1 : i32, i32, i32, i32
  }
  func.func @transform_1(%arg0: i32) -> (i32, i32, i32, i32) {
    %c0_i32 = arith.constant 0 : i32
    %c0_i32_0 = arith.constant 0 : i32
    %c0_i32_1 = arith.constant 0 : i32
    %c0_i32_2 = arith.constant 0 : i32
    return %arg0, %c0_i32, %c0_i32_0, %c0_i32_1 : i32, i32, i32, i32
  }
}

module attributes {stable_mosaic.version = 11 : i64} {
  func.func @_mixed_1x1_kernel(%arg0: i32, %arg1: memref<98x16xbf16, #tpu.memory_space<vmem>>, %arg2: memref<98x16xbf16, #tpu.memory_space<vmem>>, %arg3: memref<16x26xbf16, #tpu.memory_space<vmem>>, %arg4: memref<16x26xbf16, #tpu.memory_space<vmem>>, %arg5: memref<1x26xf32, #tpu.memory_space<vmem>>, %arg6: memref<98x26xbf16, #tpu.memory_space<vmem>>) attributes {dimension_semantics = [#tpu.dimension_semantics<arbitrary>], iteration_bounds = array<i64: 1>, scalar_prefetch = 0 : i64, scratch_operands = 0 : i64, tpu.core_type = #tpu.core_type<tc>, window_params = [{pipeline_mode = #tpu.pipeline_mode<synchronous>, transform_indices = @transform_0, window_bounds = array<i64: 98, 16>}, {pipeline_mode = #tpu.pipeline_mode<synchronous>, transform_indices = @transform_1, window_bounds = array<i64: 98, 16>}, {pipeline_mode = #tpu.pipeline_mode<synchronous>, transform_indices = @transform_2, window_bounds = array<i64: 16, 26>}, {pipeline_mode = #tpu.pipeline_mode<synchronous>, transform_indices = @transform_3, window_bounds = array<i64: 16, 26>}, {pipeline_mode = #tpu.pipeline_mode<synchronous>, transform_indices = @transform_4, window_bounds = array<i64: 1, 26>}, {pipeline_mode = #tpu.pipeline_mode<synchronous>, transform_indices = @transform_5, window_bounds = array<i64: 98, 26>}]} {
    %c0 = arith.constant 0 : index
    %c0_0 = arith.constant 0 : index
    %0 = vector.load %arg1[%c0, %c0_0] : memref<98x16xbf16, #tpu.memory_space<vmem>>, vector<98x16xbf16>
    %c0_1 = arith.constant 0 : index
    %c0_2 = arith.constant 0 : index
    %1 = vector.load %arg3[%c0_1, %c0_2] : memref<16x26xbf16, #tpu.memory_space<vmem>>, vector<16x26xbf16>
    %cst = arith.constant dense<0.000000e+00> : vector<98x26xf32>
    %2 = tpu.matmul %0, %1, %cst {dimension_numbers = #tpu.dot_dimension_numbers<[1], [0], [0], [1], [0, 0, 1, 1], [], []>} : vector<98x16xbf16>, vector<16x26xbf16>, vector<98x26xf32> -> vector<98x26xf32>
    %c0_3 = arith.constant 0 : index
    %c0_4 = arith.constant 0 : index
    %3 = vector.load %arg2[%c0_3, %c0_4] : memref<98x16xbf16, #tpu.memory_space<vmem>>, vector<98x16xbf16>
    %c0_5 = arith.constant 0 : index
    %c0_6 = arith.constant 0 : index
    %4 = vector.load %arg4[%c0_5, %c0_6] : memref<16x26xbf16, #tpu.memory_space<vmem>>, vector<16x26xbf16>
    %cst_7 = arith.constant dense<0.000000e+00> : vector<98x26xf32>
    %5 = tpu.matmul %3, %4, %cst_7 {dimension_numbers = #tpu.dot_dimension_numbers<[1], [0], [0], [1], [0, 0, 1, 1], [], []>} : vector<98x16xbf16>, vector<16x26xbf16>, vector<98x26xf32> -> vector<98x26xf32>
    %6 = arith.addf %2, %5 : vector<98x26xf32>
    %c0_8 = arith.constant 0 : index
    %c0_9 = arith.constant 0 : index
    %7 = vector.load %arg5[%c0_8, %c0_9] : memref<1x26xf32, #tpu.memory_space<vmem>>, vector<1x26xf32>
    %8 = vector.broadcast %7 : vector<1x26xf32> to vector<98x26xf32>
    %9 = arith.addf %6, %8 : vector<98x26xf32>
    %cst_10 = arith.constant 0.000000e+00 : f32
    %10 = vector.broadcast %cst_10 : f32 to vector<98x26xf32>
    %11 = arith.maximumf %9, %10 : vector<98x26xf32>
    %12 = arith.truncf %11 : vector<98x26xf32> to vector<98x26xbf16>
    %c0_11 = arith.constant 0 : index
    %c0_12 = arith.constant 0 : index
    %13 = vector.load %arg6[%c0_11, %c0_12] : memref<98x26xbf16, #tpu.memory_space<vmem>>, vector<98x26xbf16>
    tpu.vector_store %arg6[%c0_11, %c0_12], %12 {strides = array<i32>} : memref<98x26xbf16, #tpu.memory_space<vmem>>, vector<98x26xbf16>,
    return
  }
  func.func @transform_0(%arg0: i32) -> (i32, i32) {
    %c0_i32 = arith.constant 0 : i32
    %c0_i32_0 = arith.constant 0 : i32
    %c0_i32_1 = arith.constant 0 : i32
    return %c0_i32, %c0_i32_0 : i32, i32
  }
  func.func @transform_1(%arg0: i32) -> (i32, i32) {
    %c0_i32 = arith.constant 0 : i32
    %c0_i32_0 = arith.constant 0 : i32
    %c0_i32_1 = arith.constant 0 : i32
    return %c0_i32, %c0_i32_0 : i32, i32
  }
  func.func @transform_2(%arg0: i32) -> (i32, i32) {
    %c0_i32 = arith.constant 0 : i32
    %c0_i32_0 = arith.constant 0 : i32
    %c0_i32_1 = arith.constant 0 : i32
    return %c0_i32, %c0_i32_0 : i32, i32
  }
  func.func @transform_3(%arg0: i32) -> (i32, i32) {
    %c0_i32 = arith.constant 0 : i32
    %c0_i32_0 = arith.constant 0 : i32
    %c0_i32_1 = arith.constant 0 : i32
    return %c0_i32, %c0_i32_0 : i32, i32
  }
  func.func @transform_4(%arg0: i32) -> (i32, i32) {
    %c0_i32 = arith.constant 0 : i32
    %c0_i32_0 = arith.constant 0 : i32
    %c0_i32_1 = arith.constant 0 : i32
    return %c0_i32, %c0_i32_0 : i32, i32
  }
  func.func @transform_5(%arg0: i32) -> (i32, i32) {
    %c0_i32 = arith.constant 0 : i32
    %c0_i32_0 = arith.constant 0 : i32
    %c0_i32_1 = arith.constant 0 : i32
    return %c0_i32, %c0_i32_0 : i32, i32
  }
}

module attributes {stable_mosaic.version = 11 : i64} {
  func.func @_conv_rows_kernel(%arg0: i32, %arg1: memref<1x11x42xbf16, #tpu.memory_space<vmem>>, %arg2: memref<5x42x56xbf16, #tpu.memory_space<vmem>>, %arg3: memref<1x56xf32, #tpu.memory_space<vmem>>, %arg4: memref<1x7x56xbf16, #tpu.memory_space<vmem>>) attributes {dimension_semantics = [#tpu.dimension_semantics<parallel>], iteration_bounds = array<i64: 2>, scalar_prefetch = 0 : i64, scratch_operands = 0 : i64, tpu.core_type = #tpu.core_type<tc>, window_params = [{transform_indices = @transform_0, window_bounds = array<i64: 1, 11, 42>}, {pipeline_mode = #tpu.pipeline_mode<synchronous>, transform_indices = @transform_1, window_bounds = array<i64: 5, 42, 56>}, {pipeline_mode = #tpu.pipeline_mode<synchronous>, transform_indices = @transform_2, window_bounds = array<i64: 1, 56>}, {transform_indices = @transform_3, window_bounds = array<i64: 1, 7, 56>}]} {
    %c0 = arith.constant 0 : index
    %c0_0 = arith.constant 0 : index
    %c0_1 = arith.constant 0 : index
    %0 = vector.load %arg1[%c0, %c0_0, %c0_1] : memref<1x11x42xbf16, #tpu.memory_space<vmem>>, vector<1x11x42xbf16>
    %1 = vector.shape_cast %0 : vector<1x11x42xbf16> to vector<11x42xbf16>
    %c0_2 = arith.constant 0 : index
    %c0_3 = arith.constant 0 : index
    %c0_4 = arith.constant 0 : index
    %2 = vector.load %arg2[%c0_2, %c0_3, %c0_4] : memref<5x42x56xbf16, #tpu.memory_space<vmem>>, vector<1x42x56xbf16>
    %3 = vector.shape_cast %2 : vector<1x42x56xbf16> to vector<42x56xbf16>
    %cst = arith.constant dense<0.000000e+00> : vector<11x56xf32>
    %4 = tpu.matmul %1, %3, %cst {dimension_numbers = #tpu.dot_dimension_numbers<[1], [0], [0], [1], [0, 0, 1, 1], [], []>} : vector<11x42xbf16>, vector<42x56xbf16>, vector<11x56xf32> -> vector<11x56xf32>
    %5 = vector.extract_strided_slice %4 {offsets = [0, 0], sizes = [7, 56], strides = [1, 1]} : vector<11x56xf32> to vector<7x56xf32>
    %c1 = arith.constant 1 : index
    %c0_5 = arith.constant 0 : index
    %c0_6 = arith.constant 0 : index
    %6 = vector.load %arg2[%c1, %c0_5, %c0_6] : memref<5x42x56xbf16, #tpu.memory_space<vmem>>, vector<1x42x56xbf16>
    %7 = vector.shape_cast %6 : vector<1x42x56xbf16> to vector<42x56xbf16>
    %cst_7 = arith.constant dense<0.000000e+00> : vector<11x56xf32>
    %8 = tpu.matmul %1, %7, %cst_7 {dimension_numbers = #tpu.dot_dimension_numbers<[1], [0], [0], [1], [0, 0, 1, 1], [], []>} : vector<11x42xbf16>, vector<42x56xbf16>, vector<11x56xf32> -> vector<11x56xf32>
    %9 = vector.extract_strided_slice %8 {offsets = [1, 0], sizes = [7, 56], strides = [1, 1]} : vector<11x56xf32> to vector<7x56xf32>
    %10 = arith.addf %5, %9 : vector<7x56xf32>
    %c2 = arith.constant 2 : index
    %c0_8 = arith.constant 0 : index
    %c0_9 = arith.constant 0 : index
    %11 = vector.load %arg2[%c2, %c0_8, %c0_9] : memref<5x42x56xbf16, #tpu.memory_space<vmem>>, vector<1x42x56xbf16>
    %12 = vector.shape_cast %11 : vector<1x42x56xbf16> to vector<42x56xbf16>
    %cst_10 = arith.constant dense<0.000000e+00> : vector<11x56xf32>
    %13 = tpu.matmul %1, %12, %cst_10 {dimension_numbers = #tpu.dot_dimension_numbers<[1], [0], [0], [1], [0, 0, 1, 1], [], []>} : vector<11x42xbf16>, vector<42x56xbf16>, vector<11x56xf32> -> vector<11x56xf32>
    %14 = vector.extract_strided_slice %13 {offsets = [2, 0], sizes = [7, 56], strides = [1, 1]} : vector<11x56xf32> to vector<7x56xf32>
    %15 = arith.addf %10, %14 : vector<7x56xf32>
    %c3 = arith.constant 3 : index
    %c0_11 = arith.constant 0 : index
    %c0_12 = arith.constant 0 : index
    %16 = vector.load %arg2[%c3, %c0_11, %c0_12] : memref<5x42x56xbf16, #tpu.memory_space<vmem>>, vector<1x42x56xbf16>
    %17 = vector.shape_cast %16 : vector<1x42x56xbf16> to vector<42x56xbf16>
    %cst_13 = arith.constant dense<0.000000e+00> : vector<11x56xf32>
    %18 = tpu.matmul %1, %17, %cst_13 {dimension_numbers = #tpu.dot_dimension_numbers<[1], [0], [0], [1], [0, 0, 1, 1], [], []>} : vector<11x42xbf16>, vector<42x56xbf16>, vector<11x56xf32> -> vector<11x56xf32>
    %19 = vector.extract_strided_slice %18 {offsets = [3, 0], sizes = [7, 56], strides = [1, 1]} : vector<11x56xf32> to vector<7x56xf32>
    %20 = arith.addf %15, %19 : vector<7x56xf32>
    %c4 = arith.constant 4 : index
    %c0_14 = arith.constant 0 : index
    %c0_15 = arith.constant 0 : index
    %21 = vector.load %arg2[%c4, %c0_14, %c0_15] : memref<5x42x56xbf16, #tpu.memory_space<vmem>>, vector<1x42x56xbf16>
    %22 = vector.shape_cast %21 : vector<1x42x56xbf16> to vector<42x56xbf16>
    %cst_16 = arith.constant dense<0.000000e+00> : vector<11x56xf32>
    %23 = tpu.matmul %1, %22, %cst_16 {dimension_numbers = #tpu.dot_dimension_numbers<[1], [0], [0], [1], [0, 0, 1, 1], [], []>} : vector<11x42xbf16>, vector<42x56xbf16>, vector<11x56xf32> -> vector<11x56xf32>
    %24 = vector.extract_strided_slice %23 {offsets = [4, 0], sizes = [7, 56], strides = [1, 1]} : vector<11x56xf32> to vector<7x56xf32>
    %25 = arith.addf %20, %24 : vector<7x56xf32>
    %c0_17 = arith.constant 0 : index
    %c0_18 = arith.constant 0 : index
    %26 = vector.load %arg3[%c0_17, %c0_18] : memref<1x56xf32, #tpu.memory_space<vmem>>, vector<1x56xf32>
    %27 = vector.broadcast %26 : vector<1x56xf32> to vector<7x56xf32>
    %28 = arith.addf %25, %27 : vector<7x56xf32>
    %cst_19 = arith.constant 0.000000e+00 : f32
    %29 = vector.broadcast %cst_19 : f32 to vector<7x56xf32>
    %30 = arith.maximumf %28, %29 : vector<7x56xf32>
    %31 = arith.truncf %30 : vector<7x56xf32> to vector<7x56xbf16>
    %c0_20 = arith.constant 0 : index
    %c0_21 = arith.constant 0 : index
    %c0_22 = arith.constant 0 : index
    %32 = vector.load %arg4[%c0_20, %c0_21, %c0_22] : memref<1x7x56xbf16, #tpu.memory_space<vmem>>, vector<1x7x56xbf16>
    %33 = vector.shape_cast %32 : vector<1x7x56xbf16> to vector<7x56xbf16>
    %34 = vector.shape_cast %31 : vector<7x56xbf16> to vector<1x7x56xbf16>
    tpu.vector_store %arg4[%c0_20, %c0_21, %c0_22], %34 {strides = array<i32>} : memref<1x7x56xbf16, #tpu.memory_space<vmem>>, vector<1x7x56xbf16>,
    return
  }
  func.func @transform_0(%arg0: i32) -> (i32, i32, i32) {
    %c0_i32 = arith.constant 0 : i32
    %c0_i32_0 = arith.constant 0 : i32
    %c0_i32_1 = arith.constant 0 : i32
    return %arg0, %c0_i32, %c0_i32_0 : i32, i32, i32
  }
  func.func @transform_1(%arg0: i32) -> (i32, i32, i32) {
    %c0_i32 = arith.constant 0 : i32
    %c0_i32_0 = arith.constant 0 : i32
    %c0_i32_1 = arith.constant 0 : i32
    %c0_i32_2 = arith.constant 0 : i32
    return %c0_i32, %c0_i32_0, %c0_i32_1 : i32, i32, i32
  }
  func.func @transform_2(%arg0: i32) -> (i32, i32) {
    %c0_i32 = arith.constant 0 : i32
    %c0_i32_0 = arith.constant 0 : i32
    %c0_i32_1 = arith.constant 0 : i32
    return %c0_i32, %c0_i32_0 : i32, i32
  }
  func.func @transform_3(%arg0: i32) -> (i32, i32, i32) {
    %c0_i32 = arith.constant 0 : i32
    %c0_i32_0 = arith.constant 0 : i32
    %c0_i32_1 = arith.constant 0 : i32
    return %arg0, %c0_i32, %c0_i32_0 : i32, i32, i32
  }
}

module attributes {stable_mosaic.version = 11 : i64} {
  func.func @_conv_rows_kernel(%arg0: i32, %arg1: memref<1x9x56xbf16, #tpu.memory_space<vmem>>, %arg2: memref<3x56x84xbf16, #tpu.memory_space<vmem>>, %arg3: memref<1x84xf32, #tpu.memory_space<vmem>>, %arg4: memref<1x7x84xbf16, #tpu.memory_space<vmem>>) attributes {dimension_semantics = [#tpu.dimension_semantics<parallel>], iteration_bounds = array<i64: 2>, scalar_prefetch = 0 : i64, scratch_operands = 0 : i64, tpu.core_type = #tpu.core_type<tc>, window_params = [{transform_indices = @transform_0, window_bounds = array<i64: 1, 9, 56>}, {pipeline_mode = #tpu.pipeline_mode<synchronous>, transform_indices = @transform_1, window_bounds = array<i64: 3, 56, 84>}, {pipeline_mode = #tpu.pipeline_mode<synchronous>, transform_indices = @transform_2, window_bounds = array<i64: 1, 84>}, {transform_indices = @transform_3, window_bounds = array<i64: 1, 7, 84>}]} {
    %c0 = arith.constant 0 : index
    %c0_0 = arith.constant 0 : index
    %c0_1 = arith.constant 0 : index
    %0 = vector.load %arg1[%c0, %c0_0, %c0_1] : memref<1x9x56xbf16, #tpu.memory_space<vmem>>, vector<1x9x56xbf16>
    %1 = vector.shape_cast %0 : vector<1x9x56xbf16> to vector<9x56xbf16>
    %c0_2 = arith.constant 0 : index
    %c0_3 = arith.constant 0 : index
    %c0_4 = arith.constant 0 : index
    %2 = vector.load %arg2[%c0_2, %c0_3, %c0_4] : memref<3x56x84xbf16, #tpu.memory_space<vmem>>, vector<1x56x84xbf16>
    %3 = vector.shape_cast %2 : vector<1x56x84xbf16> to vector<56x84xbf16>
    %cst = arith.constant dense<0.000000e+00> : vector<9x84xf32>
    %4 = tpu.matmul %1, %3, %cst {dimension_numbers = #tpu.dot_dimension_numbers<[1], [0], [0], [1], [0, 0, 1, 1], [], []>} : vector<9x56xbf16>, vector<56x84xbf16>, vector<9x84xf32> -> vector<9x84xf32>
    %5 = vector.extract_strided_slice %4 {offsets = [0, 0], sizes = [7, 84], strides = [1, 1]} : vector<9x84xf32> to vector<7x84xf32>
    %c1 = arith.constant 1 : index
    %c0_5 = arith.constant 0 : index
    %c0_6 = arith.constant 0 : index
    %6 = vector.load %arg2[%c1, %c0_5, %c0_6] : memref<3x56x84xbf16, #tpu.memory_space<vmem>>, vector<1x56x84xbf16>
    %7 = vector.shape_cast %6 : vector<1x56x84xbf16> to vector<56x84xbf16>
    %cst_7 = arith.constant dense<0.000000e+00> : vector<9x84xf32>
    %8 = tpu.matmul %1, %7, %cst_7 {dimension_numbers = #tpu.dot_dimension_numbers<[1], [0], [0], [1], [0, 0, 1, 1], [], []>} : vector<9x56xbf16>, vector<56x84xbf16>, vector<9x84xf32> -> vector<9x84xf32>
    %9 = vector.extract_strided_slice %8 {offsets = [1, 0], sizes = [7, 84], strides = [1, 1]} : vector<9x84xf32> to vector<7x84xf32>
    %10 = arith.addf %5, %9 : vector<7x84xf32>
    %c2 = arith.constant 2 : index
    %c0_8 = arith.constant 0 : index
    %c0_9 = arith.constant 0 : index
    %11 = vector.load %arg2[%c2, %c0_8, %c0_9] : memref<3x56x84xbf16, #tpu.memory_space<vmem>>, vector<1x56x84xbf16>
    %12 = vector.shape_cast %11 : vector<1x56x84xbf16> to vector<56x84xbf16>
    %cst_10 = arith.constant dense<0.000000e+00> : vector<9x84xf32>
    %13 = tpu.matmul %1, %12, %cst_10 {dimension_numbers = #tpu.dot_dimension_numbers<[1], [0], [0], [1], [0, 0, 1, 1], [], []>} : vector<9x56xbf16>, vector<56x84xbf16>, vector<9x84xf32> -> vector<9x84xf32>
    %14 = vector.extract_strided_slice %13 {offsets = [2, 0], sizes = [7, 84], strides = [1, 1]} : vector<9x84xf32> to vector<7x84xf32>
    %15 = arith.addf %10, %14 : vector<7x84xf32>
    %c0_11 = arith.constant 0 : index
    %c0_12 = arith.constant 0 : index
    %16 = vector.load %arg3[%c0_11, %c0_12] : memref<1x84xf32, #tpu.memory_space<vmem>>, vector<1x84xf32>
    %17 = vector.broadcast %16 : vector<1x84xf32> to vector<7x84xf32>
    %18 = arith.addf %15, %17 : vector<7x84xf32>
    %cst_13 = arith.constant 0.000000e+00 : f32
    %19 = vector.broadcast %cst_13 : f32 to vector<7x84xf32>
    %20 = arith.maximumf %18, %19 : vector<7x84xf32>
    %21 = arith.truncf %20 : vector<7x84xf32> to vector<7x84xbf16>
    %c0_14 = arith.constant 0 : index
    %c0_15 = arith.constant 0 : index
    %c0_16 = arith.constant 0 : index
    %22 = vector.load %arg4[%c0_14, %c0_15, %c0_16] : memref<1x7x84xbf16, #tpu.memory_space<vmem>>, vector<1x7x84xbf16>
    %23 = vector.shape_cast %22 : vector<1x7x84xbf16> to vector<7x84xbf16>
    %24 = vector.shape_cast %21 : vector<7x84xbf16> to vector<1x7x84xbf16>
    tpu.vector_store %arg4[%c0_14, %c0_15, %c0_16], %24 {strides = array<i32>} : memref<1x7x84xbf16, #tpu.memory_space<vmem>>, vector<1x7x84xbf16>,
    return
  }
  func.func @transform_0(%arg0: i32) -> (i32, i32, i32) {
    %c0_i32 = arith.constant 0 : i32
    %c0_i32_0 = arith.constant 0 : i32
    %c0_i32_1 = arith.constant 0 : i32
    return %arg0, %c0_i32, %c0_i32_0 : i32, i32, i32
  }
  func.func @transform_1(%arg0: i32) -> (i32, i32, i32) {
    %c0_i32 = arith.constant 0 : i32
    %c0_i32_0 = arith.constant 0 : i32
    %c0_i32_1 = arith.constant 0 : i32
    %c0_i32_2 = arith.constant 0 : i32
    return %c0_i32, %c0_i32_0, %c0_i32_1 : i32, i32, i32
  }
  func.func @transform_2(%arg0: i32) -> (i32, i32) {
    %c0_i32 = arith.constant 0 : i32
    %c0_i32_0 = arith.constant 0 : i32
    %c0_i32_1 = arith.constant 0 : i32
    return %c0_i32, %c0_i32_0 : i32, i32
  }
  func.func @transform_3(%arg0: i32) -> (i32, i32, i32) {
    %c0_i32 = arith.constant 0 : i32
    %c0_i32_0 = arith.constant 0 : i32
    %c0_i32_1 = arith.constant 0 : i32
    return %arg0, %c0_i32, %c0_i32_0 : i32, i32, i32
  }
}

module attributes {stable_mosaic.version = 11 : i64} {
  func.func @_conv_rows_kernel(%arg0: i32, %arg1: memref<1x9x84xbf16, #tpu.memory_space<vmem>>, %arg2: memref<3x84x84xbf16, #tpu.memory_space<vmem>>, %arg3: memref<1x84xf32, #tpu.memory_space<vmem>>, %arg4: memref<1x7x84xbf16, #tpu.memory_space<vmem>>) attributes {dimension_semantics = [#tpu.dimension_semantics<parallel>], iteration_bounds = array<i64: 2>, scalar_prefetch = 0 : i64, scratch_operands = 0 : i64, tpu.core_type = #tpu.core_type<tc>, window_params = [{transform_indices = @transform_0, window_bounds = array<i64: 1, 9, 84>}, {pipeline_mode = #tpu.pipeline_mode<synchronous>, transform_indices = @transform_1, window_bounds = array<i64: 3, 84, 84>}, {pipeline_mode = #tpu.pipeline_mode<synchronous>, transform_indices = @transform_2, window_bounds = array<i64: 1, 84>}, {transform_indices = @transform_3, window_bounds = array<i64: 1, 7, 84>}]} {
    %c0 = arith.constant 0 : index
    %c0_0 = arith.constant 0 : index
    %c0_1 = arith.constant 0 : index
    %0 = vector.load %arg1[%c0, %c0_0, %c0_1] : memref<1x9x84xbf16, #tpu.memory_space<vmem>>, vector<1x9x84xbf16>
    %1 = vector.shape_cast %0 : vector<1x9x84xbf16> to vector<9x84xbf16>
    %c0_2 = arith.constant 0 : index
    %c0_3 = arith.constant 0 : index
    %c0_4 = arith.constant 0 : index
    %2 = vector.load %arg2[%c0_2, %c0_3, %c0_4] : memref<3x84x84xbf16, #tpu.memory_space<vmem>>, vector<1x84x84xbf16>
    %3 = vector.shape_cast %2 : vector<1x84x84xbf16> to vector<84x84xbf16>
    %cst = arith.constant dense<0.000000e+00> : vector<9x84xf32>
    %4 = tpu.matmul %1, %3, %cst {dimension_numbers = #tpu.dot_dimension_numbers<[1], [0], [0], [1], [0, 0, 1, 1], [], []>} : vector<9x84xbf16>, vector<84x84xbf16>, vector<9x84xf32> -> vector<9x84xf32>
    %5 = vector.extract_strided_slice %4 {offsets = [0, 0], sizes = [7, 84], strides = [1, 1]} : vector<9x84xf32> to vector<7x84xf32>
    %c1 = arith.constant 1 : index
    %c0_5 = arith.constant 0 : index
    %c0_6 = arith.constant 0 : index
    %6 = vector.load %arg2[%c1, %c0_5, %c0_6] : memref<3x84x84xbf16, #tpu.memory_space<vmem>>, vector<1x84x84xbf16>
    %7 = vector.shape_cast %6 : vector<1x84x84xbf16> to vector<84x84xbf16>
    %cst_7 = arith.constant dense<0.000000e+00> : vector<9x84xf32>
    %8 = tpu.matmul %1, %7, %cst_7 {dimension_numbers = #tpu.dot_dimension_numbers<[1], [0], [0], [1], [0, 0, 1, 1], [], []>} : vector<9x84xbf16>, vector<84x84xbf16>, vector<9x84xf32> -> vector<9x84xf32>
    %9 = vector.extract_strided_slice %8 {offsets = [1, 0], sizes = [7, 84], strides = [1, 1]} : vector<9x84xf32> to vector<7x84xf32>
    %10 = arith.addf %5, %9 : vector<7x84xf32>
    %c2 = arith.constant 2 : index
    %c0_8 = arith.constant 0 : index
    %c0_9 = arith.constant 0 : index
    %11 = vector.load %arg2[%c2, %c0_8, %c0_9] : memref<3x84x84xbf16, #tpu.memory_space<vmem>>, vector<1x84x84xbf16>
    %12 = vector.shape_cast %11 : vector<1x84x84xbf16> to vector<84x84xbf16>
    %cst_10 = arith.constant dense<0.000000e+00> : vector<9x84xf32>
    %13 = tpu.matmul %1, %12, %cst_10 {dimension_numbers = #tpu.dot_dimension_numbers<[1], [0], [0], [1], [0, 0, 1, 1], [], []>} : vector<9x84xbf16>, vector<84x84xbf16>, vector<9x84xf32> -> vector<9x84xf32>
    %14 = vector.extract_strided_slice %13 {offsets = [2, 0], sizes = [7, 84], strides = [1, 1]} : vector<9x84xf32> to vector<7x84xf32>
    %15 = arith.addf %10, %14 : vector<7x84xf32>
    %c0_11 = arith.constant 0 : index
    %c0_12 = arith.constant 0 : index
    %16 = vector.load %arg3[%c0_11, %c0_12] : memref<1x84xf32, #tpu.memory_space<vmem>>, vector<1x84xf32>
    %17 = vector.broadcast %16 : vector<1x84xf32> to vector<7x84xf32>
    %18 = arith.addf %15, %17 : vector<7x84xf32>
    %cst_13 = arith.constant 0.000000e+00 : f32
    %19 = vector.broadcast %cst_13 : f32 to vector<7x84xf32>
    %20 = arith.maximumf %18, %19 : vector<7x84xf32>
    %21 = arith.truncf %20 : vector<7x84xf32> to vector<7x84xbf16>
    %c0_14 = arith.constant 0 : index
    %c0_15 = arith.constant 0 : index
    %c0_16 = arith.constant 0 : index
    %22 = vector.load %arg4[%c0_14, %c0_15, %c0_16] : memref<1x7x84xbf16, #tpu.memory_space<vmem>>, vector<1x7x84xbf16>
    %23 = vector.shape_cast %22 : vector<1x7x84xbf16> to vector<7x84xbf16>
    %24 = vector.shape_cast %21 : vector<7x84xbf16> to vector<1x7x84xbf16>
    tpu.vector_store %arg4[%c0_14, %c0_15, %c0_16], %24 {strides = array<i32>} : memref<1x7x84xbf16, #tpu.memory_space<vmem>>, vector<1x7x84xbf16>,
    return
  }
  func.func @transform_0(%arg0: i32) -> (i32, i32, i32) {
    %c0_i32 = arith.constant 0 : i32
    %c0_i32_0 = arith.constant 0 : i32
    %c0_i32_1 = arith.constant 0 : i32
    return %arg0, %c0_i32, %c0_i32_0 : i32, i32, i32
  }
  func.func @transform_1(%arg0: i32) -> (i32, i32, i32) {
    %c0_i32 = arith.constant 0 : i32
    %c0_i32_0 = arith.constant 0 : i32
    %c0_i32_1 = arith.constant 0 : i32
    %c0_i32_2 = arith.constant 0 : i32
    return %c0_i32, %c0_i32_0, %c0_i32_1 : i32, i32, i32
  }
  func.func @transform_2(%arg0: i32) -> (i32, i32) {
    %c0_i32 = arith.constant 0 : i32
    %c0_i32_0 = arith.constant 0 : i32
    %c0_i32_1 = arith.constant 0 : i32
    return %c0_i32, %c0_i32_0 : i32, i32
  }
  func.func @transform_3(%arg0: i32) -> (i32, i32, i32) {
    %c0_i32 = arith.constant 0 : i32
    %c0_i32_0 = arith.constant 0 : i32
    %c0_i32_1 = arith.constant 0 : i32
    return %arg0, %c0_i32, %c0_i32_0 : i32, i32, i32
  }
}

</mosaic_0001>

<bundles_post_ra>
// kernel: _lambda_.8
= control target key start
LH: loop header
LB: loop body
LE: loop exit
PB: predicated region body
PF: predicated region fallthrough
CT: control target
= control target key end

     0   :  { %s818_s12 = smov 0   ;;  %s908_s0 = inlined_call_operand.vmem [shape: bf16[2,32,96], index: 0, kind: input, shape index: {}]   ;;  %s909_s1 = inlined_call_operand.vmem [shape: bf16[3,96,120], index: 1, kind: input, shape index: {}]   ;;  %s910_s2 = inlined_call_operand.vmem [shape: f32[1,120], index: 2, kind: input, shape index: {}]   ;;  %s911_s3 = inlined_call_operand.vmem [shape: bf16[2,30,120], index: 3, kind: output, shape index: {}]  }
   0x1 LB: > { %s618_s13 = sadd.s32 4294967295, %s796_s12   ;;  %p622_p0 = scmp.ge.s32.totalorder %s796_s12, 1  ;;  %s796_s12 = sphi %s818_s12, %s13_s12  }
   0x2   : > { %p137_p1 = scmp.lt.s32.totalorder %s796_s12, 3 }
   0x4   : > { %p138_p2 = pnand %p622_p0, %p137_p1 }
   0x5   : > { %p161_p3 = scmp.lt.s32.totalorder (!%p138_p2), %s618_s13, 1 }
   0x6   : > { %141 = sbr.rel (%p138_p2) target bundleno = 271 (0x10f), region = 32 }
   0xb   : > { %v770_v0 = vld [vmem:[%s909_s1 + $0x28] sm:$0xff]   ;;  %v771_v1 = vld [vmem:[%s909_s1 + $0x58] sm:$0xff]   ;;  %v772_v2 = vld [vmem:[%s909_s1 + $0x20] sm:$0xff]   ;;  %s913_s13 = smov (!%p161_p3, %s618_s13), 1  ;;  %vm234_vm0 = vcmask 785408   ;;  %vm392_vm1 = vcmask 1046528  }
   0xc   : > { %714 = vmatprep.subr.bf16.mxu0 %v770_v0  ;;  %730 = vmatprep.subr.bf16.mxu1 %v771_v1  ;;  %v773_v3 = vld [vmem:[%s909_s1 + $0x50] sm:$0xff]   ;;  %v774_v4 = vld [vmem:[%s909_s1 + $0x18] sm:$0xff]   ;;  %v775_v5 = vld [vmem:[%s909_s1 + $0x48] sm:$0xff]   ;;  %s684_s26 = sshll.u32 %s913_s13, 4  ;;  %vm510_vm2 = vcmask 1045504   ;;  %vm561_vm3 = vcmask 976896  }
   0xd   : > { %715 = vmatpush3.bf16.msra.mxu0 %v770_v0  ;;  %731 = vmatpush3.bf16.msra.mxu1 %v771_v1  ;;  %v776_v6 = vld [vmem:[%s909_s1 + $0x10] sm:$0xff]   ;;  %v777_v7 = vld [vmem:[%s909_s1 + $0x40] sm:$0xff]   ;;  %s165_s6 = scalar_lea.vmem %s908_s0, %s684_s26  ;;  %v778_v8 = vld [vmem:[%s909_s1 + $0x8] sm:$0xff]   ;;  %s170_s7 = scalar_lea.vmem %s911_s3, %s684_s26  ;;  %vm557_vm4 = vcmask 977920  }
   0xe   : > { %716 = vmatprep.subr.bf16.mxu0 %v772_v2  ;;  %732 = vmatprep.subr.bf16.mxu1 %v773_v3  ;;  %v782_v9 = vld [vmem:[%s165_s6] sm:$0xff]   ;;  %v779_v10 = vld [vmem:[%s909_s1 + $0x38] sm:$0xff]   ;;  %v781_v12 = vld [vmem:[%s909_s1 + $0x30] sm:$0xff]  }
   0xf   : > { %726 = vmatprep.mubr.msk.bf16.mxu0 %vm234_vm0, %v782_v9  ;;  %742 = vmatprep.mubr.msk.bf16.mxu1 %vm234_vm0, %v782_v9  ;;  %v780_v11 = vld [vmem:[%s909_s1] sm:$0xff]   ;;  %v784_v13 = vld [vmem:[%s909_s1 + $0x88] sm:$0xff]   ;;  %v786_v16 = vld [vmem:[%s909_s1 + $0x78] sm:$0xff]  }
  0x10   : > { %v783_v14 = vld [vmem:[%s165_s6 + $0x8] sm:$0xff]   ;;  %v785_v15 = vld [vmem:[%s909_s1 + $0x80] sm:$0xff]   ;;  %v787_v17 = vld [vmem:[%s909_s1 + $0x70] sm:$0xff]  }
  0x11   : > { %717 = vmatpush3.bf16.msra.mxu0 %v772_v2  ;;  %733 = vmatpush3.bf16.msra.mxu1 %v773_v3  ;;  %v788_v18 = vld [vmem:[%s909_s1 + $0x68] sm:$0xff]   ;;  %v789_v19 = vld [vmem:[%s909_s1 + $0x60] sm:$0xff]  }
  0x12   : > { %718 = vmatprep.subr.bf16.mxu0 %v774_v4  ;;  %734 = vmatprep.subr.bf16.mxu1 %v775_v5  ;;  %v677_v42 = vld [vmem:[%s910_s2] ss:$0 sm:$0xff] }
  0x15   : > { %719 = vmatpush3.bf16.msra.mxu0 %v774_v4  ;;  %735 = vmatpush3.bf16.msra.mxu1 %v775_v5 }
  0x16   : > { %720 = vmatprep.subr.bf16.mxu0 %v776_v6  ;;  %736 = vmatprep.subr.bf16.mxu1 %v777_v7 }
  0x19   : > { %721 = vmatpush3.bf16.msra.mxu0 %v776_v6  ;;  %737 = vmatpush3.bf16.msra.mxu1 %v777_v7 }
  0x1a   : > { %722 = vmatprep.subr.bf16.mxu0 %v778_v8  ;;  %738 = vmatprep.subr.bf16.mxu1 %v779_v10 }
  0x1d   : > { %723 = vmatpush3.bf16.msra.mxu0 %v778_v8  ;;  %739 = vmatpush3.bf16.msra.mxu1 %v779_v10 }
  0x1e   : > { %724 = vmatprep.subr.bf16.mxu0 %v780_v11  ;;  %740 = vmatprep.subr.bf16.mxu1 %v781_v12 }
  0x21   : > { %725 = vmatpush3.bf16.msra.mxu0 %v780_v11  ;;  %741 = vmatpush3.bf16.msra.mxu1 %v781_v12 }
  0x22   : > { %746 = vmatprep.subr.bf16.mxu0 %v784_v13 }
  0x24   : > { %727 = vmatmul.mubr.msk.bf16.vlgmr.msra.gmra.mxu0 %vm234_vm0, %v783_v14  ;;  %743 = vmatmul.mubr.msk.bf16.vlgmr.msra.gmra.mxu1 %vm234_vm0, %v783_v14 }
  0x25   : > { %747 = vmatpush3.bf16.msra.mxu0 %v784_v13  ;;  %758 = vmatprep.mubr.msk.bf16.mxu0 %vm234_vm0, %v782_v9 }
  0x26   : > { %748 = vmatprep.subr.bf16.mxu0 %v785_v15 }
  0x29   : > { %749 = vmatpush3.bf16.msra.mxu0 %v785_v15 }
  0x2a   : > { %750 = vmatprep.subr.bf16.mxu0 %v786_v16 }
  0x2d   : > { %751 = vmatpush3.bf16.msra.mxu0 %v786_v16 }
  0x2e   : > { %752 = vmatprep.subr.bf16.mxu0 %v787_v17 }
  0x31   : > { %753 = vmatpush3.bf16.msra.mxu0 %v787_v17 }
  0x32   : > { %754 = vmatprep.subr.bf16.mxu0 %v788_v18 }
  0x35   : > { %755 = vmatpush3.bf16.msra.mxu0 %v788_v18 }
  0x36   : > { %756 = vmatprep.subr.bf16.mxu0 %v789_v19 }
  0x39   : > { %757 = vmatpush3.bf16.msra.mxu0 %v789_v19 }
  0x3c   : > { %759 = vmatmul.mubr.msk.bf16.vlgmr.msra.gmra.mxu0 %vm234_vm0, %v783_v14 }
  0xe4   : > { %v728_v20 = vpop.f32.mrf.mxu0  ;;  %v744_v21 = vpop.f32.mrf.mxu1 }
  0xe5   : > { %v396_v28 = vrot.slane %v744_v21, 1 }
  0xe6   : > { %v275_v22 = vpop.f32.mrf.mxu0  ;;  %v373_v23 = vpop.f32.mrf.mxu1 }
  0xe7   : > { %v393_v31 = vrot.slane %v373_v23, 1 }
  0xe8   : > { %v729_v24 = vpop.f32.mrf.mxu0  ;;  %v745_v25 = vpop.f32.mrf.mxu1 }
  0xe9   : > { %v398_v29 = vrot.slane %v745_v25, 1 }
  0xea   : > { %v278_v26 = vpop.f32.mrf.mxu0  ;;  %v376_v27 = vpop.f32.mrf.mxu1 }
  0xeb   : > { %v394_v32 = vrot.slane %v376_v27, 1  ;;  %v399_v34 = vsel %vm392_vm1, %v396_v28, %v398_v29  ;;  %v407_v35 = vadd.f32 %v729_v24, %v398_v29 }
  0xec   : > { %v406_v41 = vadd.f32 %v728_v20, %v399_v34 }
  0xed   : > { %v395_v37 = vsel %vm392_vm1, %v393_v31, %v394_v32  ;;  %v397_v38 = vsel %vm392_vm1, %v394_v32, %v396_v28 }
  0xee   : > { %v404_v48 = vadd.f32 %v395_v37, %v275_v22  ;;  %v405_v49 = vadd.f32 %v397_v38, %v278_v26 }
  0xfc   : > { %v760_v30 = vpop.f32.mrf.mxu0 }
  0xfd   : > { %v514_v39 = vrot.slane %v760_v30, 2 }
  0xfe   : > { %v491_v33 = vpop.f32.mrf.mxu0 }
  0xff   : > { %v511_v44 = vrot.slane %v491_v33, 2 }
 0x100   : > { %v761_v36 = vpop.f32.mrf.mxu0 }
 0x101   : > { %v516_v40 = vrot.slane %v761_v36, 2 }
 0x102   : > { %v494_v43 = vpop.f32.mrf.mxu0 }
 0x103   : > { %v517_v45 = vsel %vm510_vm2, %v514_v39, %v516_v40  ;;  %v525_v46 = vadd.f32 %v516_v40, %v407_v35  ;;  %v512_v47 = vrot.slane %v494_v43, 2 }
 0x104   : > { %v524_v50 = vadd.f32 %v517_v45, %v406_v41 }
 0x105   : > { %v536_v51 = vadd.f32 %v677_v42, %v525_v46  ;;  %v513_v52 = vsel %vm510_vm2, %v511_v44, %v512_v47  ;;  %v515_v53 = vsel %vm510_vm2, %v512_v47, %v514_v39 }
 0x106   : > { %v535_v54 = vadd.f32 %v677_v42, %v524_v50  ;;  %v522_v55 = vadd.f32 %v513_v52, %v404_v48  ;;  %v523_v56 = vadd.f32 %v515_v53, %v405_v49 }
 0x107   : > { %v540_v57 = vmax.f32 %v536_v51, 0.0 }
 0x108   : > { %v539_v58 = vmax.f32 %v535_v54, 0.0  ;;  %v533_v59 = vadd.f32 %v677_v42, %v522_v55  ;;  %v534_v60 = vadd.f32 %v677_v42, %v523_v56 }
 0x109   : > { %v689_v61 = vpack.c.bf16 %v540_v57, %v540_v57 }
 0x10a   : > { %v688_v62 = vpack.c.bf16 %v539_v58, %v539_v58  ;;  %v537_v63 = vmax.f32 %v533_v59, 0.0  ;;  %v538_v0 = vmax.f32 %v534_v60, 0.0 }
 0x10b   : > { %562 = vst.msk [vmem:[%s170_s7 + $0xc] sm:$0x7] %vm561_vm3, %v689_v61 }
 0x10c   : > { %560 = vst.msk [vmem:[%s170_s7 + $0x8] sm:$0xf] %vm557_vm4, %v688_v62  ;;  %v686_v1 = vpack.c.bf16 %v537_v63, %v537_v63  ;;  %v687_v2 = vpack.c.bf16 %v538_v0, %v538_v0 }
 0x10e   : > { %558 = vst.msk [vmem:[%s170_s7] sm:$0xf] %vm557_vm4, %v686_v1  ;;  %559 = vst.msk [vmem:[%s170_s7 + $0x4] sm:$0xf] %vm557_vm4, %v687_v2 }
 0x10f PF: > { %s13_s12 = sadd.s32 1, %s796_s12  }
 0x110   : > { %p10_p4 = scmp.ge.s32.totalorder %s13_s12, 4  }
 0x112   :  { %12 = sbr.rel (!%p10_p4) target bundleno = 1 (0x1), region = 64 }

// kernel: _lambda_.9
= control target key start
LH: loop header
LB: loop body
LE: loop exit
PB: predicated region body
PF: predicated region fallthrough
CT: control target
= control target key end

     0   :  { %s1004_s12 = smov 0   ;;  %s1207_s0 = inlined_call_operand.vmem [shape: bf16[2,17,120], index: 0, kind: input, shape index: {}]   ;;  %s1208_s1 = inlined_call_operand.vmem [shape: bf16[3,120,240], index: 1, kind: input, shape index: {}]   ;;  %s1209_s2 = inlined_call_operand.vmem [shape: f32[1,240], index: 2, kind: input, shape index: {}]   ;;  %s1210_s3 = inlined_call_operand.vmem [shape: bf16[2,15,240], index: 3, kind: output, shape index: {}]  }
   0x1 LB: > { %s774_s13 = sadd.s32 4294967295, %s981_s12   ;;  %p778_p0 = scmp.ge.s32.totalorder %s981_s12, 1  ;;  %s981_s12 = sphi %s1004_s12, %s13_s12  }
   0x2   : > { %p137_p1 = scmp.lt.s32.totalorder %s981_s12, 3 }
   0x4   : > { %p138_p2 = pnand %p778_p0, %p137_p1 }
   0x5   : > { %p161_p3 = scmp.lt.s32.totalorder (!%p138_p2), %s774_s13, 1 }
   0x6   : > { %141 = sbr.rel (%p138_p2) target bundleno = 290 (0x122), region = 32 }
   0xb   : > { %v189_v0 = vld [vmem:[%s1208_s1 + $0x70] sm:$0xff]  ;;  %vm280_vm0 = vcmask 1043456   ;;  %v817_v1 = vld [vmem:[%s1208_s1 + $0xe8] sm:$0xff]  ;;  %v983_v7 = vmov 0   ;;  %v910_v8 = vld [vmem:[%s1208_s1 + $0xdc] ss:$8 sps:$4 sm:$0xff]  }
   0xc   : > { %v799_v2 = vcombine.high %v189_v0, %v189_v0  ;;  %v833_v3 = vcombine.high %v817_v1, %v817_v1  ;;  %v798_v4 = vcombine.low %v189_v0, %v189_v0  ;;  %v832_v5 = vcombine.low %v817_v1, %v817_v1  ;;  %v908_v6 = vld [vmem:[%s1208_s1 + $0x64] ss:$8 sps:$4 sm:$0xff]   ;;  %319 = vmatprep.mubr.bf16.mxu0 %v983_v7  ;;  %v912_v11 = vld [vmem:[%s1208_s1 + $0x60] ss:$8 sps:$4 sm:$0xff]   ;;  %v914_v13 = vld [vmem:[%s1208_s1 + $0x54] ss:$8 sps:$4 sm:$0xff]  }
   0xd   : > { %465 = vmatprep.mubr.bf16.mxu1 %v983_v7  ;;  %v913_v12 = vld [vmem:[%s1208_s1 + $0xd8] ss:$8 sps:$4 sm:$0xff]   ;;  %v916_v14 = vld [vmem:[%s1208_s1 + $0xcc] ss:$8 sps:$4 sm:$0xff]   ;;  %v919_v16 = vld [vmem:[%s1208_s1 + $0xc8] ss:$8 sps:$4 sm:$0xff]  }
   0xe   : > { %800 = vmatprep.subr.msk.bf16.mxu0 %vm280_vm0, %v799_v2  ;;  %834 = vmatprep.subr.msk.bf16.mxu1 %vm280_vm0, %v833_v3  ;;  %v282_v9 = vsel %vm280_vm0, %v798_v4, 0  ;;  %v428_v10 = vsel %vm280_vm0, %v832_v5, 0  ;;  %v918_v15 = vld [vmem:[%s1208_s1 + $0x50] ss:$8 sps:$4 sm:$0xff]   ;;  %v920_v17 = vld [vmem:[%s1208_s1 + $0x44] ss:$8 sps:$4 sm:$0xff]  }
   0xf   : > { %288 = vmatpush1.bf16.msra.mxu0 %v282_v9  ;;  %434 = vmatpush1.bf16.msra.mxu1 %v428_v10  ;;  %v922_v18 = vld [vmem:[%s1208_s1 + $0xbc] ss:$8 sps:$4 sm:$0xff]   ;;  %s1214_s13 = smov (!%p161_p3, %s774_s13), 1  ;;  %v924_v19 = vld [vmem:[%s1208_s1 + $0x40] ss:$8 sps:$4 sm:$0xff]   ;;  %vm273_vm1 = vcmask 982016   ;;  %v676_v9 = vlaneseq }
  0x10   : > { %289 = vmatprep.subr.bf16.mxu0 %v908_v6  ;;  %435 = vmatprep.subr.bf16.mxu1 %v910_v8  ;;  %v925_v20 = vld [vmem:[%s1208_s1 + $0xb8] ss:$8 sps:$4 sm:$0xff]   ;;  %v926_v21 = vld [vmem:[%s1208_s1 + $0x34] ss:$8 sps:$4 sm:$0xff]   ;;  %s894_s21 = smul.u32 12, %s1214_s13  ;;  %vm486_vm2 = vcmask 1046528  }
  0x11   : > { %v928_v22 = vld [vmem:[%s1208_s1 + $0xac] ss:$8 sps:$4 sm:$0xff]   ;;  %v930_v23 = vld [vmem:[%s1208_s1 + $0x30] ss:$8 sps:$4 sm:$0xff]   ;;  %v934_v26 = vld [vmem:[%s1208_s1 + $0x9c] ss:$8 sps:$4 sm:$0xff]  }
  0x12   : > { %v931_v24 = vld [vmem:[%s1208_s1 + $0xa8] ss:$8 sps:$4 sm:$0xff]   ;;  %v932_v25 = vld [vmem:[%s1208_s1 + $0x24] ss:$8 sps:$4 sm:$0xff]   ;;  %s1088_s5 = scalar_lea.vmem %s1207_s0, %s894_s21  ;;  %v937_v28 = vld [vmem:[%s1208_s1 + $0x98] ss:$8 sps:$4 sm:$0xff]  }
  0x13   : > { %290 = vmatpush1.bf16.msra.mxu0 %v912_v11  ;;  %436 = vmatpush1.bf16.msra.mxu1 %v913_v12  ;;  %v936_v27 = vld [vmem:[%s1208_s1 + $0x20] ss:$8 sps:$4 sm:$0xff]   ;;  %v938_v29 = vld [vmem:[%s1208_s1 + $0x14] ss:$8 sps:$4 sm:$0xff]   ;;  %v942_v31 = vld [vmem:[%s1208_s1 + $0x10] ss:$8 sps:$4 sm:$0xff]  }
  0x14   : > { %291 = vmatprep.subr.bf16.mxu0 %v914_v13  ;;  %437 = vmatprep.subr.bf16.mxu1 %v916_v14  ;;  %v940_v30 = vld [vmem:[%s1208_s1 + $0x8c] ss:$8 sps:$4 sm:$0xff]   ;;  %v943_v32 = vld [vmem:[%s1208_s1 + $0x88] ss:$8 sps:$4 sm:$0xff]   ;;  %v946_v34 = vld [vmem:[%s1208_s1 + $0x7c] ss:$8 sps:$4 sm:$0xff]  }
  0x15   : > { %v944_v33 = vld [vmem:[%s1208_s1 + $0x4] ss:$8 sps:$4 sm:$0xff]   ;;  %v948_v36 = vld [vmem:[%s1208_s1] ss:$8 sps:$4 sm:$0xff]   ;;  %v955_v42 = vld [vmem:[%s1208_s1 + $0x154] ss:$8 sps:$4 sm:$0xff]  }
  0x16   : > { %v851_v35 = vld [vmem:[%s1208_s1 + $0x160] sm:$0xff]  ;;  %v953_v43 = vld [vmem:[%s1208_s1 + $0x150] ss:$8 sps:$4 sm:$0xff]   ;;  %v965_v45 = vld [vmem:[%s1088_s5 + $0x8] ss:$0 sps:$4 sm:$0x11]  }
  0x17   : > { %292 = vmatpush1.bf16.msra.mxu0 %v918_v15  ;;  %438 = vmatpush1.bf16.msra.mxu1 %v919_v16  ;;  %v949_v37 = vld [vmem:[%s1208_s1 + $0x78] ss:$8 sps:$4 sm:$0xff]   ;;  %v867_v38 = vcombine.high %v851_v35, %v851_v35  ;;  %v866_v39 = vcombine.low %v851_v35, %v851_v35  ;;  %v958_v44 = vld [vmem:[%s1208_s1 + $0x144] ss:$8 sps:$4 sm:$0xff]   ;;  %v961_v47 = vld [vmem:[%s1208_s1 + $0x134] ss:$8 sps:$4 sm:$0xff]  }
  0x18   : > { %293 = vmatprep.subr.bf16.mxu0 %v920_v17  ;;  %439 = vmatprep.subr.bf16.mxu1 %v922_v18  ;;  %v950_v40 = vld [vmem:[%s1088_s5] sm:$0xff]   ;;  %v959_v48 = vld [vmem:[%s1208_s1 + $0x130] ss:$8 sps:$4 sm:$0xff]   ;;  %v968_v51 = vld [vmem:[%s1208_s1 + $0x114] ss:$8 sps:$4 sm:$0xff]   ;;  %v677_v10 = vshrl.u32 %v676_v9, 7 }
  0x19   : > { %v593_v41 = vsel %vm280_vm0, %v866_v39, 0  ;;  %v956_v46 = vld [vmem:[%s1208_s1 + $0x140] ss:$8 sps:$4 sm:$0xff]   ;;  %v964_v49 = vld [vmem:[%s1208_s1 + $0x124] ss:$8 sps:$4 sm:$0xff]   ;;  %vm655_vm3 = vcmask 1045504  }
  0x1a   : > { %v962_v50 = vld [vmem:[%s1208_s1 + $0x120] ss:$8 sps:$4 sm:$0xff]   ;;  %v966_v52 = vld [vmem:[%s1208_s1 + $0x110] ss:$8 sps:$4 sm:$0xff]   ;;  %v971_v53 = vld [vmem:[%s1208_s1 + $0x104] ss:$8 sps:$4 sm:$0xff]  }
  0x1b   : > { %294 = vmatpush1.bf16.msra.mxu0 %v924_v19  ;;  %440 = vmatpush1.bf16.msra.mxu1 %v925_v20  ;;  %v969_v54 = vld [vmem:[%s1208_s1 + $0x100] ss:$8 sps:$4 sm:$0xff]   ;;  %v974_v55 = vld [vmem:[%s1208_s1 + $0xf4] ss:$8 sps:$4 sm:$0xff]   ;;  %v972_v56 = vld [vmem:[%s1208_s1 + $0xf0] ss:$8 sps:$4 sm:$0xff]  }
  0x1c   : > { %295 = vmatprep.subr.bf16.mxu0 %v926_v21  ;;  %441 = vmatprep.subr.bf16.mxu1 %v928_v22  ;;  %v678_v15 = vsub.s32 0, %v677_v10  ;;  %v674_v18 = vld [vmem:[%s1209_s2] sm:$0x3]  ;;  %v682_v19 = vsub.s32 1, %v677_v10  ;;  %vm710_vm4 = vsmask.f32 3328 }
  0x1d   : > { %s875_s9 = sshll.u32 %s1214_s13, 4  ;;  %vm706_vm5 = vcmask 916484   ;;  %vm713_vm6 = vsmask.f32 7424  ;;  %vm1192_vm7 = vmand %vm280_vm0, %vm710_vm4 }
  0x1e   : > { %s170_s13 = scalar_lea.vmem %s1210_s3, %s875_s9  ;;  %vm714_vm8 = vmand %vm706_vm5, %vm713_vm6 }
  0x1f   : > { %296 = vmatpush1.bf16.msra.mxu0 %v930_v23  ;;  %442 = vmatpush1.bf16.msra.mxu1 %v931_v24  ;;  %vm707_vm9 = vmor %vm706_vm5, %vm280_vm0 }
  0x20   : > { %297 = vmatprep.subr.bf16.mxu0 %v932_v25  ;;  %443 = vmatprep.subr.bf16.mxu1 %v934_v26  ;;  %v679_v25 = vrot.slane %v674_v18, %v678_v15  ;;  %vm715_vm10 = vmor %vm714_vm8, %vm1192_vm7 }
  0x23   : > { %298 = vmatpush1.bf16.msra.mxu0 %v936_v27  ;;  %444 = vmatpush1.bf16.msra.mxu1 %v937_v28 }
  0x24   : > { %299 = vmatprep.subr.bf16.mxu0 %v938_v29  ;;  %445 = vmatprep.subr.bf16.mxu1 %v940_v30  ;;  %v683_v30 = vrot.slane %v674_v18, %v682_v19 }
  0x27   : > { %300 = vmatpush1.bf16.msra.mxu0 %v942_v31  ;;  %446 = vmatpush1.bf16.msra.mxu1 %v943_v32 }
  0x28   : > { %301 = vmatprep.subr.bf16.mxu0 %v944_v33  ;;  %447 = vmatprep.subr.bf16.mxu1 %v946_v34 }
  0x2b   : > { %302 = vmatpush1.bf16.msra.mxu0 %v948_v36  ;;  %448 = vmatpush1.bf16.msra.mxu1 %v949_v37 }
  0x2c   : > { %868 = vmatprep.subr.msk.bf16.mxu0 %vm280_vm0, %v867_v38  ;;  %878 = vmatprep.subr.msk.bf16.mxu1 %vm280_vm0, %v867_v38 }
  0x2e   : > { %801 = vmatmul.mubr.msk.bf16.vlgmr.msra.gmra.mxu0 %vm273_vm1, %v950_v40  ;;  %835 = vmatmul.mubr.msk.bf16.vlgmr.msra.gmra.mxu1 %vm273_vm1, %v950_v40 }
  0x2f   : > { %599 = vmatpush1.bf16.msra.mxu0 %v593_v41  ;;  %886 = vmatpush1.bf16.msra.mxu1 %v593_v41 }
  0x30   : > { %600 = vmatprep.subr.bf16.mxu0 %v955_v42  ;;  %879 = vmatprep.subr.bf16.mxu1 %v955_v42 }
  0x31   : > { %329 = vmatprep.mubr.bf16.mxu0 %v983_v7  ;;  %475 = vmatprep.mubr.bf16.mxu1 %v983_v7 }
  0x33   : > { %601 = vmatpush1.bf16.msra.mxu0 %v953_v43  ;;  %887 = vmatpush1.bf16.msra.mxu1 %v953_v43 }
  0x34   : > { %602 = vmatprep.subr.bf16.mxu0 %v958_v44  ;;  %880 = vmatprep.subr.bf16.mxu1 %v958_v44 }
  0x36   : > { %802 = vmatmul.mubr.msk.bf16.gmra.mxu0 %vm273_vm1, %v965_v45  ;;  %836 = vmatmul.mubr.msk.bf16.gmra.mxu1 %vm273_vm1, %v965_v45 }
  0x37   : > { %603 = vmatpush1.bf16.msra.mxu0 %v956_v46  ;;  %888 = vmatpush1.bf16.msra.mxu1 %v956_v46 }
  0x38   : > { %604 = vmatprep.subr.bf16.mxu0 %v961_v47  ;;  %881 = vmatprep.subr.bf16.mxu1 %v961_v47 }
  0x39   : > { %630 = vmatprep.mubr.bf16.mxu0 %v983_v7  ;;  %640 = vmatprep.mubr.bf16.mxu1 %v983_v7 }
  0x3b   : > { %605 = vmatpush1.bf16.msra.mxu0 %v959_v48  ;;  %889 = vmatpush1.bf16.msra.mxu1 %v959_v48 }
  0x3c   : > { %606 = vmatprep.subr.bf16.mxu0 %v964_v49  ;;  %882 = vmatprep.subr.bf16.mxu1 %v964_v49 }
  0x3f   : > { %607 = vmatpush1.bf16.msra.mxu0 %v962_v50  ;;  %890 = vmatpush1.bf16.msra.mxu1 %v962_v50 }
  0x40   : > { %608 = vmatprep.subr.bf16.mxu0 %v968_v51  ;;  %883 = vmatprep.subr.bf16.mxu1 %v968_v51 }
  0x43   : > { %609 = vmatpush1.bf16.msra.mxu0 %v966_v52  ;;  %891 = vmatpush1.bf16.msra.mxu1 %v966_v52 }
  0x44   : > { %610 = vmatprep.subr.bf16.mxu0 %v971_v53  ;;  %884 = vmatprep.subr.bf16.mxu1 %v971_v53 }
  0x47   : > { %611 = vmatpush1.bf16.msra.mxu0 %v969_v54  ;;  %892 = vmatpush1.bf16.msra.mxu1 %v969_v54 }
  0x48   : > { %612 = vmatprep.subr.bf16.mxu0 %v974_v55  ;;  %885 = vmatprep.subr.bf16.mxu1 %v974_v55 }
  0x4b   : > { %613 = vmatpush1.bf16.msra.mxu0 %v972_v56  ;;  %893 = vmatpush1.bf16.msra.mxu1 %v972_v56 }
  0x4e   : > { %869 = vmatmul.mubr.msk.bf16.vlgmr.msra.gmra.mxu0 %vm273_vm1, %v950_v40  ;;  %870 = vmatmul.mubr.msk.bf16.vlgmr.msra.gmra.mxu1 %vm273_vm1, %v965_v45 }
  0xee   : > { %v321_v57 = vpop.f32.mrf.mxu0  ;;  %v467_v58 = vpop.f32.mrf.mxu1 }
  0xef   : > { %v487_v11 = vrot.slane %v467_v58, 1 }
  0xf0   : > { %v323_v59 = vpop.f32.mrf.mxu0  ;;  %v469_v60 = vpop.f32.mrf.mxu1 }
  0xf1   : > { %v490_v16 = vrot.slane %v469_v60, 1 }
  0xf2   : > { %v325_v61 = vpop.f32.mrf.mxu0  ;;  %v471_v62 = vpop.f32.mrf.mxu1 }
  0xf3   : > { %v488_v12 = vrot.slane %v471_v62, 1 }
  0xf4   : > { %v327_v63 = vpop.f32.mrf.mxu0  ;;  %v473_v0 = vpop.f32.mrf.mxu1 }
  0xf5   : > { %v491_v17 = vrot.slane %v473_v0, 1  ;;  %v489_v22 = vsel %vm486_vm2, %v487_v11, %v488_v12  ;;  %v499_v32 = vadd.f32 %v488_v12, %v325_v61 }
  0xf6   : > { %v331_v1 = vpop.f32.mrf.mxu0  ;;  %v477_v2 = vpop.f32.mrf.mxu1  ;;  %v497_v31 = vadd.f32 %v489_v22, %v321_v57  ;;  %v716_v57 = vld [vmem:[%s170_s13 + $0x8] sm:$0xff] }
  0xf7   : > { %v492_v27 = vsel %vm486_vm2, %v490_v16, %v491_v17  ;;  %v500_v41 = vadd.f32 %v491_v17, %v327_v63 }
  0xf8   : > { %v332_v3 = vpop.f32.mrf.mxu0  ;;  %v478_v4 = vpop.f32.mrf.mxu1  ;;  %v498_v40 = vadd.f32 %v492_v27, %v323_v59 }
  0xfa   : > { %v333_v5 = vpop.f32.mrf.mxu0  ;;  %v479_v6 = vpop.f32.mrf.mxu1 }
  0xfc   : > { %v334_v7 = vpop.f32.mrf.mxu0  ;;  %v480_v8 = vpop.f32.mrf.mxu1 }
 0x10e   : > { %v632_v13 = vpop.f32.mrf.mxu0  ;;  %v642_v14 = vpop.f32.mrf.mxu1 }
 0x10f   : > { %v662_v23 = vrot.slane %v642_v14, 2  ;;  %v656_v28 = vrot.slane %v632_v13, 2 }
 0x110   : > { %v634_v20 = vpop.f32.mrf.mxu0  ;;  %v644_v21 = vpop.f32.mrf.mxu1 }
 0x111   : > { %v659_v33 = vrot.slane %v634_v20, 2  ;;  %v664_v36 = vrot.slane %v644_v21, 2 }
 0x112   : > { %v636_v24 = vpop.f32.mrf.mxu0  ;;  %v646_v26 = vpop.f32.mrf.mxu1 }
 0x113   : > { %v657_v29 = vrot.slane %v636_v24, 2 }
 0x114   : > { %v638_v34 = vpop.f32.mrf.mxu0  ;;  %v647_v35 = vpop.f32.mrf.mxu1 }
 0x115   : > { %v658_v37 = vsel %vm655_vm3, %v656_v28, %v657_v29  ;;  %v663_v38 = vsel %vm655_vm3, %v657_v29, %v662_v23  ;;  %v660_v39 = vrot.slane %v638_v34, 2 }
 0x116   : > { %v670_v42 = vadd.f32 %v658_v37, %v497_v31  ;;  %v672_v43 = vadd.f32 %v663_v38, %v499_v32 }
 0x117   : > { %v661_v44 = vsel %vm655_vm3, %v659_v33, %v660_v39  ;;  %v665_v45 = vsel %vm655_vm3, %v660_v39, %v664_v36 }
 0x118   : > { %v686_v46 = vadd.f32 %v679_v25, %v670_v42  ;;  %v688_v47 = vadd.f32 %v679_v25, %v672_v43  ;;  %v671_v48 = vadd.f32 %v661_v44, %v498_v40  ;;  %v673_v49 = vadd.f32 %v665_v45, %v500_v41 }
 0x11a   : > { %v687_v51 = vadd.f32 %v683_v30, %v671_v48  ;;  %v689_v52 = vadd.f32 %v683_v30, %v673_v49  ;;  %v690_v53 = vmax.f32 %v686_v46, 0.0  ;;  %v692_v54 = vmax.f32 %v688_v47, 0.0 }
 0x11c   : > { %v691_v55 = vmax.f32 %v687_v51, 0.0  ;;  %v693_v56 = vmax.f32 %v689_v52, 0.0 }
 0x11e   : > { %v876_v58 = vpack.c.bf16 %v691_v55, %v690_v53  ;;  %v877_v59 = vpack.c.bf16 %v693_v56, %v692_v54 }
 0x120   : > { %708 = vst.msk [vmem:[%s170_s13] sm:$0xff] %vm707_vm9, %v876_v58  ;;  %v717_v60 = vsel %vm715_vm10, %v877_v59, %v716_v57 }
 0x121   : > { %718 = vst [vmem:[%s170_s13 + $0x8] sm:$0xff] %v717_v60 }
 0x122 PF: > { %s13_s12 = sadd.s32 1, %s981_s12  }
 0x123   : > { %p10_p4 = scmp.ge.s32.totalorder %s13_s12, 4  }
 0x125   :  { %12 = sbr.rel (!%p10_p4) target bundleno = 1 (0x1), region = 64 }

// kernel: _lambda_.11
= control target key start
LH: loop header
LB: loop body
LE: loop exit
PB: predicated region body
PF: predicated region fallthrough
CT: control target
= control target key end

     0   :  { %s412_s6 = smov 0   ;;  %s494_s0 = inlined_call_operand.vmem [shape: bf16[2,9,9,16], index: 0, kind: input, shape index: {}]   ;;  %s495_s1 = inlined_call_operand.vmem [shape: bf16[2,7,7,16], index: 1, kind: output, shape index: {}]  }
   0x1 LB: > { %s375_s7 = sadd.s32 4294967295, %s400_s6   ;;  %p379_p0 = scmp.ge.s32.totalorder %s400_s6, 1  ;;  %s400_s6 = sphi %s412_s6, %s11_s6  }
   0x2   : > { %p87_p1 = scmp.lt.s32.totalorder %s400_s6, 3 }
   0x4   : > { %p88_p2 = pnand %p379_p0, %p87_p1 }
   0x5   : > { %p107_p3 = scmp.lt.s32.totalorder (!%p88_p2), %s375_s7, 1 }
   0x6   : > { %91 = sbr.rel (%p88_p2) target bundleno = 59 (0x3b), region = 24 }
   0xb   : > { %s499_s7 = smov (!%p107_p3, %s375_s7), 1  ;;  %vm188_vm0 = vcmask 1045504   ;;  %vm296_vm1 = vcmask 125952   ;;  %vm297_vm2 = vsmask.f32 3328 }
   0xc   : > { %s384_s8 = smul.u32 72, %s499_s7  ;;  %vm454_vm3 = vmand %vm296_vm1, %vm297_vm2 }
   0xd   : > { %s385_s12 = smul.u32 28, %s499_s7 }
   0xe   : > { %s426_s11 = scalar_lea.vmem %s494_s0, %s384_s8 }
   0xf   : > { %v117_v0 = vld [vmem:[%s426_s11] ss:$8 sps:$4 sm:$0xff]   ;;  %v118_v1 = vld [vmem:[%s426_s11 + $0x4] sm:$0x1]  ;;  %v120_v2 = vld [vmem:[%s426_s11 + $0xc] sm:$0x1]  ;;  %s448_s15 = scalar_lea.vmem %s495_s1, %s385_s12 }
  0x10   : > { %v121_v3 = vld [vmem:[%s426_s11 + $0x10] ss:$8 sps:$4 sm:$0xff]   ;;  %v122_v4 = vld [vmem:[%s426_s11 + $0x14] sm:$0x1]  ;;  %v135_v5 = vunpack.c.l.bf16 %v117_v0  ;;  %v136_v6 = vunpack.c.l.bf16 %v118_v1  ;;  %v137_v7 = vunpack.c.h.bf16 %v117_v0  ;;  %v138_v8 = vunpack.c.l.bf16 %v120_v2  ;;  %v124_v12 = vld [vmem:[%s426_s11 + $0x1c] sm:$0x1] }
  0x11   : > { %v139_v9 = vunpack.c.l.bf16 %v121_v3  ;;  %v140_v10 = vunpack.c.l.bf16 %v122_v4  ;;  %v141_v11 = vunpack.c.h.bf16 %v121_v3  ;;  %v125_v17 = vld [vmem:[%s426_s11 + $0x20] ss:$8 sps:$4 sm:$0xff]   ;;  %v126_v26 = vld [vmem:[%s426_s11 + $0x24] sm:$0x1]  ;;  %v142_v29 = vunpack.c.l.bf16 %v124_v12  ;;  %v128_v43 = vld [vmem:[%s426_s11 + $0x2c] sm:$0x1] }
  0x12   : > { %v160_v13 = vrot.slane %v135_v5, 1  ;;  %v161_v14 = vrot.slane %v137_v7, 1  ;;  %v189_v15 = vrot.slane %v135_v5, 2  ;;  %v190_v16 = vrot.slane %v136_v6, 2  ;;  %v129_v44 = vld [vmem:[%s426_s11 + $0x30] ss:$8 sps:$4 sm:$0xff]  }
  0x13   : > { %v162_v18 = vrot.slane %v139_v9, 1  ;;  %v192_v19 = vrot.slane %v137_v7, 2  ;;  %v193_v20 = vrot.slane %v138_v8, 2  ;;  %v195_v21 = vrot.slane %v139_v9, 2  ;;  %v130_v61 = vld [vmem:[%s426_s11 + $0x34] sm:$0x1] }
  0x14   : > { %v174_v22 = vadd.f32 %v160_v13, %v135_v5  ;;  %v175_v23 = vadd.f32 %v161_v14, %v137_v7  ;;  %v191_v24 = vsel %vm188_vm0, %v189_v15, %v190_v16  ;;  %v196_v25 = vrot.slane %v140_v10, 2 }
  0x15   : > { %v176_v27 = vadd.f32 %v162_v18, %v139_v9  ;;  %v194_v28 = vsel %vm188_vm0, %v192_v19, %v193_v20  ;;  %v143_v30 = vunpack.c.l.bf16 %v125_v17  ;;  %v163_v34 = vrot.slane %v141_v11, 1 }
  0x16   : > { %v197_v31 = vsel %vm188_vm0, %v195_v21, %v196_v25  ;;  %v217_v32 = vadd.f32 %v191_v24, %v174_v22  ;;  %v218_v33 = vadd.f32 %v194_v28, %v175_v23  ;;  %v198_v36 = vrot.slane %v141_v11, 2  ;;  %v299_v23 = vld [vmem:[%s448_s15] sm:$0xf] }
  0x17   : > { %v219_v35 = vadd.f32 %v197_v31, %v176_v27  ;;  %v199_v37 = vrot.slane %v142_v29, 2  ;;  %v144_v38 = vunpack.c.l.bf16 %v126_v26  ;;  %v177_v41 = vadd.f32 %v163_v34, %v141_v11 }
  0x18   : > { %v224_v39 = vadd.f32 %v217_v32, %v137_v7  ;;  %v225_v40 = vadd.f32 %v218_v33, %v139_v9  ;;  %v145_v42 = vunpack.c.h.bf16 %v125_v17  ;;  %v164_v47 = vrot.slane %v143_v30, 1 }
  0x19   : > { %v226_v45 = vadd.f32 %v219_v35, %v141_v11  ;;  %v200_v46 = vsel %vm188_vm0, %v198_v36, %v199_v37  ;;  %v201_v48 = vrot.slane %v143_v30, 2  ;;  %v202_v52 = vrot.slane %v144_v38, 2  ;;  %v132_v36 = vld [vmem:[%s426_s11 + $0x3c] sm:$0x1] }
  0x1a   : > { %v234_v49 = vadd.f32 %v224_v39, %v161_v14  ;;  %v235_v50 = vadd.f32 %v225_v40, %v162_v18  ;;  %v220_v51 = vadd.f32 %v200_v46, %v177_v41  ;;  %v178_v54 = vadd.f32 %v164_v47, %v143_v30  ;;  %v305_v40 = vld [vmem:[%s448_s15 + $0x8] sm:$0xf] }
  0x1b   : > { %v236_v53 = vadd.f32 %v226_v45, %v163_v34  ;;  %v146_v55 = vunpack.c.l.bf16 %v128_v43  ;;  %v147_v56 = vunpack.c.l.bf16 %v129_v44  ;;  %v203_v60 = vsel %vm188_vm0, %v201_v48, %v202_v52  ;;  %v134_v52 = vld [vmem:[%s426_s11 + $0x44] sm:$0x1] }
  0x1c   : > { %v246_v57 = vadd.f32 %v234_v49, %v194_v28  ;;  %v247_v58 = vadd.f32 %v235_v50, %v197_v31  ;;  %v227_v59 = vadd.f32 %v220_v51, %v143_v30  ;;  %v221_v63 = vadd.f32 %v203_v60, %v178_v54  ;;  %v133_v51 = vld [vmem:[%s426_s11 + $0x40] sm:$0xf]  ;;  %v308_v54 = vld [vmem:[%s448_s15 + $0xc] sm:$0xf] }
  0x1d   : > { %v248_v62 = vadd.f32 %v236_v53, %v200_v46  ;;  %v165_v0 = vrot.slane %v145_v42, 1  ;;  %v204_v1 = vrot.slane %v145_v42, 2  ;;  %v205_v5 = vrot.slane %v146_v55, 2 }
  0x1e   : > { %v253_v2 = vadd.f32 %v246_v57, %v139_v9  ;;  %v254_v3 = vadd.f32 %v247_v58, %v141_v11  ;;  %v237_v4 = vadd.f32 %v227_v59, %v164_v47  ;;  %v228_v6 = vadd.f32 %v221_v63, %v145_v42 }
  0x1f   : > { %v255_v7 = vadd.f32 %v248_v62, %v143_v30  ;;  %v179_v8 = vadd.f32 %v165_v0, %v145_v42  ;;  %v148_v10 = vunpack.c.l.bf16 %v130_v61  ;;  %v206_v15 = vsel %vm188_vm0, %v204_v1, %v205_v5 }
  0x20   : > { %v263_v12 = vadd.f32 %v253_v2, %v162_v18  ;;  %v264_v13 = vadd.f32 %v254_v3, %v163_v34  ;;  %v249_v14 = vadd.f32 %v237_v4, %v203_v60  ;;  %v238_v11 = vadd.f32 %v228_v6, %v165_v0  ;;  %v311_v3 = vld [vmem:[%s448_s15 + $0x10] sm:$0xf] }
  0x21   : > { %v265_v16 = vadd.f32 %v255_v7, %v164_v47  ;;  %v222_v9 = vadd.f32 %v206_v15, %v179_v8  ;;  %v166_v17 = vrot.slane %v147_v56, 1  ;;  %v207_v22 = vrot.slane %v147_v56, 2 }
  0x22   : > { %v275_v19 = vadd.f32 %v263_v12, %v197_v31  ;;  %v276_v20 = vadd.f32 %v264_v13, %v200_v46  ;;  %v256_v21 = vadd.f32 %v249_v14, %v145_v42  ;;  %v250_v26 = vadd.f32 %v238_v11, %v206_v15  ;;  %v302_v31 = vld [vmem:[%s448_s15 + $0x4] sm:$0xf]  ;;  %v314_v11 = vld [vmem:[%s448_s15 + $0x14] sm:$0xf] }
  0x23   : > { %v277_v24 = vadd.f32 %v265_v16, %v203_v60  ;;  %v229_v25 = vadd.f32 %v222_v9, %v147_v56  ;;  %v180_v18 = vadd.f32 %v166_v17, %v147_v56  ;;  %v208_v30 = vrot.slane %v148_v10, 2 }
  0x24   : > { %v282_v27 = vmul.f32 0.11111111, %v275_v19  ;;  %v283_v28 = vmul.f32 0.11111111, %v276_v20  ;;  %v266_v29 = vadd.f32 %v256_v21, %v165_v0  ;;  %v257_v35 = vadd.f32 %v250_v26, %v147_v56 }
  0x25   : > { %v284_v33 = vmul.f32 0.11111111, %v277_v24  ;;  %v239_v34 = vadd.f32 %v229_v25, %v166_v17  ;;  %v149_v37 = vunpack.c.h.bf16 %v129_v44  ;;  %v209_v42 = vsel %vm188_vm0, %v207_v22, %v208_v30 }
  0x26   : > { %v289_v38 = vpack.c.bf16 %v282_v27, %v282_v27  ;;  %v290_v39 = vpack.c.bf16 %v283_v28, %v283_v28  ;;  %v278_v41 = vadd.f32 %v266_v29, %v206_v15  ;;  %v223_v45 = vadd.f32 %v209_v42, %v180_v18 }
  0x27   : > { %v291_v43 = vpack.c.bf16 %v284_v33, %v284_v33  ;;  %v251_v46 = vadd.f32 %v239_v34, %v209_v42  ;;  %v267_v47 = vadd.f32 %v257_v35, %v166_v17  ;;  %v150_v50 = vunpack.c.l.bf16 %v132_v36 }
  0x28   : > { %v300_v48 = vsel %vm454_vm3, %v289_v38, %v299_v23  ;;  %v303_v44 = vsel %vm454_vm3, %v290_v39, %v302_v31  ;;  %v285_v49 = vmul.f32 0.11111111, %v278_v41  ;;  %v230_v56 = vadd.f32 %v223_v45, %v149_v37  ;;  %v317_v23 = vld [vmem:[%s448_s15 + $0x18] sm:$0xf] }
  0x29   : > { %301 = vst [vmem:[%s448_s15] sm:$0xf] %v300_v48  ;;  %304 = vst [vmem:[%s448_s15 + $0x4] sm:$0xf] %v303_v44  ;;  %v306_v53 = vsel %vm454_vm3, %v291_v43, %v305_v40  ;;  %v279_v55 = vadd.f32 %v267_v47, %v209_v42  ;;  %v232_v57 = vrot.slane %v149_v37, 1  ;;  %v242_v59 = vrot.slane %v149_v37, 2 }
  0x2a   : > { %307 = vst [vmem:[%s448_s15 + $0x8] sm:$0xf] %v306_v53  ;;  %v292_v58 = vpack.c.bf16 %v285_v49, %v285_v49  ;;  %v243_v60 = vrot.slane %v150_v50, 2  ;;  %v258_v61 = vadd.f32 %v251_v46, %v149_v37  ;;  %v151_v0 = vunpack.c.l.bf16 %v133_v51 }
  0x2b   : > { %v286_v62 = vmul.f32 0.11111111, %v279_v55  ;;  %v240_v63 = vadd.f32 %v232_v57, %v230_v56  ;;  %v152_v1 = vunpack.c.l.bf16 %v134_v52 }
  0x2c   : > { %v309_v2 = vsel %vm454_vm3, %v292_v58, %v308_v54  ;;  %v244_v4 = vsel %vm188_vm0, %v242_v59, %v243_v60  ;;  %v268_v5 = vadd.f32 %v258_v61, %v232_v57  ;;  %v261_v8 = vrot.slane %v151_v0, 1 }
  0x2d   : > { %310 = vst [vmem:[%s448_s15 + $0xc] sm:$0xf] %v309_v2  ;;  %v293_v6 = vpack.c.bf16 %v286_v62, %v286_v62  ;;  %v252_v7 = vadd.f32 %v244_v4, %v240_v63  ;;  %v271_v10 = vrot.slane %v151_v0, 2  ;;  %v272_v13 = vrot.slane %v152_v1, 2 }
  0x2e   : > { %v280_v12 = vadd.f32 %v268_v5, %v244_v4 }
  0x2f   : > { %v312_v14 = vsel %vm454_vm3, %v293_v6, %v311_v3  ;;  %v259_v15 = vadd.f32 %v252_v7, %v151_v0  ;;  %v273_v9 = vsel %vm188_vm0, %v271_v10, %v272_v13 }
  0x30   : > { %313 = vst [vmem:[%s448_s15 + $0x10] sm:$0xf] %v312_v14  ;;  %v287_v16 = vmul.f32 0.11111111, %v280_v12 }
  0x31   : > { %v269_v17 = vadd.f32 %v261_v8, %v259_v15 }
  0x32   : > { %v294_v19 = vpack.c.bf16 %v287_v16, %v287_v16 }
  0x33   : > { %v281_v20 = vadd.f32 %v273_v9, %v269_v17 }
  0x34   : > { %v315_v21 = vsel %vm454_vm3, %v294_v19, %v314_v11 }
  0x35   : > { %316 = vst [vmem:[%s448_s15 + $0x14] sm:$0xf] %v315_v21  ;;  %v288_v22 = vmul.f32 0.11111111, %v281_v20 }
  0x37   : > { %v295_v24 = vpack.c.bf16 %v288_v22, %v288_v22 }
  0x39   : > { %v318_v25 = vsel %vm454_vm3, %v295_v24, %v317_v23 }
  0x3a   : > { %319 = vst [vmem:[%s448_s15 + $0x18] sm:$0xf] %v318_v25 }
  0x3b PF: > { %s11_s6 = sadd.s32 1, %s400_s6  }
  0x3c   : > { %p8_p4 = scmp.ge.s32.totalorder %s11_s6, 4  }
  0x3e   :  { %10 = sbr.rel (!%p8_p4) target bundleno = 1 (0x1), region = 54 }

// kernel: _lambda_.10
= control target key start
LH: loop header
LB: loop body
LE: loop exit
PB: predicated region body
PF: predicated region fallthrough
CT: control target
= control target key end

     0   :  { %s945_s6 = smov 0   ;;  %s1380_s0 = inlined_call_operand.vmem [shape: bf16[2,15,15,16], index: 0, kind: input, shape index: {}]   ;;  %s1381_s1 = inlined_call_operand.vmem [shape: bf16[2,13,13,16], index: 1, kind: output, shape index: {}]  }
   0x1 LB: > { %s782_s7 = sadd.s32 4294967295, %s933_s6   ;;  %p786_p0 = scmp.ge.s32.totalorder %s933_s6, 1  ;;  %s933_s6 = sphi %s945_s6, %s11_s6  }
   0x2   : > { %p87_p1 = scmp.lt.s32.totalorder %s933_s6, 3 }
   0x4   : > { %p88_p2 = pnand %p786_p0, %p87_p1 }
   0x5   : > { %p107_p3 = scmp.lt.s32.totalorder (!%p88_p2), %s782_s7, 1 }
   0x6   : > { %91 = sbr.rel (%p88_p2) target bundleno = 119 (0x77), region = 24 }
   0xb   : > { %s1385_s7 = smov (!%p107_p3, %s782_s7), 1  ;;  %vm203_vm0 = vcmask 1046528   ;;  %vm295_vm1 = vcmask 1045504   ;;  %vm673_vm2 = vcmask 124928   ;;  %vm674_vm3 = vsmask.f32 2304 }
   0xc   : > { %s917_s8 = smul.u32 120, %s1385_s7  ;;  %vm671_vm4 = vcmask 125952   ;;  %vm1048_vm5 = vmand %vm673_vm2, %vm674_vm3 }
   0xd   : > { %s918_s12 = smul.u32 104, %s1385_s7 }
   0xe   : > { %s959_s11 = scalar_lea.vmem %s1380_s0, %s917_s8 }
   0xf   : > { %v844_v0 = vld [vmem:[%s959_s11] sm:$0xff]   ;;  %v903_v1 = vld [vmem:[%s959_s11 + $0x8] sm:$0xff]   ;;  %v904_v2 = vld [vmem:[%s959_s11 + $0x10] sm:$0xff]   ;;  %s1037_s15 = scalar_lea.vmem %s1381_s1, %s918_s12 }
  0x10   : > { %v845_v3 = vunpack.c.l.bf16 %v844_v0  ;;  %v846_v4 = vunpack.c.h.bf16 %v844_v0  ;;  %v849_v5 = vunpack.c.l.bf16 %v903_v1  ;;  %v850_v6 = vunpack.c.h.bf16 %v903_v1  ;;  %v905_v7 = vld [vmem:[%s959_s11 + $0x18] sm:$0xff]   ;;  %v906_v24 = vld [vmem:[%s959_s11 + $0x20] sm:$0xff]   ;;  %v907_v45 = vld [vmem:[%s959_s11 + $0x28] sm:$0xff]  }
  0x11   : > { %v853_v8 = vunpack.c.l.bf16 %v904_v2  ;;  %v965_v9 = vunpack.c.h.bf16 %v904_v2  ;;  %v967_v10 = vunpack.c.l.bf16 %v905_v7  ;;  %v969_v11 = vunpack.c.h.bf16 %v905_v7 }
  0x12   : > { %v204_v12 = vrot.slane %v845_v3, 1  ;;  %v205_v13 = vrot.slane %v846_v4, 1  ;;  %v207_v14 = vrot.slane %v849_v5, 1  ;;  %v208_v15 = vrot.slane %v850_v6, 1 }
  0x13   : > { %v210_v16 = vrot.slane %v853_v8, 1  ;;  %v972_v17 = vrot.slane %v965_v9, 1  ;;  %v296_v18 = vrot.slane %v845_v3, 2  ;;  %v297_v19 = vrot.slane %v846_v4, 2 }
  0x14   : > { %v206_v20 = vsel %vm203_vm0, %v204_v12, %v205_v13  ;;  %v209_v21 = vsel %vm203_vm0, %v207_v14, %v208_v15  ;;  %v299_v22 = vrot.slane %v849_v5, 2  ;;  %v300_v23 = vrot.slane %v850_v6, 2 }
  0x15   : > { %v979_v25 = vsel %vm203_vm0, %v210_v16, %v972_v17  ;;  %v269_v26 = vmax.f32 %v845_v3, %v206_v20  ;;  %v271_v27 = vmax.f32 %v849_v5, %v209_v21  ;;  %v298_v28 = vsel %vm295_vm1, %v296_v18, %v297_v19 }
  0x16   : > { %v273_v29 = vmax.f32 %v853_v8, %v979_v25  ;;  %v301_v30 = vsel %vm295_vm1, %v299_v22, %v300_v23  ;;  %v302_v31 = vrot.slane %v853_v8, 2  ;;  %v985_v32 = vrot.slane %v965_v9, 2 }
  0x17   : > { %v361_v33 = vmax.f32 %v269_v26, %v298_v28  ;;  %v363_v34 = vmax.f32 %v271_v27, %v301_v30  ;;  %v270_v35 = vmax.f32 %v846_v4, %v205_v13  ;;  %v987_v36 = vunpack.c.l.bf16 %v906_v24  ;;  %v908_v28 = vld [vmem:[%s959_s11 + $0x30] sm:$0xff]  }
  0x18   : > { %v304_v37 = vsel %vm295_vm1, %v302_v31, %v985_v32  ;;  %v991_v38 = vunpack.c.h.bf16 %v906_v24  ;;  %v213_v39 = vrot.slane %v967_v10, 1  ;;  %v995_v40 = vrot.slane %v969_v11, 1 }
  0x19   : > { %v365_v41 = vmax.f32 %v273_v29, %v304_v37  ;;  %v387_v42 = vmax.f32 %v361_v33, %v849_v5  ;;  %v389_v43 = vmax.f32 %v363_v34, %v853_v8  ;;  %v362_v44 = vmax.f32 %v270_v35, %v297_v19  ;;  %v676_v34 = vld [vmem:[%s1037_s15 + $0x4] sm:$0x7] }
  0x1a   : > { %v215_v46 = vsel %vm203_vm0, %v213_v39, %v995_v40  ;;  %v305_v47 = vrot.slane %v967_v10, 2  ;;  %v1002_v48 = vrot.slane %v969_v11, 2  ;;  %v272_v49 = vmax.f32 %v850_v6, %v208_v15 }
  0x1b   : > { %v391_v50 = vmax.f32 %v365_v41, %v967_v10  ;;  %v420_v51 = vmax.f32 %v387_v42, %v209_v21  ;;  %v422_v52 = vmax.f32 %v389_v43, %v979_v25  ;;  %v388_v53 = vmax.f32 %v362_v44, %v850_v6 }
  0x1c   : > { %v275_v54 = vmax.f32 %v967_v10, %v215_v46  ;;  %v307_v55 = vsel %vm295_vm1, %v305_v47, %v1002_v48  ;;  %v364_v56 = vmax.f32 %v272_v49, %v300_v23  ;;  %v1009_v57 = vunpack.c.l.bf16 %v907_v45 }
  0x1d   : > { %v451_v58 = vmax.f32 %v420_v51, %v301_v30  ;;  %v453_v59 = vmax.f32 %v422_v52, %v304_v37  ;;  %v421_v60 = vmax.f32 %v388_v53, %v208_v15  ;;  %v424_v61 = vmax.f32 %v391_v50, %v215_v46  ;;  %v680_v51 = vld [vmem:[%s1037_s15 + $0xc] sm:$0x7] }
  0x1e   : > { %v367_v62 = vmax.f32 %v275_v54, %v307_v55  ;;  %v390_v63 = vmax.f32 %v364_v56, %v965_v9  ;;  %v1012_v0 = vunpack.c.h.bf16 %v907_v45  ;;  %v216_v1 = vrot.slane %v987_v36, 1 }
  0x1f   : > { %v477_v2 = vmax.f32 %v451_v58, %v853_v8  ;;  %v452_v3 = vmax.f32 %v421_v60, %v300_v23  ;;  %v455_v4 = vmax.f32 %v424_v61, %v307_v55  ;;  %v479_v5 = vmax.f32 %v453_v59, %v967_v10 }
  0x20   : > { %v393_v6 = vmax.f32 %v367_v62, %v987_v36  ;;  %v423_v7 = vmax.f32 %v390_v63, %v972_v17  ;;  %v1020_v12 = vrot.slane %v991_v38, 1  ;;  %v308_v13 = vrot.slane %v987_v36, 2 }
  0x21   : > { %v510_v14 = vmax.f32 %v477_v2, %v979_v25  ;;  %v478_v15 = vmax.f32 %v452_v3, %v965_v9  ;;  %v512_v16 = vmax.f32 %v479_v5, %v215_v46  ;;  %v1026_v8 = vrot.slane %v991_v38, 2 }
  0x22   : > { %v454_v10 = vmax.f32 %v423_v7, %v985_v32  ;;  %v218_v18 = vsel %vm203_vm0, %v216_v1, %v1020_v12  ;;  %v481_v19 = vmax.f32 %v455_v4, %v987_v36  ;;  %v274_v20 = vmax.f32 %v965_v9, %v972_v17 }
  0x23   : > { %v541_v21 = vmax.f32 %v510_v14, %v304_v37  ;;  %v511_v22 = vmax.f32 %v478_v15, %v972_v17  ;;  %v543_v23 = vmax.f32 %v512_v16, %v307_v55  ;;  %v277_v24 = vmax.f32 %v987_v36, %v218_v18 }
  0x24   : > { %v480_v25 = vmax.f32 %v454_v10, %v969_v11  ;;  %v310_v26 = vsel %vm295_vm1, %v308_v13, %v1026_v8  ;;  %v426_v9 = vmax.f32 %v393_v6, %v218_v18  ;;  %v514_v27 = vmax.f32 %v481_v19, %v218_v18 }
  0x25   : > { %v817_v29 = vpack.c.bf16 %v541_v21, %v541_v21  ;;  %v542_v30 = vmax.f32 %v511_v22, %v985_v32  ;;  %v819_v31 = vpack.c.bf16 %v543_v23, %v543_v23  ;;  %v369_v33 = vmax.f32 %v277_v24, %v310_v26  ;;  %v910_v22 = vld [vmem:[%s959_s11 + $0x40] sm:$0xff]  }
  0x26   : > { %v513_v35 = vmax.f32 %v480_v25, %v995_v40  ;;  %v457_v36 = vmax.f32 %v426_v9, %v310_v26  ;;  %v545_v37 = vmax.f32 %v514_v27, %v310_v26  ;;  %v366_v39 = vmax.f32 %v274_v20, %v985_v32  ;;  %v909_v32 = vld [vmem:[%s959_s11 + $0x38] sm:$0xff]  }
  0x27   : > { %672 = vst.msk [vmem:[%s1037_s15] sm:$0xf] %vm671_vm4, %v817_v29  ;;  %v818_v41 = vpack.c.bf16 %v542_v30, %v542_v30  ;;  %679 = vst.msk [vmem:[%s1037_s15 + $0x8] sm:$0xf] %vm671_vm4, %v819_v31  ;;  %v395_v42 = vmax.f32 %v369_v33, %v1009_v57  ;;  %v869_v43 = vunpack.c.l.bf16 %v908_v28  ;;  %v1060_v44 = vunpack.c.h.bf16 %v908_v28  ;;  %v684_v30 = vld [vmem:[%s1037_s15 + $0x14] sm:$0x7] }
  0x28   : > { %v544_v45 = vmax.f32 %v513_v35, %v1002_v48  ;;  %v821_v46 = vpack.c.bf16 %v545_v37, %v545_v37  ;;  %v392_v47 = vmax.f32 %v366_v39, %v969_v11  ;;  %v219_v49 = vrot.slane %v1009_v57, 1 }
  0x29   : > { %v677_v50 = vsel %vm1048_vm5, %v818_v41, %v676_v34  ;;  %v1070_v52 = vrot.slane %v1012_v0, 1  ;;  %v311_v53 = vrot.slane %v1009_v57, 2  ;;  %v1074_v54 = vrot.slane %v1012_v0, 2 }
  0x2a   : > { %678 = vst [vmem:[%s1037_s15 + $0x4] sm:$0x7] %v677_v50  ;;  %v820_v55 = vpack.c.bf16 %v544_v45, %v544_v45  ;;  %683 = vst.msk [vmem:[%s1037_s15 + $0x10] sm:$0xf] %vm671_vm4, %v821_v46  ;;  %v425_v56 = vmax.f32 %v392_v47, %v995_v40  ;;  %v483_v58 = vmax.f32 %v457_v36, %v1009_v57  ;;  %v1087_v62 = vunpack.c.l.bf16 %v909_v32 }
  0x2b   : > { %v276_v59 = vmax.f32 %v969_v11, %v995_v40  ;;  %v221_v60 = vsel %vm203_vm0, %v219_v49, %v1070_v52  ;;  %v313_v61 = vsel %vm295_vm1, %v311_v53, %v1074_v54  ;;  %v1089_v63 = vunpack.c.h.bf16 %v909_v32  ;;  %v911_v49 = vld [vmem:[%s959_s11 + $0x48] sm:$0xff]  }
  0x2c   : > { %v681_v1 = vsel %vm1048_vm5, %v820_v55, %v680_v51  ;;  %v456_v2 = vmax.f32 %v425_v56, %v1002_v48  ;;  %v279_v3 = vmax.f32 %v1009_v57, %v221_v60  ;;  %v428_v4 = vmax.f32 %v395_v42, %v221_v60 }
  0x2d   : > { %682 = vst [vmem:[%s1037_s15 + $0xc] sm:$0x7] %v681_v1  ;;  %v516_v11 = vmax.f32 %v483_v58, %v221_v60  ;;  %v368_v40 = vmax.f32 %v276_v59, %v1002_v48  ;;  %v222_v5 = vrot.slane %v869_v43, 1  ;;  %v1098_v6 = vrot.slane %v1060_v44, 1 }
  0x2e   : > { %v482_v7 = vmax.f32 %v456_v2, %v991_v38  ;;  %v371_v13 = vmax.f32 %v279_v3, %v313_v61  ;;  %v459_v14 = vmax.f32 %v428_v4, %v313_v61  ;;  %v314_v15 = vrot.slane %v869_v43, 2  ;;  %v688_v3 = vld [vmem:[%s1037_s15 + $0x1c] sm:$0x7] }
  0x2f   : > { %v547_v16 = vmax.f32 %v516_v11, %v313_v61  ;;  %v394_v10 = vmax.f32 %v368_v40, %v991_v38  ;;  %v224_v57 = vsel %vm203_vm0, %v222_v5, %v1098_v6  ;;  %v1105_v18 = vrot.slane %v1060_v44, 2 }
  0x30   : > { %v515_v48 = vmax.f32 %v482_v7, %v1020_v12  ;;  %v397_v19 = vmax.f32 %v371_v13, %v869_v43  ;;  %v281_v20 = vmax.f32 %v869_v43, %v224_v57  ;;  %v485_v21 = vmax.f32 %v459_v14, %v869_v43 }
  0x31   : > { %v823_v23 = vpack.c.bf16 %v547_v16, %v547_v16  ;;  %v427_v24 = vmax.f32 %v394_v10, %v1020_v12  ;;  %v316_v25 = vsel %vm295_vm1, %v314_v15, %v1105_v18  ;;  %v278_v26 = vmax.f32 %v991_v38, %v1020_v12 }
  0x32   : > { %v546_v9 = vmax.f32 %v515_v48, %v1026_v8  ;;  %v373_v27 = vmax.f32 %v281_v20, %v316_v25  ;;  %v430_v28 = vmax.f32 %v397_v19, %v224_v57  ;;  %v518_v29 = vmax.f32 %v485_v21, %v224_v57  ;;  %v912_v19 = vld [vmem:[%s959_s11 + $0x50] sm:$0xff]  }
  0x33   : > { %687 = vst.msk [vmem:[%s1037_s15 + $0x18] sm:$0xf] %vm671_vm4, %v823_v23  ;;  %v458_v31 = vmax.f32 %v427_v24, %v1026_v8  ;;  %v370_v33 = vmax.f32 %v278_v26, %v1026_v8  ;;  %v1120_v34 = vunpack.c.l.bf16 %v910_v22  ;;  %v1122_v35 = vunpack.c.h.bf16 %v910_v22 }
  0x34   : > { %v822_v36 = vpack.c.bf16 %v546_v9, %v546_v9  ;;  %v399_v38 = vmax.f32 %v373_v27, %v1087_v62  ;;  %v461_v12 = vmax.f32 %v430_v28, %v316_v25  ;;  %v549_v37 = vmax.f32 %v518_v29, %v316_v25  ;;  %v692_v27 = vld [vmem:[%s1037_s15 + $0x24] sm:$0x7] }
  0x35   : > { %v484_v39 = vmax.f32 %v458_v31, %v1012_v0  ;;  %v396_v41 = vmax.f32 %v370_v33, %v1012_v0  ;;  %v225_v42 = vrot.slane %v1087_v62, 1  ;;  %v1129_v43 = vrot.slane %v1089_v63, 1 }
  0x36   : > { %v685_v8 = vsel %vm1048_vm5, %v822_v36, %v684_v30  ;;  %v825_v45 = vpack.c.bf16 %v549_v37, %v549_v37  ;;  %v317_v46 = vrot.slane %v1087_v62, 2  ;;  %v1135_v47 = vrot.slane %v1089_v63, 2 }
  0x37   : > { %686 = vst [vmem:[%s1037_s15 + $0x14] sm:$0x7] %v685_v8  ;;  %v517_v32 = vmax.f32 %v484_v39, %v1070_v52  ;;  %v429_v50 = vmax.f32 %v396_v41, %v1070_v52  ;;  %v227_v51 = vsel %vm203_vm0, %v225_v42, %v1129_v43  ;;  %v487_v53 = vmax.f32 %v461_v12, %v1087_v62  ;;  %v913_v39 = vld [vmem:[%s959_s11 + $0x58] sm:$0xff]  }
  0x38   : > { %691 = vst.msk [vmem:[%s1037_s15 + $0x20] sm:$0xf] %vm671_vm4, %v825_v45  ;;  %v283_v55 = vmax.f32 %v1087_v62, %v227_v51  ;;  %v319_v56 = vsel %vm295_vm1, %v317_v46, %v1135_v47  ;;  %v432_v58 = vmax.f32 %v399_v38, %v227_v51  ;;  %v280_v59 = vmax.f32 %v1012_v0, %v1070_v52 }
  0x39   : > { %v548_v60 = vmax.f32 %v517_v32, %v1074_v54  ;;  %v460_v61 = vmax.f32 %v429_v50, %v1074_v54  ;;  %v520_v1 = vmax.f32 %v487_v53, %v227_v51  ;;  %v1153_v2 = vunpack.c.l.bf16 %v911_v49 }
  0x3a   : > { %v375_v4 = vmax.f32 %v283_v55, %v319_v56  ;;  %v463_v11 = vmax.f32 %v432_v58, %v319_v56  ;;  %v372_v62 = vmax.f32 %v280_v59, %v1074_v54  ;;  %v1157_v40 = vunpack.c.h.bf16 %v911_v49 }
  0x3b   : > { %v824_v5 = vpack.c.bf16 %v548_v60, %v548_v60  ;;  %v486_v7 = vmax.f32 %v460_v61, %v1060_v44  ;;  %v551_v0 = vmax.f32 %v520_v1, %v319_v56  ;;  %v228_v52 = vrot.slane %v1120_v34, 1  ;;  %v696_v61 = vld [vmem:[%s1037_s15 + $0x2c] sm:$0x7] }
  0x3c   : > { %v401_v13 = vmax.f32 %v375_v4, %v1120_v34  ;;  %v398_v14 = vmax.f32 %v372_v62, %v1060_v44  ;;  %v1164_v15 = vrot.slane %v1122_v35, 1  ;;  %v320_v16 = vrot.slane %v1120_v34, 2 }
  0x3d   : > { %v689_v54 = vsel %vm1048_vm5, %v824_v5, %v688_v3  ;;  %v519_v10 = vmax.f32 %v486_v7, %v1098_v6  ;;  %v827_v57 = vpack.c.bf16 %v551_v0, %v551_v0  ;;  %v1171_v48 = vrot.slane %v1122_v35, 2 }
  0x3e   : > { %690 = vst [vmem:[%s1037_s15 + $0x1c] sm:$0x7] %v689_v54  ;;  %v431_v20 = vmax.f32 %v398_v14, %v1098_v6  ;;  %v230_v21 = vsel %vm203_vm0, %v228_v52, %v1164_v15  ;;  %v489_v22 = vmax.f32 %v463_v11, %v1120_v34  ;;  %v282_v23 = vmax.f32 %v1060_v44, %v1098_v6  ;;  %v914_v54 = vld [vmem:[%s959_s11 + $0x60] sm:$0xff]  }
  0x3f   : > { %v550_v24 = vmax.f32 %v519_v10, %v1105_v18  ;;  %695 = vst.msk [vmem:[%s1037_s15 + $0x28] sm:$0xf] %vm671_vm4, %v827_v57  ;;  %v285_v25 = vmax.f32 %v1120_v34, %v230_v21  ;;  %v322_v26 = vsel %vm295_vm1, %v320_v16, %v1171_v48  ;;  %v434_v9 = vmax.f32 %v401_v13, %v230_v21 }
  0x40   : > { %v462_v28 = vmax.f32 %v431_v20, %v1105_v18  ;;  %v522_v29 = vmax.f32 %v489_v22, %v230_v21  ;;  %v374_v30 = vmax.f32 %v282_v23, %v1105_v18  ;;  %v1190_v31 = vunpack.c.l.bf16 %v912_v19 }
  0x41   : > { %v826_v44 = vpack.c.bf16 %v550_v24, %v550_v24  ;;  %v377_v6 = vmax.f32 %v285_v25, %v322_v26  ;;  %v465_v33 = vmax.f32 %v434_v9, %v322_v26  ;;  %v1192_v36 = vunpack.c.h.bf16 %v912_v19  ;;  %v700_v25 = vld [vmem:[%s1037_s15 + $0x34] sm:$0x7] }
  0x42   : > { %v488_v34 = vmax.f32 %v462_v28, %v1089_v63  ;;  %v553_v38 = vmax.f32 %v522_v29, %v322_v26  ;;  %v400_v12 = vmax.f32 %v374_v30, %v1089_v63  ;;  %v231_v37 = vrot.slane %v1153_v2, 1 }
  0x43   : > { %v693_v41 = vsel %vm1048_vm5, %v826_v44, %v692_v27  ;;  %v403_v18 = vmax.f32 %v377_v6, %v1153_v2  ;;  %v1202_v42 = vrot.slane %v1157_v40, 1  ;;  %v323_v8 = vrot.slane %v1153_v2, 2 }
  0x44   : > { %694 = vst [vmem:[%s1037_s15 + $0x24] sm:$0x7] %v693_v41  ;;  %v521_v45 = vmax.f32 %v488_v34, %v1129_v43  ;;  %v829_v46 = vpack.c.bf16 %v553_v38, %v553_v38  ;;  %v433_v49 = vmax.f32 %v400_v12, %v1129_v43  ;;  %v1209_v32 = vrot.slane %v1157_v40, 2 }
  0x45   : > { %v233_v50 = vsel %vm203_vm0, %v231_v37, %v1202_v42  ;;  %v491_v51 = vmax.f32 %v465_v33, %v1153_v2  ;;  %v284_v53 = vmax.f32 %v1089_v63, %v1129_v43  ;;  %v1216_v55 = vunpack.c.l.bf16 %v913_v39 }
  0x46   : > { %v552_v56 = vmax.f32 %v521_v45, %v1135_v47  ;;  %699 = vst.msk [vmem:[%s1037_s15 + $0x30] sm:$0xf] %vm671_vm4, %v829_v46  ;;  %v464_v58 = vmax.f32 %v433_v49, %v1135_v47  ;;  %v287_v59 = vmax.f32 %v1153_v2, %v233_v50  ;;  %v325_v60 = vsel %vm295_vm1, %v323_v8, %v1209_v32 }
  0x47   : > { %v436_v1 = vmax.f32 %v403_v18, %v233_v50  ;;  %v524_v3 = vmax.f32 %v491_v51, %v233_v50  ;;  %v376_v63 = vmax.f32 %v284_v53, %v1135_v47  ;;  %v1227_v43 = vunpack.c.h.bf16 %v913_v39 }
  0x48   : > { %v828_v4 = vpack.c.bf16 %v552_v56, %v552_v56  ;;  %v490_v11 = vmax.f32 %v464_v58, %v1122_v35  ;;  %v379_v62 = vmax.f32 %v287_v59, %v325_v60  ;;  %v234_v5 = vrot.slane %v1190_v31, 1  ;;  %v704_v58 = vld [vmem:[%s1037_s15 + $0x3c] sm:$0x7] }
  0x49   : > { %v467_v7 = vmax.f32 %v436_v1, %v325_v60  ;;  %v555_v2 = vmax.f32 %v524_v3, %v325_v60  ;;  %v402_v0 = vmax.f32 %v376_v63, %v1122_v35  ;;  %v1233_v52 = vrot.slane %v1192_v36, 1 }
  0x4a   : > { %v697_v47 = vsel %vm1048_vm5, %v828_v4, %v696_v61  ;;  %v523_v13 = vmax.f32 %v490_v11, %v1164_v15  ;;  %v405_v14 = vmax.f32 %v379_v62, %v1190_v31  ;;  %v326_v16 = vrot.slane %v1190_v31, 2 }
  0x4b   : > { %698 = vst [vmem:[%s1037_s15 + $0x2c] sm:$0x7] %v697_v47  ;;  %v831_v10 = vpack.c.bf16 %v555_v2, %v555_v2  ;;  %v435_v57 = vmax.f32 %v402_v0, %v1164_v15  ;;  %v236_v19 = vsel %vm203_vm0, %v234_v5, %v1233_v52  ;;  %v1246_v20 = vrot.slane %v1192_v36, 2 }
  0x4c   : > { %v554_v21 = vmax.f32 %v523_v13, %v1171_v48  ;;  %v289_v22 = vmax.f32 %v1190_v31, %v236_v19  ;;  %v438_v23 = vmax.f32 %v405_v14, %v236_v19  ;;  %v493_v24 = vmax.f32 %v467_v7, %v1190_v31 }
  0x4d   : > { %703 = vst.msk [vmem:[%s1037_s15 + $0x38] sm:$0xf] %vm671_vm4, %v831_v10  ;;  %v466_v26 = vmax.f32 %v435_v57, %v1171_v48  ;;  %v328_v9 = vsel %vm295_vm1, %v326_v16, %v1246_v20  ;;  %v286_v27 = vmax.f32 %v1122_v35, %v1164_v15  ;;  %v893_v28 = vunpack.c.l.bf16 %v914_v54 }
  0x4e   : > { %v830_v29 = vpack.c.bf16 %v554_v21, %v554_v21  ;;  %v381_v30 = vmax.f32 %v289_v22, %v328_v9  ;;  %v469_v44 = vmax.f32 %v438_v23, %v328_v9  ;;  %v526_v6 = vmax.f32 %v493_v24, %v236_v19 }
  0x4f   : > { %v492_v33 = vmax.f32 %v466_v26, %v1157_v40  ;;  %v378_v31 = vmax.f32 %v286_v27, %v1171_v48  ;;  %v1261_v34 = vunpack.c.h.bf16 %v914_v54  ;;  %v237_v38 = vrot.slane %v1216_v55, 1 }
  0x50   : > { %v701_v12 = vsel %vm1048_vm5, %v830_v29, %v700_v25  ;;  %v407_v37 = vmax.f32 %v381_v30, %v1216_v55  ;;  %v557_v35 = vmax.f32 %v526_v6, %v328_v9  ;;  %v1268_v15 = vrot.slane %v1227_v43, 1 }
  0x51   : > { %702 = vst [vmem:[%s1037_s15 + $0x34] sm:$0x7] %v701_v12  ;;  %v525_v39 = vmax.f32 %v492_v33, %v1202_v42  ;;  %v404_v48 = vmax.f32 %v378_v31, %v1157_v40  ;;  %v329_v41 = vrot.slane %v1216_v55, 2  ;;  %v1275_v18 = vrot.slane %v1227_v43, 2 }
  0x52   : > { %v833_v8 = vpack.c.bf16 %v557_v35, %v557_v35  ;;  %v239_v45 = vsel %vm203_vm0, %v237_v38, %v1268_v15  ;;  %v495_v46 = vmax.f32 %v469_v44, %v1216_v55  ;;  %v288_v49 = vmax.f32 %v1157_v40, %v1202_v42  ;;  %v916_v35 = vld [vmem:[%s959_s11 + $0x70] sm:$0xff]  }
  0x53   : > { %v556_v50 = vmax.f32 %v525_v39, %v1209_v32  ;;  %v437_v51 = vmax.f32 %v404_v48, %v1202_v42  ;;  %v291_v53 = vmax.f32 %v1216_v55, %v239_v45  ;;  %v331_v56 = vsel %vm295_vm1, %v329_v41, %v1275_v18 }
  0x54   : > { %707 = vst.msk [vmem:[%s1037_s15 + $0x40] sm:$0xf] %vm671_vm4, %v833_v8  ;;  %v440_v59 = vmax.f32 %v407_v37, %v239_v45  ;;  %v528_v60 = vmax.f32 %v495_v46, %v239_v45  ;;  %v380_v61 = vmax.f32 %v288_v49, %v1209_v32  ;;  %v240_v1 = vrot.slane %v893_v28, 1 }
  0x55   : > { %v832_v40 = vpack.c.bf16 %v556_v50, %v556_v50  ;;  %v468_v3 = vmax.f32 %v437_v51, %v1209_v32  ;;  %v383_v63 = vmax.f32 %v291_v53, %v331_v56  ;;  %v1293_v42 = vrot.slane %v1261_v34, 1  ;;  %v915_v32 = vld [vmem:[%s959_s11 + $0x68] sm:$0xff]  }
  0x56   : > { %v471_v55 = vmax.f32 %v440_v59, %v331_v56  ;;  %v559_v4 = vmax.f32 %v528_v60, %v331_v56  ;;  %v406_v11 = vmax.f32 %v380_v61, %v1192_v36  ;;  %v332_v62 = vrot.slane %v893_v28, 2  ;;  %v712_v51 = vld [vmem:[%s1037_s15 + $0x4c] sm:$0x7] }
  0x57   : > { %v705_v5 = vsel %vm1048_vm5, %v832_v40, %v704_v58  ;;  %v494_v7 = vmax.f32 %v468_v3, %v1192_v36  ;;  %v409_v2 = vmax.f32 %v383_v63, %v893_v28  ;;  %v242_v0 = vsel %vm203_vm0, %v240_v1, %v1293_v42 }
  0x58   : > { %706 = vst [vmem:[%s1037_s15 + $0x3c] sm:$0x7] %v705_v5  ;;  %v835_v47 = vpack.c.bf16 %v559_v4, %v559_v4  ;;  %v439_v13 = vmax.f32 %v406_v11, %v1233_v52  ;;  %v293_v14 = vmax.f32 %v893_v28, %v242_v0  ;;  %v1305_v16 = vrot.slane %v1261_v34, 2 }
  0x59   : > { %v527_v54 = vmax.f32 %v494_v7, %v1233_v52  ;;  %v442_v10 = vmax.f32 %v409_v2, %v242_v0  ;;  %v497_v57 = vmax.f32 %v471_v55, %v893_v28  ;;  %v290_v19 = vmax.f32 %v1192_v36, %v1233_v52  ;;  %v708_v28 = vld [vmem:[%s1037_s15 + $0x44] sm:$0x7] }
  0x5a   : > { %711 = vst.msk [vmem:[%s1037_s15 + $0x48] sm:$0xf] %vm671_vm4, %v835_v47  ;;  %v470_v21 = vmax.f32 %v439_v13, %v1246_v20  ;;  %v334_v22 = vsel %vm295_vm1, %v332_v62, %v1305_v16  ;;  %v897_v23 = vunpack.c.l.bf16 %v915_v32  ;;  %v1315_v24 = vunpack.c.h.bf16 %v915_v32 }
  0x5b   : > { %v558_v25 = vmax.f32 %v527_v54, %v1246_v20  ;;  %v385_v26 = vmax.f32 %v293_v14, %v334_v22  ;;  %v473_v9 = vmax.f32 %v442_v10, %v334_v22  ;;  %v530_v27 = vmax.f32 %v497_v57, %v242_v0  ;;  %v716_v57 = vld [vmem:[%s1037_s15 + $0x54] sm:$0x7] }
  0x5c   : > { %v496_v29 = vmax.f32 %v470_v21, %v1227_v43  ;;  %v382_v36 = vmax.f32 %v290_v19, %v1246_v20  ;;  %v415_v52 = vrot.slane %v897_v23, 1  ;;  %v1322_v30 = vrot.slane %v1315_v24, 1 }
  0x5d   : > { %v834_v44 = vpack.c.bf16 %v558_v25, %v558_v25  ;;  %v561_v6 = vmax.f32 %v530_v27, %v334_v22  ;;  %v411_v33 = vmax.f32 %v385_v26, %v897_v23  ;;  %v446_v31 = vrot.slane %v897_v23, 2  ;;  %v720_v27 = vld [vmem:[%s1037_s15 + $0x5c] sm:$0x7] }
  0x5e   : > { %v529_v38 = vmax.f32 %v496_v29, %v1268_v15  ;;  %v408_v12 = vmax.f32 %v382_v36, %v1227_v43  ;;  %v417_v37 = vsel %vm203_vm0, %v415_v52, %v1322_v30  ;;  %v447_v20 = vrot.slane %v1315_v24, 2  ;;  %v724_v52 = vld [vmem:[%s1037_s15 + $0x64] sm:$0x7] }
  0x5f   : > { %v709_v39 = vsel %vm1048_vm5, %v834_v44, %v708_v28  ;;  %v837_v48 = vpack.c.bf16 %v561_v6, %v561_v6  ;;  %v444_v41 = vmax.f32 %v411_v33, %v417_v37  ;;  %v499_v8 = vmax.f32 %v473_v9, %v897_v23 }
  0x60   : > { %710 = vst [vmem:[%s1037_s15 + $0x44] sm:$0x7] %v709_v39  ;;  %v560_v45 = vmax.f32 %v529_v38, %v1275_v18  ;;  %v441_v46 = vmax.f32 %v408_v12, %v1268_v15  ;;  %v448_v49 = vsel %vm295_vm1, %v446_v31, %v447_v20  ;;  %v292_v50 = vmax.f32 %v1227_v43, %v1268_v15 }
  0x61   : > { %715 = vst.msk [vmem:[%s1037_s15 + $0x50] sm:$0xf] %vm671_vm4, %v837_v48  ;;  %v475_v53 = vmax.f32 %v444_v41, %v448_v49  ;;  %v532_v56 = vmax.f32 %v499_v8, %v417_v37  ;;  %v901_v58 = vunpack.c.l.bf16 %v916_v35  ;;  %v902_v59 = vunpack.c.h.bf16 %v916_v35 }
  0x62   : > { %v836_v60 = vpack.c.bf16 %v560_v45, %v560_v45  ;;  %v472_v61 = vmax.f32 %v441_v46, %v1275_v18  ;;  %v384_v1 = vmax.f32 %v292_v50, %v1275_v18  ;;  %v294_v40 = vmax.f32 %v1261_v34, %v1293_v42 }
  0x63   : > { %v563_v3 = vmax.f32 %v532_v56, %v448_v49  ;;  %v501_v63 = vmax.f32 %v475_v53, %v901_v58  ;;  %v505_v43 = vrot.slane %v901_v58, 1  ;;  %v506_v15 = vrot.slane %v902_v59, 1 }
  0x64   : > { %v713_v55 = vsel %vm1048_vm5, %v836_v60, %v712_v51  ;;  %v498_v4 = vmax.f32 %v472_v61, %v1261_v34  ;;  %v410_v11 = vmax.f32 %v384_v1, %v1261_v34  ;;  %v536_v62 = vrot.slane %v901_v58, 2 }
  0x65   : > { %714 = vst [vmem:[%s1037_s15 + $0x4c] sm:$0x7] %v713_v55  ;;  %v839_v5 = vpack.c.bf16 %v563_v3, %v563_v3  ;;  %v507_v18 = vsel %vm203_vm0, %v505_v43, %v506_v15  ;;  %v537_v7 = vrot.slane %v902_v59, 2  ;;  %v386_v2 = vmax.f32 %v294_v40, %v1305_v16 }
  0x66   : > { %v531_v0 = vmax.f32 %v498_v4, %v1293_v42  ;;  %v443_v32 = vmax.f32 %v410_v11, %v1293_v42  ;;  %v534_v47 = vmax.f32 %v501_v63, %v507_v18 }
  0x67   : > { %719 = vst.msk [vmem:[%s1037_s15 + $0x58] sm:$0xf] %vm671_vm4, %v839_v5  ;;  %v538_v34 = vsel %vm295_vm1, %v536_v62, %v537_v7  ;;  %v412_v13 = vmax.f32 %v386_v2, %v1315_v24 }
  0x68   : > { %v562_v14 = vmax.f32 %v531_v0, %v1305_v16  ;;  %v474_v54 = vmax.f32 %v443_v32, %v1305_v16  ;;  %v565_v10 = vmax.f32 %v534_v47, %v538_v34 }
  0x69   : > { %v445_v19 = vmax.f32 %v412_v13, %v1322_v30 }
  0x6a   : > { %v838_v42 = vpack.c.bf16 %v562_v14, %v562_v14  ;;  %v500_v21 = vmax.f32 %v474_v54, %v1315_v24  ;;  %v841_v22 = vpack.c.bf16 %v565_v10, %v565_v10 }
  0x6b   : > { %v476_v23 = vmax.f32 %v445_v19, %v447_v20 }
  0x6c   : > { %v717_v25 = vsel %vm1048_vm5, %v838_v42, %v716_v57  ;;  %v533_v26 = vmax.f32 %v500_v21, %v1322_v30  ;;  %723 = vst.msk [vmem:[%s1037_s15 + $0x60] sm:$0xf] %vm671_vm4, %v841_v22 }
  0x6d   : > { %718 = vst [vmem:[%s1037_s15 + $0x54] sm:$0x7] %v717_v25  ;;  %v502_v16 = vmax.f32 %v476_v23, %v902_v59 }
  0x6e   : > { %v564_v9 = vmax.f32 %v533_v26, %v447_v20 }
  0x6f   : > { %v535_v28 = vmax.f32 %v502_v16, %v506_v15 }
  0x70   : > { %v840_v29 = vpack.c.bf16 %v564_v9, %v564_v9 }
  0x71   : > { %v566_v36 = vmax.f32 %v535_v28, %v537_v7 }
  0x72   : > { %v721_v24 = vsel %vm1048_vm5, %v840_v29, %v720_v27 }
  0x73   : > { %722 = vst [vmem:[%s1037_s15 + $0x5c] sm:$0x7] %v721_v24  ;;  %v842_v44 = vpack.c.bf16 %v566_v36, %v566_v36 }
  0x75   : > { %v725_v6 = vsel %vm1048_vm5, %v842_v44, %v724_v52 }
  0x76   : > { %726 = vst [vmem:[%s1037_s15 + $0x64] sm:$0x7] %v725_v6 }
  0x77 PF: > { %s11_s6 = sadd.s32 1, %s933_s6  }
  0x78   : > { %p8_p4 = scmp.ge.s32.totalorder %s11_s6, 4  }
  0x7a   :  { %10 = sbr.rel (!%p8_p4) target bundleno = 1 (0x1), region = 54 }

// kernel: _lambda_.12
= control target key start
LH: loop header
LB: loop body
LE: loop exit
PB: predicated region body
PF: predicated region fallthrough
CT: control target
= control target key end

     0   :  { %v604_v0 = vmov 0.0   ;;  %vm605_vm0 = vmmov 0   ;;  %vm90_vm1 = vcmask 130048   ;;  %vm434_vm2 = vcmask 207872   ;;  %s781_s3 = inlined_call_operand.vmem [shape: bf16[16,26], index: 3, kind: input, shape index: {}]   ;;  %s782_s2 = inlined_call_operand.vmem [shape: bf16[16,26], index: 2, kind: input, shape index: {}]   ;;  %s783_s1 = inlined_call_operand.vmem [shape: bf16[98,16], index: 1, kind: input, shape index: {}]   ;;  %s784_s0 = inlined_call_operand.vmem [shape: bf16[98,16], index: 0, kind: input, shape index: {}]   ;;  %s785_s4 = inlined_call_operand.vmem [shape: f32[1,26], index: 4, kind: input, shape index: {}]   ;;  %s786_s5 = inlined_call_operand.vmem [shape: bf16[98,26], index: 5, kind: output, shape index: {}]  }
   0x1   :  { %526 = vmatprep.subr.bf16.mxu0 %v604_v0  ;;  %556 = vmatprep.subr.bf16.mxu1 %v604_v0  ;;  %v588_v1 = vld [vmem:[%s781_s3] sm:$0xff]   ;;  %v592_v5 = vld [vmem:[%s783_s1 + $0x8] sm:$0xff]   ;;  %v594_v7 = vld [vmem:[%s783_s1 + $0x10] sm:$0xff]   ;;  %vm447_vm3 = vcmask 204800  }
   0x2   :  { %v589_v2 = vld [vmem:[%s782_s2] sm:$0xff]   ;;  %528 = vmatprep.mubr.msk.bf16.mxu0 %vm605_vm0, %v604_v0  ;;  %558 = vmatprep.mubr.msk.bf16.mxu1 %vm605_vm0, %v604_v0  ;;  %v593_v6 = vld [vmem:[%s784_s0 + $0x8] sm:$0xff]   ;;  %v595_v8 = vld [vmem:[%s784_s0 + $0x10] sm:$0xff]  }
   0x3   :  { %527 = vmatpush3.bf16.msra.mxu0 %v588_v1  ;;  %v590_v3 = vld [vmem:[%s783_s1] sm:$0xff]   ;;  %557 = vmatpush3.bf16.msra.mxu1 %v589_v2  ;;  %v596_v9 = vld [vmem:[%s783_s1 + $0x18] sm:$0xff]   ;;  %v600_v13 = vld [vmem:[%s783_s1 + $0x28] sm:$0xff]  }
   0x4   :  { %v591_v4 = vld [vmem:[%s784_s0] sm:$0xff]   ;;  %v597_v10 = vld [vmem:[%s784_s0 + $0x18] sm:$0xff]   ;;  %v601_v14 = vld [vmem:[%s784_s0 + $0x28] sm:$0xff]  }
   0x5   :  { %v598_v11 = vld [vmem:[%s783_s1 + $0x20] sm:$0xff]   ;;  %v602_v15 = vld [vmem:[%s783_s1 + $0x30] ss:$0 sps:$4 sm:$0x11]  }
   0x6   :  { %529 = vmatmul.mubr.msk.bf16.vlgmr.msra.gmra.mxu0 %vm90_vm1, %v590_v3  ;;  %559 = vmatmul.mubr.msk.bf16.vlgmr.msra.gmra.mxu1 %vm90_vm1, %v591_v4  ;;  %v599_v12 = vld [vmem:[%s784_s0 + $0x20] sm:$0xff]   ;;  %v603_v16 = vld [vmem:[%s784_s0 + $0x30] ss:$0 sps:$4 sm:$0x11]  }
   0x7   :  { %532 = vmatprep.mubr.msk.bf16.mxu0 %vm605_vm0, %v604_v0  ;;  %562 = vmatprep.mubr.msk.bf16.mxu1 %vm605_vm0, %v604_v0  ;;  %v715_v19 = vld [vmem:[%s785_s4] ss:$0 sm:$0xff] }
   0xe   :  { %533 = vmatmul.mubr.msk.bf16.gmra.mxu0 %vm90_vm1, %v592_v5  ;;  %563 = vmatmul.mubr.msk.bf16.gmra.mxu1 %vm90_vm1, %v593_v6 }
   0xf   :  { %536 = vmatprep.mubr.msk.bf16.mxu0 %vm605_vm0, %v604_v0  ;;  %566 = vmatprep.mubr.msk.bf16.mxu1 %vm605_vm0, %v604_v0 }
  0x16   :  { %537 = vmatmul.mubr.msk.bf16.gmra.mxu0 %vm90_vm1, %v594_v7  ;;  %567 = vmatmul.mubr.msk.bf16.gmra.mxu1 %vm90_vm1, %v595_v8 }
  0x17   :  { %540 = vmatprep.mubr.msk.bf16.mxu0 %vm605_vm0, %v604_v0  ;;  %570 = vmatprep.mubr.msk.bf16.mxu1 %vm605_vm0, %v604_v0 }
  0x1e   :  { %541 = vmatmul.mubr.msk.bf16.gmra.mxu0 %vm90_vm1, %v596_v9  ;;  %571 = vmatmul.mubr.msk.bf16.gmra.mxu1 %vm90_vm1, %v597_v10 }
  0x1f   :  { %544 = vmatprep.mubr.msk.bf16.mxu0 %vm605_vm0, %v604_v0  ;;  %574 = vmatprep.mubr.msk.bf16.mxu1 %vm605_vm0, %v604_v0 }
  0x26   :  { %545 = vmatmul.mubr.msk.bf16.gmra.mxu0 %vm90_vm1, %v598_v11  ;;  %575 = vmatmul.mubr.msk.bf16.gmra.mxu1 %vm90_vm1, %v599_v12 }
  0x27   :  { %548 = vmatprep.mubr.msk.bf16.mxu0 %vm605_vm0, %v604_v0  ;;  %578 = vmatprep.mubr.msk.bf16.mxu1 %vm605_vm0, %v604_v0 }
  0x2e   :  { %549 = vmatmul.mubr.msk.bf16.gmra.mxu0 %vm90_vm1, %v600_v13  ;;  %579 = vmatmul.mubr.msk.bf16.gmra.mxu1 %vm90_vm1, %v601_v14 }
  0x2f   :  { %552 = vmatprep.mubr.msk.bf16.mxu0 %vm605_vm0, %v604_v0  ;;  %582 = vmatprep.mubr.msk.bf16.mxu1 %vm605_vm0, %v604_v0 }
  0x36   :  { %553 = vmatmul.mubr.msk.bf16.gmra.mxu0 %vm90_vm1, %v602_v15  ;;  %583 = vmatmul.mubr.msk.bf16.gmra.mxu1 %vm90_vm1, %v603_v16 }
  0xc6   :  { %v146_v17 = vpop.f32.mrf.mxu0  ;;  %v294_v18 = vpop.f32.mrf.mxu1 }
  0xc7   :  { %v295_v20 = vadd.f32 %v294_v18, %v146_v17 }
  0xc8   :  { %v530_v21 = vpop.f32.mrf.mxu0  ;;  %v560_v22 = vpop.f32.mrf.mxu1 }
  0xc9   :  { %v355_v23 = vadd.f32 %v715_v19, %v295_v20 }
  0xca   :  { %v149_v24 = vpop.f32.mrf.mxu0  ;;  %v297_v25 = vpop.f32.mrf.mxu1 }
  0xcb   :  { %v368_v26 = vmax.f32 %v355_v23, 0.0  ;;  %v298_v27 = vadd.f32 %v297_v25, %v149_v24 }
  0xcc   :  { %v531_v28 = vpop.f32.mrf.mxu0  ;;  %v561_v29 = vpop.f32.mrf.mxu1 }
  0xcd   :  { %v497_v30 = vpack.c.bf16 %v368_v26, %v368_v26  ;;  %v356_v31 = vadd.f32 %v715_v19, %v298_v27 }
  0xce   :  { %v154_v32 = vpop.f32.mrf.mxu0  ;;  %v302_v33 = vpop.f32.mrf.mxu1 }
  0xcf   :  { %435 = vst.msk [vmem:[%s786_s5] sm:$0xf] %vm434_vm2, %v497_v30  ;;  %v369_v34 = vmax.f32 %v356_v31, 0.0  ;;  %v303_v35 = vadd.f32 %v302_v33, %v154_v32 }
  0xd0   :  { %v534_v36 = vpop.f32.mrf.mxu0  ;;  %v564_v37 = vpop.f32.mrf.mxu1 }
  0xd1   :  { %v498_v38 = vpack.c.bf16 %v369_v34, %v369_v34  ;;  %v357_v39 = vadd.f32 %v715_v19, %v303_v35 }
  0xd2   :  { %v157_v40 = vpop.f32.mrf.mxu0  ;;  %v305_v41 = vpop.f32.mrf.mxu1 }
  0xd3   :  { %436 = vst.msk [vmem:[%s786_s5 + $0x4] sm:$0xf] %vm434_vm2, %v498_v38  ;;  %v370_v42 = vmax.f32 %v357_v39, 0.0  ;;  %v306_v43 = vadd.f32 %v305_v41, %v157_v40 }
  0xd4   :  { %v535_v44 = vpop.f32.mrf.mxu0  ;;  %v565_v45 = vpop.f32.mrf.mxu1 }
  0xd5   :  { %v499_v46 = vpack.c.bf16 %v370_v42, %v370_v42  ;;  %v358_v47 = vadd.f32 %v715_v19, %v306_v43 }
  0xd6   :  { %v162_v48 = vpop.f32.mrf.mxu0  ;;  %v310_v49 = vpop.f32.mrf.mxu1 }
  0xd7   :  { %437 = vst.msk [vmem:[%s786_s5 + $0x8] sm:$0xf] %vm434_vm2, %v499_v46  ;;  %v371_v50 = vmax.f32 %v358_v47, 0.0  ;;  %v311_v51 = vadd.f32 %v310_v49, %v162_v48 }
  0xd8   :  { %v538_v52 = vpop.f32.mrf.mxu0  ;;  %v568_v53 = vpop.f32.mrf.mxu1 }
  0xd9   :  { %v500_v54 = vpack.c.bf16 %v371_v50, %v371_v50  ;;  %v359_v55 = vadd.f32 %v715_v19, %v311_v51 }
  0xda   :  { %v165_v56 = vpop.f32.mrf.mxu0  ;;  %v313_v57 = vpop.f32.mrf.mxu1 }
  0xdb   :  { %438 = vst.msk [vmem:[%s786_s5 + $0xc] sm:$0xf] %vm434_vm2, %v500_v54  ;;  %v372_v58 = vmax.f32 %v359_v55, 0.0  ;;  %v314_v59 = vadd.f32 %v313_v57, %v165_v56 }
  0xdc   :  { %v539_v60 = vpop.f32.mrf.mxu0  ;;  %v569_v61 = vpop.f32.mrf.mxu1 }
  0xdd   :  { %v501_v62 = vpack.c.bf16 %v372_v58, %v372_v58  ;;  %v360_v63 = vadd.f32 %v715_v19, %v314_v59 }
  0xde   :  { %v170_v0 = vpop.f32.mrf.mxu0  ;;  %v318_v1 = vpop.f32.mrf.mxu1 }
  0xdf   :  { %439 = vst.msk [vmem:[%s786_s5 + $0x10] sm:$0xf] %vm434_vm2, %v501_v62  ;;  %v373_v2 = vmax.f32 %v360_v63, 0.0  ;;  %v319_v3 = vadd.f32 %v318_v1, %v170_v0 }
  0xe0   :  { %v542_v4 = vpop.f32.mrf.mxu0  ;;  %v572_v5 = vpop.f32.mrf.mxu1 }
  0xe1   :  { %v502_v6 = vpack.c.bf16 %v373_v2, %v373_v2  ;;  %v361_v7 = vadd.f32 %v715_v19, %v319_v3 }
  0xe2   :  { %v173_v8 = vpop.f32.mrf.mxu0  ;;  %v321_v9 = vpop.f32.mrf.mxu1 }
  0xe3   :  { %440 = vst.msk [vmem:[%s786_s5 + $0x14] sm:$0xf] %vm434_vm2, %v502_v6  ;;  %v374_v10 = vmax.f32 %v361_v7, 0.0  ;;  %v322_v11 = vadd.f32 %v321_v9, %v173_v8 }
  0xe4   :  { %v543_v12 = vpop.f32.mrf.mxu0  ;;  %v573_v13 = vpop.f32.mrf.mxu1 }
  0xe5   :  { %v503_v14 = vpack.c.bf16 %v374_v10, %v374_v10  ;;  %v362_v15 = vadd.f32 %v715_v19, %v322_v11 }
  0xe6   :  { %v178_v16 = vpop.f32.mrf.mxu0  ;;  %v326_v17 = vpop.f32.mrf.mxu1 }
  0xe7   :  { %441 = vst.msk [vmem:[%s786_s5 + $0x18] sm:$0xf] %vm434_vm2, %v503_v14  ;;  %v375_v18 = vmax.f32 %v362_v15, 0.0  ;;  %v327_v20 = vadd.f32 %v326_v17, %v178_v16 }
  0xe8   :  { %v546_v21 = vpop.f32.mrf.mxu0  ;;  %v576_v22 = vpop.f32.mrf.mxu1 }
  0xe9   :  { %v504_v23 = vpack.c.bf16 %v375_v18, %v375_v18  ;;  %v363_v24 = vadd.f32 %v715_v19, %v327_v20 }
  0xea   :  { %v181_v25 = vpop.f32.mrf.mxu0  ;;  %v329_v26 = vpop.f32.mrf.mxu1 }
  0xeb   :  { %442 = vst.msk [vmem:[%s786_s5 + $0x1c] sm:$0xf] %vm434_vm2, %v504_v23  ;;  %v376_v27 = vmax.f32 %v363_v24, 0.0  ;;  %v330_v28 = vadd.f32 %v329_v26, %v181_v25 }
  0xec   :  { %v547_v29 = vpop.f32.mrf.mxu0  ;;  %v577_v30 = vpop.f32.mrf.mxu1 }
  0xed   :  { %v505_v31 = vpack.c.bf16 %v376_v27, %v376_v27  ;;  %v364_v32 = vadd.f32 %v715_v19, %v330_v28 }
  0xee   :  { %v186_v33 = vpop.f32.mrf.mxu0  ;;  %v334_v34 = vpop.f32.mrf.mxu1 }
  0xef   :  { %443 = vst.msk [vmem:[%s786_s5 + $0x20] sm:$0xf] %vm434_vm2, %v505_v31  ;;  %v377_v35 = vmax.f32 %v364_v32, 0.0  ;;  %v335_v36 = vadd.f32 %v334_v34, %v186_v33 }
  0xf0   :  { %v550_v37 = vpop.f32.mrf.mxu0  ;;  %v580_v38 = vpop.f32.mrf.mxu1 }
  0xf1   :  { %v506_v39 = vpack.c.bf16 %v377_v35, %v377_v35  ;;  %v365_v40 = vadd.f32 %v715_v19, %v335_v36 }
  0xf2   :  { %v189_v41 = vpop.f32.mrf.mxu0  ;;  %v337_v42 = vpop.f32.mrf.mxu1 }
  0xf3   :  { %444 = vst.msk [vmem:[%s786_s5 + $0x24] sm:$0xf] %vm434_vm2, %v506_v39  ;;  %v378_v43 = vmax.f32 %v365_v40, 0.0  ;;  %v338_v44 = vadd.f32 %v337_v42, %v189_v41 }
  0xf4   :  { %v551_v45 = vpop.f32.mrf.mxu0  ;;  %v581_v46 = vpop.f32.mrf.mxu1 }
  0xf5   :  { %v507_v47 = vpack.c.bf16 %v378_v43, %v378_v43  ;;  %v366_v48 = vadd.f32 %v715_v19, %v338_v44 }
  0xf6   :  { %v194_v49 = vpop.f32.mrf.mxu0  ;;  %v342_v50 = vpop.f32.mrf.mxu1 }
  0xf7   :  { %445 = vst.msk [vmem:[%s786_s5 + $0x28] sm:$0xf] %vm434_vm2, %v507_v47  ;;  %v379_v51 = vmax.f32 %v366_v48, 0.0  ;;  %v343_v52 = vadd.f32 %v342_v50, %v194_v49 }
  0xf8   :  { %v554_v53 = vpop.f32.mrf.mxu0  ;;  %v584_v54 = vpop.f32.mrf.mxu1 }
  0xf9   :  { %v508_v55 = vpack.c.bf16 %v379_v51, %v379_v51  ;;  %v367_v56 = vadd.f32 %v715_v19, %v343_v52 }
  0xfa   :  { %v197_v57 = vpop.f32.mrf.mxu0  ;;  %v345_v58 = vpop.f32.mrf.mxu1 }
  0xfb   :  { %446 = vst.msk [vmem:[%s786_s5 + $0x2c] sm:$0xf] %vm434_vm2, %v508_v55  ;;  %v380_v59 = vmax.f32 %v367_v56, 0.0 }
  0xfc   :  { %v555_v60 = vpop.f32.mrf.mxu0  ;;  %v585_v61 = vpop.f32.mrf.mxu1 }
  0xfd   :  { %v509_v62 = vpack.c.bf16 %v380_v59, %v380_v59 }
  0xff   :  { %448 = vst.msk [vmem:[%s786_s5 + $0x30] sm:$0x1] %vm447_vm3, %v509_v62 }

// kernel: _lambda_.13
= control target key start
LH: loop header
LB: loop body
LE: loop exit
PB: predicated region body
PF: predicated region fallthrough
CT: control target
= control target key end

     0   :  { %s798_s12 = smov 0   ;;  %s903_s0 = inlined_call_operand.vmem [shape: bf16[2,11,42], index: 0, kind: input, shape index: {}]   ;;  %s904_s1 = inlined_call_operand.vmem [shape: bf16[5,42,56], index: 1, kind: input, shape index: {}]   ;;  %s905_s2 = inlined_call_operand.vmem [shape: f32[1,56], index: 2, kind: input, shape index: {}]   ;;  %s906_s3 = inlined_call_operand.vmem [shape: bf16[2,7,56], index: 3, kind: output, shape index: {}]  }
   0x1 LB: > { %s615_s13 = sadd.s32 4294967295, %s774_s12   ;;  %p619_p0 = scmp.ge.s32.totalorder %s774_s12, 1  ;;  %s774_s12 = sphi %s798_s12, %s13_s12  }
   0x2   : > { %p137_p1 = scmp.lt.s32.totalorder %s774_s12, 3 }
   0x4   : > { %p138_p2 = pnand %p619_p0, %p137_p1 }
   0x5   : > { %p160_p3 = scmp.lt.s32.totalorder (!%p138_p2), %s615_s13, 1 }
   0x6   : > { %141 = sbr.rel (%p138_p2) target bundleno = 258 (0x102), region = 32 }
   0xb   : > { %vm204_vm0 = vcmask 1044480   ;;  %v776_v0 = vmov 0.0   ;;  %v752_v1 = vld [vmem:[%s904_s1 + $0x10] sm:$0x1f]   ;;  %v753_v2 = vld [vmem:[%s904_s1 + $0x28] sm:$0x1f]  }
   0xc   : > { %692 = vmatprep.subr.bf16.mxu0 %v776_v0  ;;  %702 = vmatprep.subr.bf16.mxu1 %v776_v0  ;;  %v206_v3 = vsel %vm204_vm0, %v752_v1, 0  ;;  %v273_v4 = vsel %vm204_vm0, %v753_v2, 0  ;;  %v754_v5 = vld [vmem:[%s904_s1 + $0x8] sm:$0xff]   ;;  %v755_v6 = vld [vmem:[%s904_s1 + $0x20] sm:$0xff]   ;;  %vm777_vm1 = vmmov 0   ;;  %v757_v8 = vld [vmem:[%s904_s1 + $0x18] sm:$0xff]  }
   0xd   : > { %693 = vmatpush3.bf16.msra.mxu0 %v206_v3  ;;  %703 = vmatpush3.bf16.msra.mxu1 %v273_v4  ;;  %v756_v7 = vld [vmem:[%s904_s1] sm:$0xff]   ;;  %s908_s13 = smov (!%p160_p3, %s615_s13), 1  ;;  %v760_v10 = vld [vmem:[%s904_s1 + $0x58] sm:$0x1f]   ;;  %vm200_vm2 = vcmask 343040   ;;  %v762_v15 = vld [vmem:[%s904_s1 + $0x50] sm:$0xff]  }
   0xe   : > { %694 = vmatprep.subr.bf16.mxu0 %v776_v0  ;;  %704 = vmatprep.subr.bf16.mxu1 %v776_v0  ;;  %v759_v9 = vld [vmem:[%s904_s1 + $0x40] sm:$0x1f]   ;;  %s671_s30 = sshll.u32 %s908_s13, 3  ;;  %v420_v13 = vsel %vm204_vm0, %v760_v10, 0  ;;  %v761_v14 = vld [vmem:[%s904_s1 + $0x38] sm:$0xff]   ;;  %v763_v16 = vld [vmem:[%s904_s1 + $0x30] sm:$0xff]  }
   0xf   : > { %698 = vmatprep.mubr.msk.bf16.mxu0 %vm777_vm1, %v776_v0  ;;  %708 = vmatprep.mubr.msk.bf16.mxu1 %vm777_vm1, %v776_v0  ;;  %s164_s6 = scalar_lea.vmem %s903_s0, %s671_s30  ;;  %v344_v12 = vsel %vm204_vm0, %v759_v9, 0  ;;  %v764_v17 = vld [vmem:[%s904_s1 + $0x48] sm:$0xff]   ;;  %v765_v18 = vld [vmem:[%s904_s1 + $0x70] sm:$0x1f]   ;;  %v767_v21 = vld [vmem:[%s904_s1 + $0x60] sm:$0xff]   ;;  %vm389_vm3 = vcmask 1045504  }
  0x10   : > { %v758_v11 = vld [vmem:[%s164_s6] sm:$0x3f]   ;;  %v495_v19 = vsel %vm204_vm0, %v765_v18, 0  ;;  %v766_v20 = vld [vmem:[%s904_s1 + $0x68] sm:$0xff]   ;;  %vm540_vm4 = vcmask 1043456   ;;  %s622_s23 = sshll.u32 %s908_s13, 2 }
  0x11   : > { %695 = vmatpush3.bf16.msra.mxu0 %v754_v5  ;;  %705 = vmatpush3.bf16.msra.mxu1 %v755_v6  ;;  %v668_v55 = vld [vmem:[%s905_s2] ss:$0 sm:$0xff]  ;;  %s168_s28 = scalar_lea.vmem %s906_s3, %s622_s23  ;;  %vm556_vm5 = vcmask 453632   ;;  %vm557_vm6 = vsmask.f32 3328 }
  0x12   : > { %696 = vmatprep.subr.bf16.mxu0 %v776_v0  ;;  %706 = vmatprep.subr.bf16.mxu1 %v776_v0  ;;  %vm558_vm7 = vmand %vm556_vm5, %vm557_vm6  ;;  %v559_v59 = vld [vmem:[%s168_s28] sm:$0xf] }
  0x15   : > { %697 = vmatpush3.bf16.msra.mxu0 %v756_v7  ;;  %707 = vmatpush3.bf16.msra.mxu1 %v757_v8 }
  0x16   : > { %712 = vmatprep.subr.bf16.mxu0 %v776_v0  ;;  %722 = vmatprep.subr.bf16.mxu1 %v776_v0 }
  0x18   : > { %699 = vmatmul.mubr.msk.bf16.vlgmr.msra.gmra.mxu0 %vm200_vm2, %v758_v11  ;;  %709 = vmatmul.mubr.msk.bf16.vlgmr.msra.gmra.mxu1 %vm200_vm2, %v758_v11 }
  0x19   : > { %713 = vmatpush3.bf16.msra.mxu0 %v344_v12  ;;  %723 = vmatpush3.bf16.msra.mxu1 %v420_v13 }
  0x1a   : > { %714 = vmatprep.subr.bf16.mxu0 %v776_v0  ;;  %724 = vmatprep.subr.bf16.mxu1 %v776_v0 }
  0x1b   : > { %718 = vmatprep.mubr.msk.bf16.mxu0 %vm777_vm1, %v776_v0  ;;  %728 = vmatprep.mubr.msk.bf16.mxu1 %vm777_vm1, %v776_v0 }
  0x1d   : > { %715 = vmatpush3.bf16.msra.mxu0 %v761_v14  ;;  %725 = vmatpush3.bf16.msra.mxu1 %v762_v15 }
  0x1e   : > { %716 = vmatprep.subr.bf16.mxu0 %v776_v0  ;;  %726 = vmatprep.subr.bf16.mxu1 %v776_v0 }
  0x21   : > { %717 = vmatpush3.bf16.msra.mxu0 %v763_v16  ;;  %727 = vmatpush3.bf16.msra.mxu1 %v764_v17 }
  0x22   : > { %732 = vmatprep.subr.bf16.mxu0 %v776_v0 }
  0x24   : > { %719 = vmatmul.mubr.msk.bf16.vlgmr.msra.gmra.mxu0 %vm200_vm2, %v758_v11  ;;  %729 = vmatmul.mubr.msk.bf16.vlgmr.msra.gmra.mxu1 %vm200_vm2, %v758_v11 }
  0x25   : > { %733 = vmatpush3.bf16.msra.mxu0 %v495_v19  ;;  %738 = vmatprep.mubr.msk.bf16.mxu0 %vm777_vm1, %v776_v0 }
  0x26   : > { %734 = vmatprep.subr.bf16.mxu0 %v776_v0 }
  0x29   : > { %735 = vmatpush3.bf16.msra.mxu0 %v766_v20 }
  0x2a   : > { %736 = vmatprep.subr.bf16.mxu0 %v776_v0 }
  0x2d   : > { %737 = vmatpush3.bf16.msra.mxu0 %v767_v21 }
  0x30   : > { %739 = vmatmul.mubr.msk.bf16.vlgmr.msra.gmra.mxu0 %vm200_vm2, %v758_v11 }
  0xd8   : > { %v242_v22 = vpop.f32.mrf.mxu0  ;;  %v309_v23 = vpop.f32.mrf.mxu1 }
  0xd9   : > { %v316_v39 = vrot.slane %v309_v23, 1 }
  0xda   : > { %v700_v24 = vpop.f32.mrf.mxu0  ;;  %v710_v25 = vpop.f32.mrf.mxu1 }
  0xdb   : > { %v318_v44 = vadd.f32 %v316_v39, %v242_v22 }
  0xdc   : > { %v245_v26 = vpop.f32.mrf.mxu0  ;;  %v312_v27 = vpop.f32.mrf.mxu1 }
  0xde   : > { %v701_v28 = vpop.f32.mrf.mxu0  ;;  %v711_v29 = vpop.f32.mrf.mxu1 }
  0xe4   : > { %v380_v30 = vpop.f32.mrf.mxu0  ;;  %v456_v31 = vpop.f32.mrf.mxu1 }
  0xe5   : > { %v390_v40 = vrot.slane %v380_v30, 2  ;;  %v465_v41 = vrot.slane %v456_v31, 3 }
  0xe6   : > { %v720_v32 = vpop.f32.mrf.mxu0  ;;  %v730_v33 = vpop.f32.mrf.mxu1 }
  0xe8   : > { %v383_v34 = vpop.f32.mrf.mxu0  ;;  %v459_v35 = vpop.f32.mrf.mxu1 }
  0xe9   : > { %v391_v37 = vrot.slane %v383_v34, 2  ;;  %v466_v43 = vrot.slane %v459_v35, 3 }
  0xea   : > { %v721_v36 = vpop.f32.mrf.mxu0  ;;  %v731_v38 = vpop.f32.mrf.mxu1 }
  0xeb   : > { %v392_v42 = vsel %vm389_vm3, %v390_v40, %v391_v37  ;;  %v467_v48 = vsel %vm204_vm0, %v465_v41, %v466_v43 }
  0xec   : > { %v394_v46 = vadd.f32 %v392_v42, %v318_v44 }
  0xee   : > { %v469_v52 = vadd.f32 %v467_v48, %v394_v46 }
  0xf0   : > { %v531_v45 = vpop.f32.mrf.mxu0 }
  0xf1   : > { %v541_v50 = vrot.slane %v531_v45, 4 }
  0xf2   : > { %v740_v47 = vpop.f32.mrf.mxu0 }
  0xf4   : > { %v534_v49 = vpop.f32.mrf.mxu0 }
  0xf5   : > { %v542_v51 = vrot.slane %v534_v49, 4 }
  0xf6   : > { %v741_v53 = vpop.f32.mrf.mxu0 }
  0xf7   : > { %v543_v54 = vsel %vm540_vm4, %v541_v50, %v542_v51 }
  0xf8   : > { %v545_v56 = vadd.f32 %v543_v54, %v469_v52 }
  0xfa   : > { %v553_v57 = vadd.f32 %v668_v55, %v545_v56 }
  0xfc   : > { %v554_v58 = vmax.f32 %v553_v57, 0.0 }
  0xfe   : > { %v555_v60 = vpack.c.bf16 %v554_v58, %v554_v58 }
 0x100   : > { %v560_v61 = vsel %vm558_vm7, %v555_v60, %v559_v59 }
 0x101   : > { %561 = vst [vmem:[%s168_s28] sm:$0xf] %v560_v61 }
 0x102 PF: > { %s13_s12 = sadd.s32 1, %s774_s12  }
 0x103   : > { %p10_p4 = scmp.ge.s32.totalorder %s13_s12, 4  }
 0x105   :  { %12 = sbr.rel (!%p10_p4) target bundleno = 1 (0x1), region = 66 }

// kernel: _lambda_.14
= control target key start
LH: loop header
LB: loop body
LE: loop exit
PB: predicated region body
PF: predicated region fallthrough
CT: control target
= control target key end

     0   :  { %s625_s12 = smov 0   ;;  %s694_s0 = inlined_call_operand.vmem [shape: bf16[2,9,56], index: 0, kind: input, shape index: {}]   ;;  %s695_s1 = inlined_call_operand.vmem [shape: bf16[3,56,84], index: 1, kind: input, shape index: {}]   ;;  %s696_s2 = inlined_call_operand.vmem [shape: f32[1,84], index: 2, kind: input, shape index: {}]   ;;  %s697_s3 = inlined_call_operand.vmem [shape: bf16[2,7,84], index: 3, kind: output, shape index: {}]  }
   0x1 LB: > { %s479_s13 = sadd.s32 4294967295, %s601_s12   ;;  %p483_p0 = scmp.ge.s32.totalorder %s601_s12, 1  ;;  %s601_s12 = sphi %s625_s12, %s13_s12  }
   0x2   : > { %p137_p1 = scmp.lt.s32.totalorder %s601_s12, 3 }
   0x4   : > { %p138_p2 = pnand %p483_p0, %p137_p1 }
   0x5   : > { %p160_p3 = scmp.lt.s32.totalorder (!%p138_p2), %s479_s13, 1 }
   0x6   : > { %141 = sbr.rel (%p138_p2) target bundleno = 254 (0xfe), region = 32 }
   0xb   : > { %v582_v0 = vld [vmem:[%s695_s1 + $0x18] ss:$0 sps:$4 sm:$0xff]   ;;  %vm209_vm0 = vcmask 1043456   ;;  %v603_v1 = vmov 0.0   ;;  %v583_v2 = vld [vmem:[%s695_s1 + $0x34] ss:$0 sps:$4 sm:$0xff]  }
   0xc   : > { %536 = vmatprep.subr.bf16.mxu0 %v603_v1  ;;  %548 = vmatprep.subr.bf16.mxu1 %v603_v1  ;;  %v211_v3 = vsel %vm209_vm0, %v582_v0, 0  ;;  %v283_v4 = vsel %vm209_vm0, %v583_v2, 0  ;;  %v584_v5 = vld [vmem:[%s695_s1 + $0x10] sm:$0xff]   ;;  %vm604_vm1 = vmmov 0   ;;  %v586_v7 = vld [vmem:[%s695_s1 + $0x8] sm:$0xff]   ;;  %s699_s13 = smov (!%p160_p3, %s479_s13), 1 }
   0xd   : > { %537 = vmatpush3.bf16.msra.mxu0 %v211_v3  ;;  %549 = vmatpush3.bf16.msra.mxu1 %v283_v4  ;;  %v585_v6 = vld [vmem:[%s695_s1 + $0x2c] sm:$0xff]   ;;  %v587_v8 = vld [vmem:[%s695_s1 + $0x24] sm:$0xff]   ;;  %s520_s26 = sshll.u32 %s699_s13, 3  ;;  %v589_v10 = vld [vmem:[%s695_s1 + $0x1c] sm:$0xff]   ;;  %vm205_vm2 = vcmask 457728   ;;  %vm404_vm3 = vcmask 1045504  }
   0xe   : > { %538 = vmatprep.subr.bf16.mxu0 %v603_v1  ;;  %550 = vmatprep.subr.bf16.mxu1 %v603_v1  ;;  %s164_s29 = scalar_lea.vmem %s694_s0, %s520_s26  ;;  %v588_v9 = vld [vmem:[%s695_s1] sm:$0xff]   ;;  %v591_v11 = vld [vmem:[%s695_s1 + $0x50] ss:$0 sps:$4 sm:$0xff]   ;;  %v592_v14 = vld [vmem:[%s695_s1 + $0x48] sm:$0xff]   ;;  %s486_s17 = sshll.u32 %s699_s13, 2  ;;  %vm420_vm4 = vcmask 683008  }
   0xf   : > { %544 = vmatprep.mubr.msk.bf16.mxu0 %vm604_vm1, %v603_v1  ;;  %556 = vmatprep.mubr.msk.bf16.mxu1 %vm604_vm1, %v603_v1  ;;  %v590_v12 = vld [vmem:[%s164_s29] sm:$0x1f]   ;;  %v359_v13 = vsel %vm209_vm0, %v591_v11, 0  ;;  %v594_v16 = vld [vmem:[%s695_s1 + $0x38] sm:$0xff]   ;;  %s168_s22 = scalar_lea.vmem %s697_s3, %s486_s17  ;;  %vm421_vm5 = vsmask.f32 3328 }
  0x10   : > { %v593_v15 = vld [vmem:[%s695_s1 + $0x40] sm:$0xff]   ;;  %vm422_vm6 = vmand %vm420_vm4, %vm421_vm5 }
  0x11   : > { %539 = vmatpush3.bf16.msra.mxu0 %v584_v5  ;;  %551 = vmatpush3.bf16.msra.mxu1 %v585_v6  ;;  %v517_v34 = vld [vmem:[%s696_s2] ss:$0 sm:$0xff] }
  0x12   : > { %540 = vmatprep.subr.bf16.mxu0 %v603_v1  ;;  %552 = vmatprep.subr.bf16.mxu1 %v603_v1  ;;  %v423_v38 = vld [vmem:[%s168_s22] sm:$0xf] }
  0x15   : > { %541 = vmatpush3.bf16.msra.mxu0 %v586_v7  ;;  %553 = vmatpush3.bf16.msra.mxu1 %v587_v8 }
  0x16   : > { %542 = vmatprep.subr.bf16.mxu0 %v603_v1  ;;  %554 = vmatprep.subr.bf16.mxu1 %v603_v1 }
  0x19   : > { %543 = vmatpush3.bf16.msra.mxu0 %v588_v9  ;;  %555 = vmatpush3.bf16.msra.mxu1 %v589_v10 }
  0x1a   : > { %560 = vmatprep.subr.bf16.mxu0 %v603_v1 }
  0x1c   : > { %545 = vmatmul.mubr.msk.bf16.vlgmr.msra.gmra.mxu0 %vm205_vm2, %v590_v12  ;;  %557 = vmatmul.mubr.msk.bf16.vlgmr.msra.gmra.mxu1 %vm205_vm2, %v590_v12 }
  0x1d   : > { %561 = vmatpush3.bf16.msra.mxu0 %v359_v13  ;;  %568 = vmatprep.mubr.msk.bf16.mxu0 %vm604_vm1, %v603_v1 }
  0x1e   : > { %562 = vmatprep.subr.bf16.mxu0 %v603_v1 }
  0x21   : > { %563 = vmatpush3.bf16.msra.mxu0 %v592_v14 }
  0x22   : > { %564 = vmatprep.subr.bf16.mxu0 %v603_v1 }
  0x25   : > { %565 = vmatpush3.bf16.msra.mxu0 %v593_v15 }
  0x26   : > { %566 = vmatprep.subr.bf16.mxu0 %v603_v1 }
  0x29   : > { %567 = vmatpush3.bf16.msra.mxu0 %v594_v16 }
  0x2c   : > { %569 = vmatmul.mubr.msk.bf16.vlgmr.msra.gmra.mxu0 %vm205_vm2, %v590_v12 }
  0xdc   : > { %v247_v17 = vpop.f32.mrf.mxu0  ;;  %v319_v18 = vpop.f32.mrf.mxu1 }
  0xdd   : > { %v326_v26 = vrot.slane %v319_v18, 1 }
  0xde   : > { %v546_v19 = vpop.f32.mrf.mxu0  ;;  %v558_v20 = vpop.f32.mrf.mxu1 }
  0xdf   : > { %v328_v31 = vadd.f32 %v326_v26, %v247_v17 }
  0xe0   : > { %v250_v21 = vpop.f32.mrf.mxu0  ;;  %v322_v22 = vpop.f32.mrf.mxu1 }
  0xe2   : > { %v547_v23 = vpop.f32.mrf.mxu0  ;;  %v559_v24 = vpop.f32.mrf.mxu1 }
  0xec   : > { %v395_v25 = vpop.f32.mrf.mxu0 }
  0xed   : > { %v405_v29 = vrot.slane %v395_v25, 2 }
  0xee   : > { %v570_v27 = vpop.f32.mrf.mxu0 }
  0xf0   : > { %v398_v28 = vpop.f32.mrf.mxu0 }
  0xf1   : > { %v406_v30 = vrot.slane %v398_v28, 2 }
  0xf2   : > { %v571_v32 = vpop.f32.mrf.mxu0 }
  0xf3   : > { %v407_v33 = vsel %vm404_vm3, %v405_v29, %v406_v30 }
  0xf4   : > { %v409_v35 = vadd.f32 %v407_v33, %v328_v31 }
  0xf6   : > { %v417_v36 = vadd.f32 %v517_v34, %v409_v35 }
  0xf8   : > { %v418_v37 = vmax.f32 %v417_v36, 0.0 }
  0xfa   : > { %v419_v39 = vpack.c.bf16 %v418_v37, %v418_v37 }
  0xfc   : > { %v424_v40 = vsel %vm422_vm6, %v419_v39, %v423_v38 }
  0xfd   : > { %425 = vst [vmem:[%s168_s22] sm:$0xf] %v424_v40 }
  0xfe PF: > { %s13_s12 = sadd.s32 1, %s601_s12  }
  0xff   : > { %p10_p4 = scmp.ge.s32.totalorder %s13_s12, 4  }
 0x101   :  { %12 = sbr.rel (!%p10_p4) target bundleno = 1 (0x1), region = 64 }

// kernel: _lambda_.15
= control target key start
LH: loop header
LB: loop body
LE: loop exit
PB: predicated region body
PF: predicated region fallthrough
CT: control target
= control target key end

     0   :  { %s711_s12 = smov 0   ;;  %s819_s0 = inlined_call_operand.vmem [shape: bf16[2,9,84], index: 0, kind: input, shape index: {}]   ;;  %s820_s1 = inlined_call_operand.vmem [shape: bf16[3,84,84], index: 1, kind: input, shape index: {}]   ;;  %s821_s2 = inlined_call_operand.vmem [shape: f32[1,84], index: 2, kind: input, shape index: {}]   ;;  %s822_s3 = inlined_call_operand.vmem [shape: bf16[2,7,84], index: 3, kind: output, shape index: {}]  }
   0x1 LB: > { %s527_s13 = sadd.s32 4294967295, %s687_s12   ;;  %p531_p0 = scmp.ge.s32.totalorder %s687_s12, 1  ;;  %s687_s12 = sphi %s711_s12, %s13_s12  }
   0x2   : > { %p137_p1 = scmp.lt.s32.totalorder %s687_s12, 3 }
   0x4   : > { %p138_p2 = pnand %p531_p0, %p137_p1 }
   0x5   : > { %p160_p3 = scmp.lt.s32.totalorder (!%p138_p2), %s527_s13, 1 }
   0x6   : > { %141 = sbr.rel (%p138_p2) target bundleno = 270 (0x10e), region = 32 }
   0xb   : > { %v662_v0 = vld [vmem:[%s820_s1 + $0x28] ss:$0 sps:$4 sm:$0x33]   ;;  %v689_v1 = vmov 0.0   ;;  %vm225_vm0 = vcmask 1041408   ;;  %v664_v5 = vld [vmem:[%s820_s1 + $0x20] sm:$0xff]  }
   0xc   : > { %604 = vmatprep.subr.bf16.mxu0 %v689_v1  ;;  %620 = vmatprep.subr.bf16.mxu1 %v689_v1  ;;  %v663_v2 = vld [vmem:[%s820_s1 + $0x54] ss:$0 sps:$4 sm:$0x33]   ;;  %v227_v3 = vsel %vm225_vm0, %v662_v0, 0  ;;  %v665_v6 = vld [vmem:[%s820_s1 + $0x4c] sm:$0xff]   ;;  %vm690_vm1 = vmmov 0  }
   0xd   : > { %605 = vmatpush3.bf16.msra.mxu0 %v227_v3  ;;  %v315_v4 = vsel %vm225_vm0, %v663_v2, 0  ;;  %616 = vmatprep.mubr.msk.bf16.mxu0 %vm690_vm1, %v689_v1  ;;  %v666_v7 = vld [vmem:[%s820_s1 + $0x18] sm:$0xff]   ;;  %s824_s13 = smov (!%p160_p3, %s527_s13), 1  ;;  %v667_v8 = vld [vmem:[%s820_s1 + $0x44] sm:$0xff]   ;;  %v668_v9 = vld [vmem:[%s820_s1 + $0x10] sm:$0xff]   ;;  %vm221_vm2 = vcmask 687104  }
   0xe   : > { %621 = vmatpush3.bf16.msra.mxu1 %v315_v4  ;;  %606 = vmatprep.subr.bf16.mxu0 %v689_v1  ;;  %s582_s26 = sshll.u32 %s824_s13, 3  ;;  %v669_v10 = vld [vmem:[%s820_s1 + $0x3c] sm:$0xff]   ;;  %v670_v11 = vld [vmem:[%s820_s1 + $0x8] sm:$0xff]   ;;  %v671_v12 = vld [vmem:[%s820_s1 + $0x34] sm:$0xff]   ;;  %vm452_vm3 = vcmask 1045504   ;;  %s534_s29 = sshll.u32 %s824_s13, 2 }
   0xf   : > { %622 = vmatprep.subr.bf16.mxu1 %v689_v1  ;;  %632 = vmatprep.mubr.msk.bf16.mxu1 %vm690_vm1, %v689_v1  ;;  %s164_s4 = scalar_lea.vmem %s819_s0, %s582_s26  ;;  %v672_v13 = vld [vmem:[%s820_s1] sm:$0xff]   ;;  %v673_v14 = vld [vmem:[%s820_s1 + $0x2c] sm:$0xff]   ;;  %v676_v18 = vld [vmem:[%s820_s1 + $0x78] sm:$0xff]   ;;  %s168_s7 = scalar_lea.vmem %s822_s3, %s534_s29  ;;  %vm468_vm4 = vcmask 683008   ;;  %vm469_vm5 = vsmask.f32 3328 }
  0x10   : > { %v675_v15 = vld [vmem:[%s820_s1 + $0x80] ss:$0 sps:$4 sm:$0x33]   ;;  %v677_v19 = vld [vmem:[%s820_s1 + $0x70] sm:$0xff]   ;;  %v678_v20 = vld [vmem:[%s820_s1 + $0x68] sm:$0xff]  }
  0x11   : > { %607 = vmatpush3.bf16.msra.mxu0 %v664_v5  ;;  %v674_v16 = vld [vmem:[%s164_s4] sm:$0x1f]   ;;  %v407_v17 = vsel %vm225_vm0, %v675_v15, 0  ;;  %v680_v22 = vld [vmem:[%s820_s1 + $0x58] sm:$0xff]   ;;  %vm470_vm6 = vmand %vm468_vm4, %vm469_vm5 }
  0x12   : > { %623 = vmatpush3.bf16.msra.mxu1 %v665_v6  ;;  %608 = vmatprep.subr.bf16.mxu0 %v689_v1  ;;  %v679_v21 = vld [vmem:[%s820_s1 + $0x60] sm:$0xff]  }
  0x13   : > { %624 = vmatprep.subr.bf16.mxu1 %v689_v1  ;;  %v579_v40 = vld [vmem:[%s821_s2] ss:$0 sm:$0xff] }
  0x14   : > { %v471_v44 = vld [vmem:[%s168_s7] sm:$0xf] }
  0x15   : > { %609 = vmatpush3.bf16.msra.mxu0 %v666_v7 }
  0x16   : > { %625 = vmatpush3.bf16.msra.mxu1 %v667_v8  ;;  %610 = vmatprep.subr.bf16.mxu0 %v689_v1 }
  0x17   : > { %626 = vmatprep.subr.bf16.mxu1 %v689_v1 }
  0x19   : > { %611 = vmatpush3.bf16.msra.mxu0 %v668_v9 }
  0x1a   : > { %627 = vmatpush3.bf16.msra.mxu1 %v669_v10  ;;  %612 = vmatprep.subr.bf16.mxu0 %v689_v1 }
  0x1b   : > { %628 = vmatprep.subr.bf16.mxu1 %v689_v1 }
  0x1d   : > { %613 = vmatpush3.bf16.msra.mxu0 %v670_v11 }
  0x1e   : > { %629 = vmatpush3.bf16.msra.mxu1 %v671_v12  ;;  %614 = vmatprep.subr.bf16.mxu0 %v689_v1 }
  0x1f   : > { %630 = vmatprep.subr.bf16.mxu1 %v689_v1 }
  0x21   : > { %615 = vmatpush3.bf16.msra.mxu0 %v672_v13 }
  0x22   : > { %631 = vmatpush3.bf16.msra.mxu1 %v673_v14  ;;  %636 = vmatprep.subr.bf16.mxu0 %v689_v1 }
  0x24   : > { %617 = vmatmul.mubr.msk.bf16.vlgmr.msra.gmra.mxu0 %vm221_vm2, %v674_v16 }
  0x25   : > { %633 = vmatmul.mubr.msk.bf16.vlgmr.msra.gmra.mxu1 %vm221_vm2, %v674_v16  ;;  %637 = vmatpush3.bf16.msra.mxu0 %v407_v17 }
  0x26   : > { %638 = vmatprep.subr.bf16.mxu0 %v689_v1  ;;  %648 = vmatprep.mubr.msk.bf16.mxu0 %vm690_vm1, %v689_v1 }
  0x29   : > { %639 = vmatpush3.bf16.msra.mxu0 %v676_v18 }
  0x2a   : > { %640 = vmatprep.subr.bf16.mxu0 %v689_v1 }
  0x2d   : > { %641 = vmatpush3.bf16.msra.mxu0 %v677_v19 }
  0x2e   : > { %642 = vmatprep.subr.bf16.mxu0 %v689_v1 }
  0x31   : > { %643 = vmatpush3.bf16.msra.mxu0 %v678_v20 }
  0x32   : > { %644 = vmatprep.subr.bf16.mxu0 %v689_v1 }
  0x35   : > { %645 = vmatpush3.bf16.msra.mxu0 %v679_v21 }
  0x36   : > { %646 = vmatprep.subr.bf16.mxu0 %v689_v1 }
  0x39   : > { %647 = vmatpush3.bf16.msra.mxu0 %v680_v22 }
  0x3c   : > { %649 = vmatmul.mubr.msk.bf16.vlgmr.msra.gmra.mxu0 %vm221_vm2, %v674_v16 }
  0xe4   : > { %v263_v23 = vpop.f32.mrf.mxu0 }
  0xe5   : > { %v351_v24 = vpop.f32.mrf.mxu1 }
  0xe6   : > { %v618_v25 = vpop.f32.mrf.mxu0  ;;  %v358_v32 = vrot.slane %v351_v24, 1 }
  0xe7   : > { %v634_v26 = vpop.f32.mrf.mxu1 }
  0xe8   : > { %v266_v27 = vpop.f32.mrf.mxu0  ;;  %v360_v37 = vadd.f32 %v358_v32, %v263_v23 }
  0xe9   : > { %v354_v28 = vpop.f32.mrf.mxu1 }
  0xea   : > { %v619_v29 = vpop.f32.mrf.mxu0 }
  0xeb   : > { %v635_v30 = vpop.f32.mrf.mxu1 }
  0xfc   : > { %v443_v31 = vpop.f32.mrf.mxu0 }
  0xfd   : > { %v453_v35 = vrot.slane %v443_v31, 2 }
  0xfe   : > { %v650_v33 = vpop.f32.mrf.mxu0 }
 0x100   : > { %v446_v34 = vpop.f32.mrf.mxu0 }
 0x101   : > { %v454_v36 = vrot.slane %v446_v34, 2 }
 0x102   : > { %v651_v38 = vpop.f32.mrf.mxu0 }
 0x103   : > { %v455_v39 = vsel %vm452_vm3, %v453_v35, %v454_v36 }
 0x104   : > { %v457_v41 = vadd.f32 %v455_v39, %v360_v37 }
 0x106   : > { %v465_v42 = vadd.f32 %v579_v40, %v457_v41 }
 0x108   : > { %v466_v43 = vmax.f32 %v465_v42, 0.0 }
 0x10a   : > { %v467_v45 = vpack.c.bf16 %v466_v43, %v466_v43 }
 0x10c   : > { %v472_v46 = vsel %vm470_vm6, %v467_v45, %v471_v44 }
 0x10d   : > { %473 = vst [vmem:[%s168_s7] sm:$0xf] %v472_v46 }
 0x10e PF: > { %s13_s12 = sadd.s32 1, %s687_s12  }
 0x10f   : > { %p10_p4 = scmp.ge.s32.totalorder %s13_s12, 4  }
 0x111   :  { %12 = sbr.rel (!%p10_p4) target bundleno = 1 (0x1), region = 64 }

</bundles_post_ra>
